<compile_context>
chip_gen: v6e
topology: v6e:2x2x1
jax: 0.10.0
libtpu: 0.0.40
codegen_flags: <defaults>
</compile_context>

<pallas_src>
import functools

import jax
import jax.numpy as jnp
from jax.experimental import pallas as pl
from jax.experimental.pallas import tpu as pltpu

NEG_SLOPE = 0.2
BN_EPS = 1e-5
LANE = 128

# Keep the fused (VMEM-resident y) BN path only while the y scratch is small
# enough to coexist with double-buffered input/output tiles under the 32 MiB
# VMEM cap on every generation (v7x has only 64 MiB physical VMEM).
Y_RESIDENT_BUDGET_BYTES = 8 * 1024 * 1024

CHANNEL_MULT = 16
DATA_SIZE = (1, 28, 28)
CONV_CFG = (
    # (in_ch, out_ch, kernel, stride, pad, use_bn)
    (1,                 CHANNEL_MULT * 1,  4, 1, 1, False),
    (CHANNEL_MULT * 1,  CHANNEL_MULT * 2,  4, 2, 1, True),
    (CHANNEL_MULT * 2,  CHANNEL_MULT * 4,  4, 2, 1, True),
    (CHANNEL_MULT * 4,  CHANNEL_MULT * 8,  4, 2, 1, True),
    (CHANNEL_MULT * 8,  CHANNEL_MULT * 16, 3, 2, 1, True),
)


def _compiler_params(semantics):
    return pltpu.CompilerParams(dimension_semantics=semantics,
                                vmem_limit_bytes=32 * 1024 * 1024)


def _round_up(x, m):
    return ((x + m - 1) // m) * m


def _tiling(M):
    """(tile_m, M_pad): tile_m multiple of 16 (bf16 sublane packing)."""
    if M >= 512:
        return 512, _round_up(M, 512)
    t = _round_up(M, 16)
    return t, t


def _leaky_relu(y):
    return jnp.where(y >= 0.0, y, NEG_SLOPE * y)


# ----------------------------------------------------------------------------
# Pallas kernels
# ----------------------------------------------------------------------------
def _gemm_bias_act_kernel(x_ref, w_ref, b_ref, o_ref):
    """GEMM (bf16 operands, f32 accum) + bias + LeakyReLU -> bf16."""
    y = jnp.dot(x_ref[...], w_ref[...], preferred_element_type=jnp.float32)
    y = y + b_ref[...]
    o_ref[...] = _leaky_relu(y).astype(o_ref.dtype)


def _gemm_bn_act_fused_kernel(x_ref, w_ref, g_ref, beta_ref, o_ref,
                              y_vmem, sum_ref, ssq_ref, *, m_real):
    """Single-call fused GEMM + train-mode BN + LeakyReLU.

    grid = (2, n_tiles).  Phase 0: GEMM tile -> VMEM-resident y scratch,
    accumulate per-feature sum / sum-of-squares (f32).  Phase 1: normalize,
    affine, LeakyReLU, store bf16.  y never touches HBM.
    """
    ph = pl.program_id(0)
    i = pl.program_id(1)

    @pl.when(jnp.logical_and(ph == 0, i == 0))
    def _init():
        sum_ref[...] = jnp.zeros_like(sum_ref)
        ssq_ref[...] = jnp.zeros_like(ssq_ref)

    @pl.when(ph == 0)
    def _gemm_and_stats():
        y = jnp.dot(x_ref[...], w_ref[...], preferred_element_type=jnp.float32)
        y_vmem[i] = y.astype(jnp.bfloat16)
        sum_ref[...] += jnp.sum(y, axis=0, keepdims=True)
        ssq_ref[...] += jnp.sum(y * y, axis=0, keepdims=True)

    @pl.when(ph == 1)
    def _normalize():
        inv_m = 1.0 / float(m_real)
        mean = sum_ref[...] * inv_m
        var = jnp.maximum(ssq_ref[...] * inv_m - mean * mean, 0.0)
        scale = g_ref[...] * jax.lax.rsqrt(var + BN_EPS)
        shift = beta_ref[...] - mean * scale
        y = y_vmem[i].astype(jnp.float32)
        o_ref[...] = _leaky_relu(y * scale + shift).astype(o_ref.dtype)


def _gemm_stats_kernel(x_ref, w_ref, y_ref, sum_ref, ssq_ref):
    """Fallback pass 1: GEMM (y stored bf16) + batch-stat accumulation."""
    y = jnp.dot(x_ref[...], w_ref[...], preferred_element_type=jnp.float32)
    y_ref[...] = y.astype(y_ref.dtype)

    @pl.when(pl.program_id(0) == 0)
    def _():
        sum_ref[...] = jnp.zeros_like(sum_ref)
        ssq_ref[...] = jnp.zeros_like(ssq_ref)

    sum_ref[...] += jnp.sum(y, axis=0, keepdims=True)
    ssq_ref[...] += jnp.sum(y * y, axis=0, keepdims=True)


def _bn_act_kernel(y_ref, sum_ref, ssq_ref, g_ref, beta_ref, o_ref, *, m_real):
    """Fallback pass 2: BN (biased var, eps=1e-5) + affine + LeakyReLU."""
    inv_m = 1.0 / float(m_real)
    mean = sum_ref[...] * inv_m
    var = jnp.maximum(ssq_ref[...] * inv_m - mean * mean, 0.0)
    scale = g_ref[...] * jax.lax.rsqrt(var + BN_EPS)
    shift = beta_ref[...] - mean * scale
    y = y_ref[...].astype(jnp.float32)
    o_ref[...] = _leaky_relu(y * scale + shift).astype(o_ref.dtype)


# ----------------------------------------------------------------------------
# Fused GEMM (+bias | +train-mode BN) + LeakyReLU wrapper
# ----------------------------------------------------------------------------
def fused_gemm_act(x, w, b, gamma, beta, use_bn):
    """x: (M, K), w: (K, N), b/gamma/beta: (N,) -> (M, N) bfloat16."""
    M, K = x.shape
    N = w.shape[1]
    N_pad = _round_up(N, LANE)                 # lane-dense stores / MXU columns
    tile_m, M_pad = _tiling(M)
    n_tiles = M_pad // tile_m

    xp = jnp.pad(x.astype(jnp.bfloat16), ((0, M_pad - M), (0, 0)))
    wp = jnp.pad(w.astype(jnp.bfloat16), ((0, 0), (0, N_pad - N)))

    x_spec = pl.BlockSpec((tile_m, K), lambda i: (i, 0))
    w_spec = pl.BlockSpec((K, N_pad), lambda i: (0, 0))          # resident
    vec_spec = pl.BlockSpec((1, N_pad), lambda i: (0, 0))        # resident
    row_spec = pl.BlockSpec((tile_m, N_pad), lambda i: (i, 0))

    if not use_bn:
        bp = jnp.pad(b.astype(jnp.float32).reshape(1, N),
                     ((0, 0), (0, N_pad - N)))
        y = pl.pallas_call(
            _gemm_bias_act_kernel,
            out_shape=jax.ShapeDtypeStruct((M_pad, N_pad), jnp.bfloat16),
            grid=(n_tiles,),
            in_specs=[x_spec, w_spec, vec_spec],
            out_specs=row_spec,
            compiler_params=_compiler_params(("parallel",)),
        )(xp, wp, bp)
        return y[:M, :N]

    # NOTE: conv/linear bias is intentionally dropped when followed by
    # train-mode BN -- it is exactly cancelled by the batch-mean subtraction.
    gp = jnp.pad(gamma.astype(jnp.float32).reshape(1, N),
                 ((0, 0), (0, N_pad - N)))
    btp = jnp.pad(beta.astype(jnp.float32).reshape(1, N),
                  ((0, 0), (0, N_pad - N)))

    y_resident_bytes = M_pad * N_pad * 2       # bf16 VMEM scratch for y
    if y_resident_bytes <= Y_RESIDENT_BUDGET_BYTES:
        # Single fused call; grid = (phase, m_tile).  Phase 0 streams x tiles,
        # phase 1 keeps x parked on the last block (no redundant DMA) and the
        # output block is only written/committed during phase 1.
        x_spec2 = pl.BlockSpec(
            (tile_m, K),
            lambda ph, i: ((1 - ph) * i + ph * (n_tiles - 1), 0))
        w_spec2 = pl.BlockSpec((K, N_pad), lambda ph, i: (0, 0))
        vec_spec2 = pl.BlockSpec((1, N_pad), lambda ph, i: (0, 0))
        out_spec2 = pl.BlockSpec((tile_m, N_pad), lambda ph, i: (ph * i, 0))
        out = pl.pallas_call(
            functools.partial(_gemm_bn_act_fused_kernel, m_real=M),
            out_shape=jax.ShapeDtypeStruct((M_pad, N_pad), jnp.bfloat16),
            grid=(2, n_tiles),
            in_specs=[x_spec2, w_spec2, vec_spec2, vec_spec2],
            out_specs=out_spec2,
            scratch_shapes=[
                pltpu.VMEM((n_tiles, tile_m, N_pad), jnp.bfloat16),  # resident y
                pltpu.VMEM((1, N_pad), jnp.float32),                 # sum
                pltpu.VMEM((1, N_pad), jnp.float32),                 # sum sq
            ],
            compiler_params=_compiler_params(("arbitrary", "arbitrary")),
        )(xp, wp, gp, btp)
        return out[:M, :N]

    # Fallback (large M): two-pass BN with a bf16 y round-trip.
    y, s1, s2 = pl.pallas_call(
        _gemm_stats_kernel,
        out_shape=(
            jax.ShapeDtypeStruct((M_pad, N_pad), jnp.bfloat16),
            jax.ShapeDtypeStruct((1, N_pad), jnp.float32),
            jax.ShapeDtypeStruct((1, N_pad), jnp.float32),
        ),
        grid=(n_tiles,),
        in_specs=[x_spec, w_spec],
        out_specs=(row_spec, vec_spec, vec_spec),
        compiler_params=_compiler_params(("arbitrary",)),
    )(xp, wp)
    out = pl.pallas_call(
        functools.partial(_bn_act_kernel, m_real=M),
        out_shape=jax.ShapeDtypeStruct((M_pad, N_pad), jnp.bfloat16),
        grid=(n_tiles,),
        in_specs=[row_spec, vec_spec, vec_spec, vec_spec, vec_spec],
        out_specs=row_spec,
        compiler_params=_compiler_params(("parallel",)),
    )(y, s1, s2, gp, btp)
    return out[:M, :N]


# ----------------------------------------------------------------------------
# Glue: NHWC im2col (bf16) + conv layer (pure reshapes / strided slices)
# ----------------------------------------------------------------------------
def im2col_nhwc(x, kh, kw, stride, pad):
    B, H, W, C = x.shape
    OH = (H + 2 * pad - kh) // stride + 1
    OW = (W + 2 * pad - kw) // stride + 1
    xp = jnp.pad(x, ((0, 0), (pad, pad), (pad, pad), (0, 0)))
    cols = []
    for i in range(kh):
        for j in range(kw):
            cols.append(xp[:, i:i + stride * OH:stride, j:j + stride * OW:stride, :])
    p = jnp.stack(cols, axis=3)                       # (B, OH, OW, kh*kw, C)
    p = p.reshape(B * OH * OW, kh * kw * C)           # feature order (ki, kj, c)
    return p, OH, OW


def conv_layer(x_nhwc, w, b, gamma, beta, stride, pad, use_bn):
    B = x_nhwc.shape[0]
    OC, IC, KH, KW = w.shape
    patches, OH, OW = im2col_nhwc(x_nhwc, KH, KW, stride, pad)
    # (OC, IC, KH, KW) -> (KH, KW, IC, OC) -> (KH*KW*IC, OC): matches (ki,kj,c)
    w2 = jnp.transpose(w, (2, 3, 1, 0)).reshape(KH * KW * IC, OC)
    y = fused_gemm_act(patches, w2, b, gamma, beta, use_bn)
    return y.reshape(B, OH, OW, OC)                   # stays NHWC, bf16


# ----------------------------------------------------------------------------
# Parameter construction (deterministic, shapes from nn.Module __init__)
# ----------------------------------------------------------------------------
def init_params(key, output_size):
    conv_params = []
    for (ic, oc, k, _s, _p, _bn) in CONV_CFG:
        key, kw_, kb_ = jax.random.split(key, 3)
        fan_in = ic * k * k
        conv_params.append(dict(
            w=jax.random.normal(kw_, (oc, ic, k, k), jnp.float32) / jnp.sqrt(float(fan_in)),
            b=jax.random.normal(kb_, (oc,), jnp.float32) * 0.01,
            gamma=jnp.ones((oc,), jnp.float32),    # PyTorch BN default init
            beta=jnp.zeros((oc,), jnp.float32),
        ))
    # spatial trace for 28x28 input: 28 -> 27 -> 13 -> 6 -> 3 -> 2
    flat_fts = (CHANNEL_MULT * 16) * 2 * 2             # 256 * 2 * 2 = 1024
    key, kw_, kb_ = jax.random.split(key, 3)
    lin_params = dict(
        w=jax.random.normal(kw_, (output_size, flat_fts), jnp.float32) / jnp.sqrt(float(flat_fts)),
        b=jax.random.normal(kb_, (output_size,), jnp.float32) * 0.01,
        gamma=jnp.ones((output_size,), jnp.float32),
        beta=jnp.zeros((output_size,), jnp.float32),
    )
    return conv_params, lin_params, flat_fts


# ----------------------------------------------------------------------------
# Full forward (mirrors CNN_Encoder.forward), jit-compiled end to end
# ----------------------------------------------------------------------------
@jax.jit
def cnn_encoder_forward(x, conv_params, lin_params):
    # x.view(-1, *data_size); single NCHW -> NHWC transpose; bf16 activations.
    x = x.reshape(-1, *DATA_SIZE).transpose(0, 2, 3, 1).astype(jnp.bfloat16)
    for (ic, oc, k, s, p, use_bn), prm in zip(CONV_CFG, conv_params):
        x = conv_layer(x, prm["w"], prm["b"], prm["gamma"], prm["beta"],
                       s, p, use_bn)
    # PyTorch flattens NCHW: single transpose back at the flatten boundary.
    B = x.shape[0]
    x = x.transpose(0, 3, 1, 2).reshape(B, -1)         # x.view(-1, flat_fts)
    # Linear -> BatchNorm1d -> LeakyReLU, same fused GEMM/BN path.
    out = fused_gemm_act(x, lin_params["w"].T, lin_params["b"],
                         lin_params["gamma"], lin_params["beta"], use_bn=True)
    return out.astype(jnp.float32)


if __name__ == "__main__":
    key = jax.random.PRNGKey(0)
    key, k_param, k_x = jax.random.split(key, 3)

    output_size = 32
    conv_params, lin_params, flat_fts = init_params(k_param, output_size)

    batch = 2
    x = jax.random.normal(k_x, (batch, 1, 28, 28), jnp.float32)

    out = cnn_encoder_forward(x, conv_params, lin_params)
    out = jax.block_until_ready(out)

    assert out.shape == (batch, output_size), out.shape
    assert bool(jnp.all(jnp.isfinite(out)))
    print("KERNEL_OK")
</pallas_src>

<mosaic_0001>
module attributes {stable_mosaic.version = 11 : i64} {
  func.func @_gemm_bias_act_kernel(%arg0: i32, %arg1: memref<512x16xbf16, #tpu.memory_space<vmem>>, %arg2: memref<16x128xbf16, #tpu.memory_space<vmem>>, %arg3: memref<1x128xf32, #tpu.memory_space<vmem>>, %arg4: memref<512x128xbf16, #tpu.memory_space<vmem>>) attributes {dimension_semantics = [#tpu.dimension_semantics<parallel>], iteration_bounds = array<i64: 3>, scalar_prefetch = 0 : i64, scratch_operands = 0 : i64, tpu.core_type = #tpu.core_type<tc>, window_params = [{transform_indices = @transform_0, window_bounds = array<i64: 512, 16>}, {pipeline_mode = #tpu.pipeline_mode<synchronous>, transform_indices = @transform_1, window_bounds = array<i64: 16, 128>}, {pipeline_mode = #tpu.pipeline_mode<synchronous>, transform_indices = @transform_2, window_bounds = array<i64: 1, 128>}, {transform_indices = @transform_3, window_bounds = array<i64: 512, 128>}]} {
    %c0 = arith.constant 0 : index
    %c0_0 = arith.constant 0 : index
    %0 = vector.load %arg1[%c0, %c0_0] : memref<512x16xbf16, #tpu.memory_space<vmem>>, vector<512x16xbf16>
    %c0_1 = arith.constant 0 : index
    %c0_2 = arith.constant 0 : index
    %1 = vector.load %arg2[%c0_1, %c0_2] : memref<16x128xbf16, #tpu.memory_space<vmem>>, vector<16x128xbf16>
    %cst = arith.constant dense<0.000000e+00> : vector<512x128xf32>
    %2 = tpu.matmul %0, %1, %cst {dimension_numbers = #tpu.dot_dimension_numbers<[1], [0], [0], [1], [0, 0, 1, 1], [], []>} : vector<512x16xbf16>, vector<16x128xbf16>, vector<512x128xf32> -> vector<512x128xf32>
    %c0_3 = arith.constant 0 : index
    %c0_4 = arith.constant 0 : index
    %3 = vector.load %arg3[%c0_3, %c0_4] : memref<1x128xf32, #tpu.memory_space<vmem>>, vector<1x128xf32>
    %4 = vector.broadcast %3 : vector<1x128xf32> to vector<512x128xf32>
    %5 = arith.addf %2, %4 : vector<512x128xf32>
    %cst_5 = arith.constant 0.000000e+00 : f32
    %6 = vector.broadcast %cst_5 : f32 to vector<512x128xf32>
    %7 = arith.cmpf oge, %5, %6 : vector<512x128xf32>
    %cst_6 = arith.constant 2.000000e-01 : f32
    %8 = vector.broadcast %cst_6 : f32 to vector<512x128xf32>
    %9 = arith.mulf %8, %5 : vector<512x128xf32>
    %10 = arith.select %7, %5, %9 : vector<512x128xi1>, vector<512x128xf32>
    %11 = arith.truncf %10 : vector<512x128xf32> to vector<512x128xbf16>
    %c0_7 = arith.constant 0 : index
    %c0_8 = arith.constant 0 : index
    %12 = vector.load %arg4[%c0_7, %c0_8] : memref<512x128xbf16, #tpu.memory_space<vmem>>, vector<512x128xbf16>
    tpu.vector_store %arg4[%c0_7, %c0_8], %11 {strides = array<i32>} : memref<512x128xbf16, #tpu.memory_space<vmem>>, vector<512x128xbf16>,
    return
  }
  func.func @transform_0(%arg0: i32) -> (i32, i32) {
    %c0_i32 = arith.constant 0 : i32
    %c0_i32_0 = arith.constant 0 : i32
    return %arg0, %c0_i32 : i32, i32
  }
  func.func @transform_1(%arg0: i32) -> (i32, i32) {
    %c0_i32 = arith.constant 0 : i32
    %c0_i32_0 = arith.constant 0 : i32
    %c0_i32_1 = arith.constant 0 : i32
    return %c0_i32, %c0_i32_0 : i32, i32
  }
  func.func @transform_2(%arg0: i32) -> (i32, i32) {
    %c0_i32 = arith.constant 0 : i32
    %c0_i32_0 = arith.constant 0 : i32
    %c0_i32_1 = arith.constant 0 : i32
    return %c0_i32, %c0_i32_0 : i32, i32
  }
  func.func @transform_3(%arg0: i32) -> (i32, i32) {
    %c0_i32 = arith.constant 0 : i32
    %c0_i32_0 = arith.constant 0 : i32
    return %arg0, %c0_i32 : i32, i32
  }
}

module attributes {stable_mosaic.version = 11 : i64} {
  func.func @_gemm_bn_act_fused_kernel(%arg0: i32, %arg1: i32, %arg2: memref<352x256xbf16, #tpu.memory_space<vmem>>, %arg3: memref<256x128xbf16, #tpu.memory_space<vmem>>, %arg4: memref<1x128xf32, #tpu.memory_space<vmem>>, %arg5: memref<1x128xf32, #tpu.memory_space<vmem>>, %arg6: memref<352x128xbf16, #tpu.memory_space<vmem>>, %arg7: memref<1x352x128xbf16, #tpu.memory_space<vmem>>, %arg8: memref<1x128xf32, #tpu.memory_space<vmem>>, %arg9: memref<1x128xf32, #tpu.memory_space<vmem>>) attributes {dimension_semantics = [#tpu.dimension_semantics<arbitrary>, #tpu.dimension_semantics<arbitrary>], iteration_bounds = array<i64: 2, 1>, scalar_prefetch = 0 : i64, scratch_operands = 3 : i64, tpu.core_type = #tpu.core_type<tc>, window_params = [{transform_indices = @transform_0, window_bounds = array<i64: 352, 256>}, {pipeline_mode = #tpu.pipeline_mode<synchronous>, transform_indices = @transform_1, window_bounds = array<i64: 256, 128>}, {pipeline_mode = #tpu.pipeline_mode<synchronous>, transform_indices = @transform_2, window_bounds = array<i64: 1, 128>}, {pipeline_mode = #tpu.pipeline_mode<synchronous>, transform_indices = @transform_3, window_bounds = array<i64: 1, 128>}, {transform_indices = @transform_4, window_bounds = array<i64: 352, 128>}]} {
    %c0_i32 = arith.constant 0 : i32
    %0 = arith.cmpi eq, %arg0, %c0_i32 : i32
    %c0_i32_0 = arith.constant 0 : i32
    %1 = arith.cmpi eq, %arg1, %c0_i32_0 : i32
    %2 = arith.andi %0, %1 : i1
    %3 = arith.extui %2 : i1 to i32
    %c0_i32_1 = arith.constant 0 : i32
    %4 = arith.cmpi ne, %3, %c0_i32_1 : i32
    scf.if %4 {
      %cst = arith.constant 0.000000e+00 : f32
      %11 = vector.broadcast %cst : f32 to vector<1x128xf32>
      %c0 = arith.constant 0 : index
      %c0_5 = arith.constant 0 : index
      %12 = vector.load %arg8[%c0, %c0_5] : memref<1x128xf32, #tpu.memory_space<vmem>>, vector<1x128xf32>
      tpu.vector_store %arg8[%c0, %c0_5], %11 {strides = array<i32>} : memref<1x128xf32, #tpu.memory_space<vmem>>, vector<1x128xf32>,
      %cst_6 = arith.constant 0.000000e+00 : f32
      %13 = vector.broadcast %cst_6 : f32 to vector<1x128xf32>
      %c0_7 = arith.constant 0 : index
      %c0_8 = arith.constant 0 : index
      %14 = vector.load %arg9[%c0_7, %c0_8] : memref<1x128xf32, #tpu.memory_space<vmem>>, vector<1x128xf32>
      tpu.vector_store %arg9[%c0_7, %c0_8], %13 {strides = array<i32>} : memref<1x128xf32, #tpu.memory_space<vmem>>, vector<1x128xf32>,
    } else {
    }
    %c0_i32_2 = arith.constant 0 : i32
    %5 = arith.cmpi eq, %arg0, %c0_i32_2 : i32
    %6 = arith.extui %5 : i1 to i32
    %c0_i32_3 = arith.constant 0 : i32
    %7 = arith.cmpi ne, %6, %c0_i32_3 : i32
    scf.if %7 {
      %c0 = arith.constant 0 : index
      %c0_5 = arith.constant 0 : index
      %11 = vector.load %arg2[%c0, %c0_5] : memref<352x256xbf16, #tpu.memory_space<vmem>>, vector<352x256xbf16>
      %c0_6 = arith.constant 0 : index
      %c0_7 = arith.constant 0 : index
      %12 = vector.load %arg3[%c0_6, %c0_7] : memref<256x128xbf16, #tpu.memory_space<vmem>>, vector<256x128xbf16>
      %cst = arith.constant dense<0.000000e+00> : vector<352x128xf32>
      %13 = tpu.matmul %11, %12, %cst {dimension_numbers = #tpu.dot_dimension_numbers<[1], [0], [0], [1], [0, 0, 1, 1], [], []>} : vector<352x256xbf16>, vector<256x128xbf16>, vector<352x128xf32> -> vector<352x128xf32>
      %14 = arith.truncf %13 : vector<352x128xf32> to vector<352x128xbf16>
      %15 = arith.index_cast %arg1 : i32 to index
      %c0_8 = arith.constant 0 : index
      %c0_9 = arith.constant 0 : index
      %16 = vector.load %arg7[%15, %c0_8, %c0_9] : memref<1x352x128xbf16, #tpu.memory_space<vmem>>, vector<1x352x128xbf16>
      %17 = vector.shape_cast %16 : vector<1x352x128xbf16> to vector<352x128xbf16>
      %18 = vector.shape_cast %14 : vector<352x128xbf16> to vector<1x352x128xbf16>
      tpu.vector_store %arg7[%15, %c0_8, %c0_9], %18 {strides = array<i32>} : memref<1x352x128xbf16, #tpu.memory_space<vmem>>, vector<1x352x128xbf16>,
      %c0_10 = arith.constant 0 : index
      %c0_11 = arith.constant 0 : index
      %19 = vector.load %arg8[%c0_10, %c0_11] : memref<1x128xf32, #tpu.memory_space<vmem>>, vector<1x128xf32>
      %cst_12 = arith.constant dense<0.000000e+00> : vector<128xf32>
      %20 = vector.multi_reduction <add>, %13, %cst_12 [0] : vector<352x128xf32> to vector<128xf32>
      %21 = vector.shape_cast %20 : vector<128xf32> to vector<1x128xf32>
      %22 = arith.addf %19, %21 : vector<1x128xf32>
      %c0_13 = arith.constant 0 : index
      %c0_14 = arith.constant 0 : index
      %23 = vector.load %arg8[%c0_13, %c0_14] : memref<1x128xf32, #tpu.memory_space<vmem>>, vector<1x128xf32>
      tpu.vector_store %arg8[%c0_13, %c0_14], %22 {strides = array<i32>} : memref<1x128xf32, #tpu.memory_space<vmem>>, vector<1x128xf32>,
      %c0_15 = arith.constant 0 : index
      %c0_16 = arith.constant 0 : index
      %24 = vector.load %arg9[%c0_15, %c0_16] : memref<1x128xf32, #tpu.memory_space<vmem>>, vector<1x128xf32>
      %25 = arith.mulf %13, %13 : vector<352x128xf32>
      %cst_17 = arith.constant dense<0.000000e+00> : vector<128xf32>
      %26 = vector.multi_reduction <add>, %25, %cst_17 [0] : vector<352x128xf32> to vector<128xf32>
      %27 = vector.shape_cast %26 : vector<128xf32> to vector<1x128xf32>
      %28 = arith.addf %24, %27 : vector<1x128xf32>
      %c0_18 = arith.constant 0 : index
      %c0_19 = arith.constant 0 : index
      %29 = vector.load %arg9[%c0_18, %c0_19] : memref<1x128xf32, #tpu.memory_space<vmem>>, vector<1x128xf32>
      tpu.vector_store %arg9[%c0_18, %c0_19], %28 {strides = array<i32>} : memref<1x128xf32, #tpu.memory_space<vmem>>, vector<1x128xf32>,
    } else {
    }
    %c1_i32 = arith.constant 1 : i32
    %8 = arith.cmpi eq, %arg0, %c1_i32 : i32
    %9 = arith.extui %8 : i1 to i32
    %c0_i32_4 = arith.constant 0 : i32
    %10 = arith.cmpi ne, %9, %c0_i32_4 : i32
    scf.if %10 {
      %c0 = arith.constant 0 : index
      %c0_5 = arith.constant 0 : index
      %11 = vector.load %arg8[%c0, %c0_5] : memref<1x128xf32, #tpu.memory_space<vmem>>, vector<1x128xf32>
      %cst = arith.constant 2.958580e-03 : f32
      %12 = vector.broadcast %cst : f32 to vector<1x128xf32>
      %13 = arith.mulf %11, %12 : vector<1x128xf32>
      %c0_6 = arith.constant 0 : index
      %c0_7 = arith.constant 0 : index
      %14 = vector.load %arg9[%c0_6, %c0_7] : memref<1x128xf32, #tpu.memory_space<vmem>>, vector<1x128xf32>
      %cst_8 = arith.constant 2.958580e-03 : f32
      %15 = vector.broadcast %cst_8 : f32 to vector<1x128xf32>
      %16 = arith.mulf %14, %15 : vector<1x128xf32>
      %17 = arith.mulf %13, %13 : vector<1x128xf32>
      %18 = arith.subf %16, %17 : vector<1x128xf32>
      %cst_9 = arith.constant 0.000000e+00 : f32
      %19 = vector.broadcast %cst_9 : f32 to vector<1x128xf32>
      %20 = arith.maximumf %18, %19 : vector<1x128xf32>
      %c0_10 = arith.constant 0 : index
      %c0_11 = arith.constant 0 : index
      %21 = vector.load %arg4[%c0_10, %c0_11] : memref<1x128xf32, #tpu.memory_space<vmem>>, vector<1x128xf32>
      %cst_12 = arith.constant 9.99999974E-6 : f32
      %22 = vector.broadcast %cst_12 : f32 to vector<1x128xf32>
      %23 = arith.addf %20, %22 : vector<1x128xf32>
      %24 = math.rsqrt %23 : vector<1x128xf32>
      %25 = arith.mulf %21, %24 : vector<1x128xf32>
      %c0_13 = arith.constant 0 : index
      %c0_14 = arith.constant 0 : index
      %26 = vector.load %arg5[%c0_13, %c0_14] : memref<1x128xf32, #tpu.memory_space<vmem>>, vector<1x128xf32>
      %27 = arith.mulf %13, %25 : vector<1x128xf32>
      %28 = arith.subf %26, %27 : vector<1x128xf32>
      %29 = arith.index_cast %arg1 : i32 to index
      %c0_15 = arith.constant 0 : index
      %c0_16 = arith.constant 0 : index
      %30 = vector.load %arg7[%29, %c0_15, %c0_16] : memref<1x352x128xbf16, #tpu.memory_space<vmem>>, vector<1x352x128xbf16>
      %31 = vector.shape_cast %30 : vector<1x352x128xbf16> to vector<352x128xbf16>
      %32 = arith.extf %31 : vector<352x128xbf16> to vector<352x128xf32>
      %33 = vector.broadcast %25 : vector<1x128xf32> to vector<352x128xf32>
      %34 = arith.mulf %32, %33 : vector<352x128xf32>
      %35 = vector.broadcast %28 : vector<1x128xf32> to vector<352x128xf32>
      %36 = arith.addf %34, %35 : vector<352x128xf32>
      %cst_17 = arith.constant 0.000000e+00 : f32
      %37 = vector.broadcast %cst_17 : f32 to vector<352x128xf32>
      %38 = arith.cmpf oge, %36, %37 : vector<352x128xf32>
      %cst_18 = arith.constant 2.000000e-01 : f32
      %39 = vector.broadcast %cst_18 : f32 to vector<352x128xf32>
      %40 = arith.mulf %39, %36 : vector<352x128xf32>
      %41 = arith.select %38, %36, %40 : vector<352x128xi1>, vector<352x128xf32>
      %42 = arith.truncf %41 : vector<352x128xf32> to vector<352x128xbf16>
      %c0_19 = arith.constant 0 : index
      %c0_20 = arith.constant 0 : index
      %43 = vector.load %arg6[%c0_19, %c0_20] : memref<352x128xbf16, #tpu.memory_space<vmem>>, vector<352x128xbf16>
      tpu.vector_store %arg6[%c0_19, %c0_20], %42 {strides = array<i32>} : memref<352x128xbf16, #tpu.memory_space<vmem>>, vector<352x128xbf16>,
    } else {
    }
    return
  }
  func.func @transform_0(%arg0: i32, %arg1: i32) -> (i32, i32) {
    %c1_i32 = arith.constant 1 : i32
    %0 = arith.subi %c1_i32, %arg0 : i32
    %1 = arith.muli %0, %arg1 : i32
    %c0_i32 = arith.constant 0 : i32
    %2 = arith.muli %arg0, %c0_i32 : i32
    %3 = arith.addi %1, %2 : i32
    %c0_i32_0 = arith.constant 0 : i32
    %c0_i32_1 = arith.constant 0 : i32
    return %3, %c0_i32_0 : i32, i32
  }
  func.func @transform_1(%arg0: i32, %arg1: i32) -> (i32, i32) {
    %c0_i32 = arith.constant 0 : i32
    %c0_i32_0 = arith.constant 0 : i32
    %c0_i32_1 = arith.constant 0 : i32
    return %c0_i32, %c0_i32_0 : i32, i32
  }
  func.func @transform_2(%arg0: i32, %arg1: i32) -> (i32, i32) {
    %c0_i32 = arith.constant 0 : i32
    %c0_i32_0 = arith.constant 0 : i32
    %c0_i32_1 = arith.constant 0 : i32
    return %c0_i32, %c0_i32_0 : i32, i32
  }
  func.func @transform_3(%arg0: i32, %arg1: i32) -> (i32, i32) {
    %c0_i32 = arith.constant 0 : i32
    %c0_i32_0 = arith.constant 0 : i32
    %c0_i32_1 = arith.constant 0 : i32
    return %c0_i32, %c0_i32_0 : i32, i32
  }
  func.func @transform_4(%arg0: i32, %arg1: i32) -> (i32, i32) {
    %0 = arith.muli %arg0, %arg1 : i32
    %c0_i32 = arith.constant 0 : i32
    %c0_i32_0 = arith.constant 0 : i32
    return %0, %c0_i32 : i32, i32
  }
}

module attributes {stable_mosaic.version = 11 : i64} {
  func.func @_gemm_bn_act_fused_kernel(%arg0: i32, %arg1: i32, %arg2: memref<80x512xbf16, #tpu.memory_space<vmem>>, %arg3: memref<512x128xbf16, #tpu.memory_space<vmem>>, %arg4: memref<1x128xf32, #tpu.memory_space<vmem>>, %arg5: memref<1x128xf32, #tpu.memory_space<vmem>>, %arg6: memref<80x128xbf16, #tpu.memory_space<vmem>>, %arg7: memref<1x80x128xbf16, #tpu.memory_space<vmem>>, %arg8: memref<1x128xf32, #tpu.memory_space<vmem>>, %arg9: memref<1x128xf32, #tpu.memory_space<vmem>>) attributes {dimension_semantics = [#tpu.dimension_semantics<arbitrary>, #tpu.dimension_semantics<arbitrary>], iteration_bounds = array<i64: 2, 1>, scalar_prefetch = 0 : i64, scratch_operands = 3 : i64, tpu.core_type = #tpu.core_type<tc>, window_params = [{transform_indices = @transform_0, window_bounds = array<i64: 80, 512>}, {pipeline_mode = #tpu.pipeline_mode<synchronous>, transform_indices = @transform_1, window_bounds = array<i64: 512, 128>}, {pipeline_mode = #tpu.pipeline_mode<synchronous>, transform_indices = @transform_2, window_bounds = array<i64: 1, 128>}, {pipeline_mode = #tpu.pipeline_mode<synchronous>, transform_indices = @transform_3, window_bounds = array<i64: 1, 128>}, {transform_indices = @transform_4, window_bounds = array<i64: 80, 128>}]} {
    %c0_i32 = arith.constant 0 : i32
    %0 = arith.cmpi eq, %arg0, %c0_i32 : i32
    %c0_i32_0 = arith.constant 0 : i32
    %1 = arith.cmpi eq, %arg1, %c0_i32_0 : i32
    %2 = arith.andi %0, %1 : i1
    %3 = arith.extui %2 : i1 to i32
    %c0_i32_1 = arith.constant 0 : i32
    %4 = arith.cmpi ne, %3, %c0_i32_1 : i32
    scf.if %4 {
      %cst = arith.constant 0.000000e+00 : f32
      %11 = vector.broadcast %cst : f32 to vector<1x128xf32>
      %c0 = arith.constant 0 : index
      %c0_5 = arith.constant 0 : index
      %12 = vector.load %arg8[%c0, %c0_5] : memref<1x128xf32, #tpu.memory_space<vmem>>, vector<1x128xf32>
      tpu.vector_store %arg8[%c0, %c0_5], %11 {strides = array<i32>} : memref<1x128xf32, #tpu.memory_space<vmem>>, vector<1x128xf32>,
      %cst_6 = arith.constant 0.000000e+00 : f32
      %13 = vector.broadcast %cst_6 : f32 to vector<1x128xf32>
      %c0_7 = arith.constant 0 : index
      %c0_8 = arith.constant 0 : index
      %14 = vector.load %arg9[%c0_7, %c0_8] : memref<1x128xf32, #tpu.memory_space<vmem>>, vector<1x128xf32>
      tpu.vector_store %arg9[%c0_7, %c0_8], %13 {strides = array<i32>} : memref<1x128xf32, #tpu.memory_space<vmem>>, vector<1x128xf32>,
    } else {
    }
    %c0_i32_2 = arith.constant 0 : i32
    %5 = arith.cmpi eq, %arg0, %c0_i32_2 : i32
    %6 = arith.extui %5 : i1 to i32
    %c0_i32_3 = arith.constant 0 : i32
    %7 = arith.cmpi ne, %6, %c0_i32_3 : i32
    scf.if %7 {
      %c0 = arith.constant 0 : index
      %c0_5 = arith.constant 0 : index
      %11 = vector.load %arg2[%c0, %c0_5] : memref<80x512xbf16, #tpu.memory_space<vmem>>, vector<80x512xbf16>
      %c0_6 = arith.constant 0 : index
      %c0_7 = arith.constant 0 : index
      %12 = vector.load %arg3[%c0_6, %c0_7] : memref<512x128xbf16, #tpu.memory_space<vmem>>, vector<512x128xbf16>
      %cst = arith.constant dense<0.000000e+00> : vector<80x128xf32>
      %13 = tpu.matmul %11, %12, %cst {dimension_numbers = #tpu.dot_dimension_numbers<[1], [0], [0], [1], [0, 0, 1, 1], [], []>} : vector<80x512xbf16>, vector<512x128xbf16>, vector<80x128xf32> -> vector<80x128xf32>
      %14 = arith.truncf %13 : vector<80x128xf32> to vector<80x128xbf16>
      %15 = arith.index_cast %arg1 : i32 to index
      %c0_8 = arith.constant 0 : index
      %c0_9 = arith.constant 0 : index
      %16 = vector.load %arg7[%15, %c0_8, %c0_9] : memref<1x80x128xbf16, #tpu.memory_space<vmem>>, vector<1x80x128xbf16>
      %17 = vector.shape_cast %16 : vector<1x80x128xbf16> to vector<80x128xbf16>
      %18 = vector.shape_cast %14 : vector<80x128xbf16> to vector<1x80x128xbf16>
      tpu.vector_store %arg7[%15, %c0_8, %c0_9], %18 {strides = array<i32>} : memref<1x80x128xbf16, #tpu.memory_space<vmem>>, vector<1x80x128xbf16>,
      %c0_10 = arith.constant 0 : index
      %c0_11 = arith.constant 0 : index
      %19 = vector.load %arg8[%c0_10, %c0_11] : memref<1x128xf32, #tpu.memory_space<vmem>>, vector<1x128xf32>
      %cst_12 = arith.constant dense<0.000000e+00> : vector<128xf32>
      %20 = vector.multi_reduction <add>, %13, %cst_12 [0] : vector<80x128xf32> to vector<128xf32>
      %21 = vector.shape_cast %20 : vector<128xf32> to vector<1x128xf32>
      %22 = arith.addf %19, %21 : vector<1x128xf32>
      %c0_13 = arith.constant 0 : index
      %c0_14 = arith.constant 0 : index
      %23 = vector.load %arg8[%c0_13, %c0_14] : memref<1x128xf32, #tpu.memory_space<vmem>>, vector<1x128xf32>
      tpu.vector_store %arg8[%c0_13, %c0_14], %22 {strides = array<i32>} : memref<1x128xf32, #tpu.memory_space<vmem>>, vector<1x128xf32>,
      %c0_15 = arith.constant 0 : index
      %c0_16 = arith.constant 0 : index
      %24 = vector.load %arg9[%c0_15, %c0_16] : memref<1x128xf32, #tpu.memory_space<vmem>>, vector<1x128xf32>
      %25 = arith.mulf %13, %13 : vector<80x128xf32>
      %cst_17 = arith.constant dense<0.000000e+00> : vector<128xf32>
      %26 = vector.multi_reduction <add>, %25, %cst_17 [0] : vector<80x128xf32> to vector<128xf32>
      %27 = vector.shape_cast %26 : vector<128xf32> to vector<1x128xf32>
      %28 = arith.addf %24, %27 : vector<1x128xf32>
      %c0_18 = arith.constant 0 : index
      %c0_19 = arith.constant 0 : index
      %29 = vector.load %arg9[%c0_18, %c0_19] : memref<1x128xf32, #tpu.memory_space<vmem>>, vector<1x128xf32>
      tpu.vector_store %arg9[%c0_18, %c0_19], %28 {strides = array<i32>} : memref<1x128xf32, #tpu.memory_space<vmem>>, vector<1x128xf32>,
    } else {
    }
    %c1_i32 = arith.constant 1 : i32
    %8 = arith.cmpi eq, %arg0, %c1_i32 : i32
    %9 = arith.extui %8 : i1 to i32
    %c0_i32_4 = arith.constant 0 : i32
    %10 = arith.cmpi ne, %9, %c0_i32_4 : i32
    scf.if %10 {
      %c0 = arith.constant 0 : index
      %c0_5 = arith.constant 0 : index
      %11 = vector.load %arg8[%c0, %c0_5] : memref<1x128xf32, #tpu.memory_space<vmem>>, vector<1x128xf32>
      %cst = arith.constant 0.013888889 : f32
      %12 = vector.broadcast %cst : f32 to vector<1x128xf32>
      %13 = arith.mulf %11, %12 : vector<1x128xf32>
      %c0_6 = arith.constant 0 : index
      %c0_7 = arith.constant 0 : index
      %14 = vector.load %arg9[%c0_6, %c0_7] : memref<1x128xf32, #tpu.memory_space<vmem>>, vector<1x128xf32>
      %cst_8 = arith.constant 0.013888889 : f32
      %15 = vector.broadcast %cst_8 : f32 to vector<1x128xf32>
      %16 = arith.mulf %14, %15 : vector<1x128xf32>
      %17 = arith.mulf %13, %13 : vector<1x128xf32>
      %18 = arith.subf %16, %17 : vector<1x128xf32>
      %cst_9 = arith.constant 0.000000e+00 : f32
      %19 = vector.broadcast %cst_9 : f32 to vector<1x128xf32>
      %20 = arith.maximumf %18, %19 : vector<1x128xf32>
      %c0_10 = arith.constant 0 : index
      %c0_11 = arith.constant 0 : index
      %21 = vector.load %arg4[%c0_10, %c0_11] : memref<1x128xf32, #tpu.memory_space<vmem>>, vector<1x128xf32>
      %cst_12 = arith.constant 9.99999974E-6 : f32
      %22 = vector.broadcast %cst_12 : f32 to vector<1x128xf32>
      %23 = arith.addf %20, %22 : vector<1x128xf32>
      %24 = math.rsqrt %23 : vector<1x128xf32>
      %25 = arith.mulf %21, %24 : vector<1x128xf32>
      %c0_13 = arith.constant 0 : index
      %c0_14 = arith.constant 0 : index
      %26 = vector.load %arg5[%c0_13, %c0_14] : memref<1x128xf32, #tpu.memory_space<vmem>>, vector<1x128xf32>
      %27 = arith.mulf %13, %25 : vector<1x128xf32>
      %28 = arith.subf %26, %27 : vector<1x128xf32>
      %29 = arith.index_cast %arg1 : i32 to index
      %c0_15 = arith.constant 0 : index
      %c0_16 = arith.constant 0 : index
      %30 = vector.load %arg7[%29, %c0_15, %c0_16] : memref<1x80x128xbf16, #tpu.memory_space<vmem>>, vector<1x80x128xbf16>
      %31 = vector.shape_cast %30 : vector<1x80x128xbf16> to vector<80x128xbf16>
      %32 = arith.extf %31 : vector<80x128xbf16> to vector<80x128xf32>
      %33 = vector.broadcast %25 : vector<1x128xf32> to vector<80x128xf32>
      %34 = arith.mulf %32, %33 : vector<80x128xf32>
      %35 = vector.broadcast %28 : vector<1x128xf32> to vector<80x128xf32>
      %36 = arith.addf %34, %35 : vector<80x128xf32>
      %cst_17 = arith.constant 0.000000e+00 : f32
      %37 = vector.broadcast %cst_17 : f32 to vector<80x128xf32>
      %38 = arith.cmpf oge, %36, %37 : vector<80x128xf32>
      %cst_18 = arith.constant 2.000000e-01 : f32
      %39 = vector.broadcast %cst_18 : f32 to vector<80x128xf32>
      %40 = arith.mulf %39, %36 : vector<80x128xf32>
      %41 = arith.select %38, %36, %40 : vector<80x128xi1>, vector<80x128xf32>
      %42 = arith.truncf %41 : vector<80x128xf32> to vector<80x128xbf16>
      %c0_19 = arith.constant 0 : index
      %c0_20 = arith.constant 0 : index
      %43 = vector.load %arg6[%c0_19, %c0_20] : memref<80x128xbf16, #tpu.memory_space<vmem>>, vector<80x128xbf16>
      tpu.vector_store %arg6[%c0_19, %c0_20], %42 {strides = array<i32>} : memref<80x128xbf16, #tpu.memory_space<vmem>>, vector<80x128xbf16>,
    } else {
    }
    return
  }
  func.func @transform_0(%arg0: i32, %arg1: i32) -> (i32, i32) {
    %c1_i32 = arith.constant 1 : i32
    %0 = arith.subi %c1_i32, %arg0 : i32
    %1 = arith.muli %0, %arg1 : i32
    %c0_i32 = arith.constant 0 : i32
    %2 = arith.muli %arg0, %c0_i32 : i32
    %3 = arith.addi %1, %2 : i32
    %c0_i32_0 = arith.constant 0 : i32
    %c0_i32_1 = arith.constant 0 : i32
    return %3, %c0_i32_0 : i32, i32
  }
  func.func @transform_1(%arg0: i32, %arg1: i32) -> (i32, i32) {
    %c0_i32 = arith.constant 0 : i32
    %c0_i32_0 = arith.constant 0 : i32
    %c0_i32_1 = arith.constant 0 : i32
    return %c0_i32, %c0_i32_0 : i32, i32
  }
  func.func @transform_2(%arg0: i32, %arg1: i32) -> (i32, i32) {
    %c0_i32 = arith.constant 0 : i32
    %c0_i32_0 = arith.constant 0 : i32
    %c0_i32_1 = arith.constant 0 : i32
    return %c0_i32, %c0_i32_0 : i32, i32
  }
  func.func @transform_3(%arg0: i32, %arg1: i32) -> (i32, i32) {
    %c0_i32 = arith.constant 0 : i32
    %c0_i32_0 = arith.constant 0 : i32
    %c0_i32_1 = arith.constant 0 : i32
    return %c0_i32, %c0_i32_0 : i32, i32
  }
  func.func @transform_4(%arg0: i32, %arg1: i32) -> (i32, i32) {
    %0 = arith.muli %arg0, %arg1 : i32
    %c0_i32 = arith.constant 0 : i32
    %c0_i32_0 = arith.constant 0 : i32
    return %0, %c0_i32 : i32, i32
  }
}

module attributes {stable_mosaic.version = 11 : i64} {
  func.func @_gemm_bn_act_fused_kernel(%arg0: i32, %arg1: i32, %arg2: memref<32x1024xbf16, #tpu.memory_space<vmem>>, %arg3: memref<1024x128xbf16, #tpu.memory_space<vmem>>, %arg4: memref<1x128xf32, #tpu.memory_space<vmem>>, %arg5: memref<1x128xf32, #tpu.memory_space<vmem>>, %arg6: memref<32x128xbf16, #tpu.memory_space<vmem>>, %arg7: memref<1x32x128xbf16, #tpu.memory_space<vmem>>, %arg8: memref<1x128xf32, #tpu.memory_space<vmem>>, %arg9: memref<1x128xf32, #tpu.memory_space<vmem>>) attributes {dimension_semantics = [#tpu.dimension_semantics<arbitrary>, #tpu.dimension_semantics<arbitrary>], iteration_bounds = array<i64: 2, 1>, scalar_prefetch = 0 : i64, scratch_operands = 3 : i64, tpu.core_type = #tpu.core_type<tc>, window_params = [{transform_indices = @transform_0, window_bounds = array<i64: 32, 1024>}, {pipeline_mode = #tpu.pipeline_mode<synchronous>, transform_indices = @transform_1, window_bounds = array<i64: 1024, 128>}, {pipeline_mode = #tpu.pipeline_mode<synchronous>, transform_indices = @transform_2, window_bounds = array<i64: 1, 128>}, {pipeline_mode = #tpu.pipeline_mode<synchronous>, transform_indices = @transform_3, window_bounds = array<i64: 1, 128>}, {transform_indices = @transform_4, window_bounds = array<i64: 32, 128>}]} {
    %c0_i32 = arith.constant 0 : i32
    %0 = arith.cmpi eq, %arg0, %c0_i32 : i32
    %c0_i32_0 = arith.constant 0 : i32
    %1 = arith.cmpi eq, %arg1, %c0_i32_0 : i32
    %2 = arith.andi %0, %1 : i1
    %3 = arith.extui %2 : i1 to i32
    %c0_i32_1 = arith.constant 0 : i32
    %4 = arith.cmpi ne, %3, %c0_i32_1 : i32
    scf.if %4 {
      %cst = arith.constant 0.000000e+00 : f32
      %11 = vector.broadcast %cst : f32 to vector<1x128xf32>
      %c0 = arith.constant 0 : index
      %c0_5 = arith.constant 0 : index
      %12 = vector.load %arg8[%c0, %c0_5] : memref<1x128xf32, #tpu.memory_space<vmem>>, vector<1x128xf32>
      tpu.vector_store %arg8[%c0, %c0_5], %11 {strides = array<i32>} : memref<1x128xf32, #tpu.memory_space<vmem>>, vector<1x128xf32>,
      %cst_6 = arith.constant 0.000000e+00 : f32
      %13 = vector.broadcast %cst_6 : f32 to vector<1x128xf32>
      %c0_7 = arith.constant 0 : index
      %c0_8 = arith.constant 0 : index
      %14 = vector.load %arg9[%c0_7, %c0_8] : memref<1x128xf32, #tpu.memory_space<vmem>>, vector<1x128xf32>
      tpu.vector_store %arg9[%c0_7, %c0_8], %13 {strides = array<i32>} : memref<1x128xf32, #tpu.memory_space<vmem>>, vector<1x128xf32>,
    } else {
    }
    %c0_i32_2 = arith.constant 0 : i32
    %5 = arith.cmpi eq, %arg0, %c0_i32_2 : i32
    %6 = arith.extui %5 : i1 to i32
    %c0_i32_3 = arith.constant 0 : i32
    %7 = arith.cmpi ne, %6, %c0_i32_3 : i32
    scf.if %7 {
      %c0 = arith.constant 0 : index
      %c0_5 = arith.constant 0 : index
      %11 = vector.load %arg2[%c0, %c0_5] : memref<32x1024xbf16, #tpu.memory_space<vmem>>, vector<32x1024xbf16>
      %c0_6 = arith.constant 0 : index
      %c0_7 = arith.constant 0 : index
      %12 = vector.load %arg3[%c0_6, %c0_7] : memref<1024x128xbf16, #tpu.memory_space<vmem>>, vector<1024x128xbf16>
      %cst = arith.constant dense<0.000000e+00> : vector<32x128xf32>
      %13 = tpu.matmul %11, %12, %cst {dimension_numbers = #tpu.dot_dimension_numbers<[1], [0], [0], [1], [0, 0, 1, 1], [], []>} : vector<32x1024xbf16>, vector<1024x128xbf16>, vector<32x128xf32> -> vector<32x128xf32>
      %14 = arith.truncf %13 : vector<32x128xf32> to vector<32x128xbf16>
      %15 = arith.index_cast %arg1 : i32 to index
      %c0_8 = arith.constant 0 : index
      %c0_9 = arith.constant 0 : index
      %16 = vector.load %arg7[%15, %c0_8, %c0_9] : memref<1x32x128xbf16, #tpu.memory_space<vmem>>, vector<1x32x128xbf16>
      %17 = vector.shape_cast %16 : vector<1x32x128xbf16> to vector<32x128xbf16>
      %18 = vector.shape_cast %14 : vector<32x128xbf16> to vector<1x32x128xbf16>
      tpu.vector_store %arg7[%15, %c0_8, %c0_9], %18 {strides = array<i32>} : memref<1x32x128xbf16, #tpu.memory_space<vmem>>, vector<1x32x128xbf16>,
      %c0_10 = arith.constant 0 : index
      %c0_11 = arith.constant 0 : index
      %19 = vector.load %arg8[%c0_10, %c0_11] : memref<1x128xf32, #tpu.memory_space<vmem>>, vector<1x128xf32>
      %cst_12 = arith.constant dense<0.000000e+00> : vector<128xf32>
      %20 = vector.multi_reduction <add>, %13, %cst_12 [0] : vector<32x128xf32> to vector<128xf32>
      %21 = vector.shape_cast %20 : vector<128xf32> to vector<1x128xf32>
      %22 = arith.addf %19, %21 : vector<1x128xf32>
      %c0_13 = arith.constant 0 : index
      %c0_14 = arith.constant 0 : index
      %23 = vector.load %arg8[%c0_13, %c0_14] : memref<1x128xf32, #tpu.memory_space<vmem>>, vector<1x128xf32>
      tpu.vector_store %arg8[%c0_13, %c0_14], %22 {strides = array<i32>} : memref<1x128xf32, #tpu.memory_space<vmem>>, vector<1x128xf32>,
      %c0_15 = arith.constant 0 : index
      %c0_16 = arith.constant 0 : index
      %24 = vector.load %arg9[%c0_15, %c0_16] : memref<1x128xf32, #tpu.memory_space<vmem>>, vector<1x128xf32>
      %25 = arith.mulf %13, %13 : vector<32x128xf32>
      %cst_17 = arith.constant dense<0.000000e+00> : vector<128xf32>
      %26 = vector.multi_reduction <add>, %25, %cst_17 [0] : vector<32x128xf32> to vector<128xf32>
      %27 = vector.shape_cast %26 : vector<128xf32> to vector<1x128xf32>
      %28 = arith.addf %24, %27 : vector<1x128xf32>
      %c0_18 = arith.constant 0 : index
      %c0_19 = arith.constant 0 : index
      %29 = vector.load %arg9[%c0_18, %c0_19] : memref<1x128xf32, #tpu.memory_space<vmem>>, vector<1x128xf32>
      tpu.vector_store %arg9[%c0_18, %c0_19], %28 {strides = array<i32>} : memref<1x128xf32, #tpu.memory_space<vmem>>, vector<1x128xf32>,
    } else {
    }
    %c1_i32 = arith.constant 1 : i32
    %8 = arith.cmpi eq, %arg0, %c1_i32 : i32
    %9 = arith.extui %8 : i1 to i32
    %c0_i32_4 = arith.constant 0 : i32
    %10 = arith.cmpi ne, %9, %c0_i32_4 : i32
    scf.if %10 {
      %c0 = arith.constant 0 : index
      %c0_5 = arith.constant 0 : index
      %11 = vector.load %arg8[%c0, %c0_5] : memref<1x128xf32, #tpu.memory_space<vmem>>, vector<1x128xf32>
      %cst = arith.constant 0.055555556 : f32
      %12 = vector.broadcast %cst : f32 to vector<1x128xf32>
      %13 = arith.mulf %11, %12 : vector<1x128xf32>
      %c0_6 = arith.constant 0 : index
      %c0_7 = arith.constant 0 : index
      %14 = vector.load %arg9[%c0_6, %c0_7] : memref<1x128xf32, #tpu.memory_space<vmem>>, vector<1x128xf32>
      %cst_8 = arith.constant 0.055555556 : f32
      %15 = vector.broadcast %cst_8 : f32 to vector<1x128xf32>
      %16 = arith.mulf %14, %15 : vector<1x128xf32>
      %17 = arith.mulf %13, %13 : vector<1x128xf32>
      %18 = arith.subf %16, %17 : vector<1x128xf32>
      %cst_9 = arith.constant 0.000000e+00 : f32
      %19 = vector.broadcast %cst_9 : f32 to vector<1x128xf32>
      %20 = arith.maximumf %18, %19 : vector<1x128xf32>
      %c0_10 = arith.constant 0 : index
      %c0_11 = arith.constant 0 : index
      %21 = vector.load %arg4[%c0_10, %c0_11] : memref<1x128xf32, #tpu.memory_space<vmem>>, vector<1x128xf32>
      %cst_12 = arith.constant 9.99999974E-6 : f32
      %22 = vector.broadcast %cst_12 : f32 to vector<1x128xf32>
      %23 = arith.addf %20, %22 : vector<1x128xf32>
      %24 = math.rsqrt %23 : vector<1x128xf32>
      %25 = arith.mulf %21, %24 : vector<1x128xf32>
      %c0_13 = arith.constant 0 : index
      %c0_14 = arith.constant 0 : index
      %26 = vector.load %arg5[%c0_13, %c0_14] : memref<1x128xf32, #tpu.memory_space<vmem>>, vector<1x128xf32>
      %27 = arith.mulf %13, %25 : vector<1x128xf32>
      %28 = arith.subf %26, %27 : vector<1x128xf32>
      %29 = arith.index_cast %arg1 : i32 to index
      %c0_15 = arith.constant 0 : index
      %c0_16 = arith.constant 0 : index
      %30 = vector.load %arg7[%29, %c0_15, %c0_16] : memref<1x32x128xbf16, #tpu.memory_space<vmem>>, vector<1x32x128xbf16>
      %31 = vector.shape_cast %30 : vector<1x32x128xbf16> to vector<32x128xbf16>
      %32 = arith.extf %31 : vector<32x128xbf16> to vector<32x128xf32>
      %33 = vector.broadcast %25 : vector<1x128xf32> to vector<32x128xf32>
      %34 = arith.mulf %32, %33 : vector<32x128xf32>
      %35 = vector.broadcast %28 : vector<1x128xf32> to vector<32x128xf32>
      %36 = arith.addf %34, %35 : vector<32x128xf32>
      %cst_17 = arith.constant 0.000000e+00 : f32
      %37 = vector.broadcast %cst_17 : f32 to vector<32x128xf32>
      %38 = arith.cmpf oge, %36, %37 : vector<32x128xf32>
      %cst_18 = arith.constant 2.000000e-01 : f32
      %39 = vector.broadcast %cst_18 : f32 to vector<32x128xf32>
      %40 = arith.mulf %39, %36 : vector<32x128xf32>
      %41 = arith.select %38, %36, %40 : vector<32x128xi1>, vector<32x128xf32>
      %42 = arith.truncf %41 : vector<32x128xf32> to vector<32x128xbf16>
      %c0_19 = arith.constant 0 : index
      %c0_20 = arith.constant 0 : index
      %43 = vector.load %arg6[%c0_19, %c0_20] : memref<32x128xbf16, #tpu.memory_space<vmem>>, vector<32x128xbf16>
      tpu.vector_store %arg6[%c0_19, %c0_20], %42 {strides = array<i32>} : memref<32x128xbf16, #tpu.memory_space<vmem>>, vector<32x128xbf16>,
    } else {
    }
    return
  }
  func.func @transform_0(%arg0: i32, %arg1: i32) -> (i32, i32) {
    %c1_i32 = arith.constant 1 : i32
    %0 = arith.subi %c1_i32, %arg0 : i32
    %1 = arith.muli %0, %arg1 : i32
    %c0_i32 = arith.constant 0 : i32
    %2 = arith.muli %arg0, %c0_i32 : i32
    %3 = arith.addi %1, %2 : i32
    %c0_i32_0 = arith.constant 0 : i32
    %c0_i32_1 = arith.constant 0 : i32
    return %3, %c0_i32_0 : i32, i32
  }
  func.func @transform_1(%arg0: i32, %arg1: i32) -> (i32, i32) {
    %c0_i32 = arith.constant 0 : i32
    %c0_i32_0 = arith.constant 0 : i32
    %c0_i32_1 = arith.constant 0 : i32
    return %c0_i32, %c0_i32_0 : i32, i32
  }
  func.func @transform_2(%arg0: i32, %arg1: i32) -> (i32, i32) {
    %c0_i32 = arith.constant 0 : i32
    %c0_i32_0 = arith.constant 0 : i32
    %c0_i32_1 = arith.constant 0 : i32
    return %c0_i32, %c0_i32_0 : i32, i32
  }
  func.func @transform_3(%arg0: i32, %arg1: i32) -> (i32, i32) {
    %c0_i32 = arith.constant 0 : i32
    %c0_i32_0 = arith.constant 0 : i32
    %c0_i32_1 = arith.constant 0 : i32
    return %c0_i32, %c0_i32_0 : i32, i32
  }
  func.func @transform_4(%arg0: i32, %arg1: i32) -> (i32, i32) {
    %0 = arith.muli %arg0, %arg1 : i32
    %c0_i32 = arith.constant 0 : i32
    %c0_i32_0 = arith.constant 0 : i32
    return %0, %c0_i32 : i32, i32
  }
}

module attributes {stable_mosaic.version = 11 : i64} {
  func.func @_gemm_bn_act_fused_kernel(%arg0: i32, %arg1: i32, %arg2: memref<16x1152xbf16, #tpu.memory_space<vmem>>, %arg3: memref<1152x256xbf16, #tpu.memory_space<vmem>>, %arg4: memref<1x256xf32, #tpu.memory_space<vmem>>, %arg5: memref<1x256xf32, #tpu.memory_space<vmem>>, %arg6: memref<16x256xbf16, #tpu.memory_space<vmem>>, %arg7: memref<1x16x256xbf16, #tpu.memory_space<vmem>>, %arg8: memref<1x256xf32, #tpu.memory_space<vmem>>, %arg9: memref<1x256xf32, #tpu.memory_space<vmem>>) attributes {dimension_semantics = [#tpu.dimension_semantics<arbitrary>, #tpu.dimension_semantics<arbitrary>], iteration_bounds = array<i64: 2, 1>, scalar_prefetch = 0 : i64, scratch_operands = 3 : i64, tpu.core_type = #tpu.core_type<tc>, window_params = [{transform_indices = @transform_0, window_bounds = array<i64: 16, 1152>}, {pipeline_mode = #tpu.pipeline_mode<synchronous>, transform_indices = @transform_1, window_bounds = array<i64: 1152, 256>}, {pipeline_mode = #tpu.pipeline_mode<synchronous>, transform_indices = @transform_2, window_bounds = array<i64: 1, 256>}, {pipeline_mode = #tpu.pipeline_mode<synchronous>, transform_indices = @transform_3, window_bounds = array<i64: 1, 256>}, {transform_indices = @transform_4, window_bounds = array<i64: 16, 256>}]} {
    %c0_i32 = arith.constant 0 : i32
    %0 = arith.cmpi eq, %arg0, %c0_i32 : i32
    %c0_i32_0 = arith.constant 0 : i32
    %1 = arith.cmpi eq, %arg1, %c0_i32_0 : i32
    %2 = arith.andi %0, %1 : i1
    %3 = arith.extui %2 : i1 to i32
    %c0_i32_1 = arith.constant 0 : i32
    %4 = arith.cmpi ne, %3, %c0_i32_1 : i32
    scf.if %4 {
      %cst = arith.constant 0.000000e+00 : f32
      %11 = vector.broadcast %cst : f32 to vector<1x256xf32>
      %c0 = arith.constant 0 : index
      %c0_5 = arith.constant 0 : index
      %12 = vector.load %arg8[%c0, %c0_5] : memref<1x256xf32, #tpu.memory_space<vmem>>, vector<1x256xf32>
      tpu.vector_store %arg8[%c0, %c0_5], %11 {strides = array<i32>} : memref<1x256xf32, #tpu.memory_space<vmem>>, vector<1x256xf32>,
      %cst_6 = arith.constant 0.000000e+00 : f32
      %13 = vector.broadcast %cst_6 : f32 to vector<1x256xf32>
      %c0_7 = arith.constant 0 : index
      %c0_8 = arith.constant 0 : index
      %14 = vector.load %arg9[%c0_7, %c0_8] : memref<1x256xf32, #tpu.memory_space<vmem>>, vector<1x256xf32>
      tpu.vector_store %arg9[%c0_7, %c0_8], %13 {strides = array<i32>} : memref<1x256xf32, #tpu.memory_space<vmem>>, vector<1x256xf32>,
    } else {
    }
    %c0_i32_2 = arith.constant 0 : i32
    %5 = arith.cmpi eq, %arg0, %c0_i32_2 : i32
    %6 = arith.extui %5 : i1 to i32
    %c0_i32_3 = arith.constant 0 : i32
    %7 = arith.cmpi ne, %6, %c0_i32_3 : i32
    scf.if %7 {
      %c0 = arith.constant 0 : index
      %c0_5 = arith.constant 0 : index
      %11 = vector.load %arg2[%c0, %c0_5] : memref<16x1152xbf16, #tpu.memory_space<vmem>>, vector<16x1152xbf16>
      %c0_6 = arith.constant 0 : index
      %c0_7 = arith.constant 0 : index
      %12 = vector.load %arg3[%c0_6, %c0_7] : memref<1152x256xbf16, #tpu.memory_space<vmem>>, vector<1152x256xbf16>
      %cst = arith.constant dense<0.000000e+00> : vector<16x256xf32>
      %13 = tpu.matmul %11, %12, %cst {dimension_numbers = #tpu.dot_dimension_numbers<[1], [0], [0], [1], [0, 0, 1, 1], [], []>} : vector<16x1152xbf16>, vector<1152x256xbf16>, vector<16x256xf32> -> vector<16x256xf32>
      %14 = arith.truncf %13 : vector<16x256xf32> to vector<16x256xbf16>
      %15 = arith.index_cast %arg1 : i32 to index
      %c0_8 = arith.constant 0 : index
      %c0_9 = arith.constant 0 : index
      %16 = vector.load %arg7[%15, %c0_8, %c0_9] : memref<1x16x256xbf16, #tpu.memory_space<vmem>>, vector<1x16x256xbf16>
      %17 = vector.shape_cast %16 : vector<1x16x256xbf16> to vector<16x256xbf16>
      %18 = vector.shape_cast %14 : vector<16x256xbf16> to vector<1x16x256xbf16>
      tpu.vector_store %arg7[%15, %c0_8, %c0_9], %18 {strides = array<i32>} : memref<1x16x256xbf16, #tpu.memory_space<vmem>>, vector<1x16x256xbf16>,
      %c0_10 = arith.constant 0 : index
      %c0_11 = arith.constant 0 : index
      %19 = vector.load %arg8[%c0_10, %c0_11] : memref<1x256xf32, #tpu.memory_space<vmem>>, vector<1x256xf32>
      %cst_12 = arith.constant dense<0.000000e+00> : vector<256xf32>
      %20 = vector.multi_reduction <add>, %13, %cst_12 [0] : vector<16x256xf32> to vector<256xf32>
      %21 = vector.shape_cast %20 : vector<256xf32> to vector<1x256xf32>
      %22 = arith.addf %19, %21 : vector<1x256xf32>
      %c0_13 = arith.constant 0 : index
      %c0_14 = arith.constant 0 : index
      %23 = vector.load %arg8[%c0_13, %c0_14] : memref<1x256xf32, #tpu.memory_space<vmem>>, vector<1x256xf32>
      tpu.vector_store %arg8[%c0_13, %c0_14], %22 {strides = array<i32>} : memref<1x256xf32, #tpu.memory_space<vmem>>, vector<1x256xf32>,
      %c0_15 = arith.constant 0 : index
      %c0_16 = arith.constant 0 : index
      %24 = vector.load %arg9[%c0_15, %c0_16] : memref<1x256xf32, #tpu.memory_space<vmem>>, vector<1x256xf32>
      %25 = arith.mulf %13, %13 : vector<16x256xf32>
      %cst_17 = arith.constant dense<0.000000e+00> : vector<256xf32>
      %26 = vector.multi_reduction <add>, %25, %cst_17 [0] : vector<16x256xf32> to vector<256xf32>
      %27 = vector.shape_cast %26 : vector<256xf32> to vector<1x256xf32>
      %28 = arith.addf %24, %27 : vector<1x256xf32>
      %c0_18 = arith.constant 0 : index
      %c0_19 = arith.constant 0 : index
      %29 = vector.load %arg9[%c0_18, %c0_19] : memref<1x256xf32, #tpu.memory_space<vmem>>, vector<1x256xf32>
      tpu.vector_store %arg9[%c0_18, %c0_19], %28 {strides = array<i32>} : memref<1x256xf32, #tpu.memory_space<vmem>>, vector<1x256xf32>,
    } else {
    }
    %c1_i32 = arith.constant 1 : i32
    %8 = arith.cmpi eq, %arg0, %c1_i32 : i32
    %9 = arith.extui %8 : i1 to i32
    %c0_i32_4 = arith.constant 0 : i32
    %10 = arith.cmpi ne, %9, %c0_i32_4 : i32
    scf.if %10 {
      %c0 = arith.constant 0 : index
      %c0_5 = arith.constant 0 : index
      %11 = vector.load %arg8[%c0, %c0_5] : memref<1x256xf32, #tpu.memory_space<vmem>>, vector<1x256xf32>
      %cst = arith.constant 1.250000e-01 : f32
      %12 = vector.broadcast %cst : f32 to vector<1x256xf32>
      %13 = arith.mulf %11, %12 : vector<1x256xf32>
      %c0_6 = arith.constant 0 : index
      %c0_7 = arith.constant 0 : index
      %14 = vector.load %arg9[%c0_6, %c0_7] : memref<1x256xf32, #tpu.memory_space<vmem>>, vector<1x256xf32>
      %cst_8 = arith.constant 1.250000e-01 : f32
      %15 = vector.broadcast %cst_8 : f32 to vector<1x256xf32>
      %16 = arith.mulf %14, %15 : vector<1x256xf32>
      %17 = arith.mulf %13, %13 : vector<1x256xf32>
      %18 = arith.subf %16, %17 : vector<1x256xf32>
      %cst_9 = arith.constant 0.000000e+00 : f32
      %19 = vector.broadcast %cst_9 : f32 to vector<1x256xf32>
      %20 = arith.maximumf %18, %19 : vector<1x256xf32>
      %c0_10 = arith.constant 0 : index
      %c0_11 = arith.constant 0 : index
      %21 = vector.load %arg4[%c0_10, %c0_11] : memref<1x256xf32, #tpu.memory_space<vmem>>, vector<1x256xf32>
      %cst_12 = arith.constant 9.99999974E-6 : f32
      %22 = vector.broadcast %cst_12 : f32 to vector<1x256xf32>
      %23 = arith.addf %20, %22 : vector<1x256xf32>
      %24 = math.rsqrt %23 : vector<1x256xf32>
      %25 = arith.mulf %21, %24 : vector<1x256xf32>
      %c0_13 = arith.constant 0 : index
      %c0_14 = arith.constant 0 : index
      %26 = vector.load %arg5[%c0_13, %c0_14] : memref<1x256xf32, #tpu.memory_space<vmem>>, vector<1x256xf32>
      %27 = arith.mulf %13, %25 : vector<1x256xf32>
      %28 = arith.subf %26, %27 : vector<1x256xf32>
      %29 = arith.index_cast %arg1 : i32 to index
      %c0_15 = arith.constant 0 : index
      %c0_16 = arith.constant 0 : index
      %30 = vector.load %arg7[%29, %c0_15, %c0_16] : memref<1x16x256xbf16, #tpu.memory_space<vmem>>, vector<1x16x256xbf16>
      %31 = vector.shape_cast %30 : vector<1x16x256xbf16> to vector<16x256xbf16>
      %32 = arith.extf %31 : vector<16x256xbf16> to vector<16x256xf32>
      %33 = vector.broadcast %25 : vector<1x256xf32> to vector<16x256xf32>
      %34 = arith.mulf %32, %33 : vector<16x256xf32>
      %35 = vector.broadcast %28 : vector<1x256xf32> to vector<16x256xf32>
      %36 = arith.addf %34, %35 : vector<16x256xf32>
      %cst_17 = arith.constant 0.000000e+00 : f32
      %37 = vector.broadcast %cst_17 : f32 to vector<16x256xf32>
      %38 = arith.cmpf oge, %36, %37 : vector<16x256xf32>
      %cst_18 = arith.constant 2.000000e-01 : f32
      %39 = vector.broadcast %cst_18 : f32 to vector<16x256xf32>
      %40 = arith.mulf %39, %36 : vector<16x256xf32>
      %41 = arith.select %38, %36, %40 : vector<16x256xi1>, vector<16x256xf32>
      %42 = arith.truncf %41 : vector<16x256xf32> to vector<16x256xbf16>
      %c0_19 = arith.constant 0 : index
      %c0_20 = arith.constant 0 : index
      %43 = vector.load %arg6[%c0_19, %c0_20] : memref<16x256xbf16, #tpu.memory_space<vmem>>, vector<16x256xbf16>
      tpu.vector_store %arg6[%c0_19, %c0_20], %42 {strides = array<i32>} : memref<16x256xbf16, #tpu.memory_space<vmem>>, vector<16x256xbf16>,
    } else {
    }
    return
  }
  func.func @transform_0(%arg0: i32, %arg1: i32) -> (i32, i32) {
    %c1_i32 = arith.constant 1 : i32
    %0 = arith.subi %c1_i32, %arg0 : i32
    %1 = arith.muli %0, %arg1 : i32
    %c0_i32 = arith.constant 0 : i32
    %2 = arith.muli %arg0, %c0_i32 : i32
    %3 = arith.addi %1, %2 : i32
    %c0_i32_0 = arith.constant 0 : i32
    %c0_i32_1 = arith.constant 0 : i32
    return %3, %c0_i32_0 : i32, i32
  }
  func.func @transform_1(%arg0: i32, %arg1: i32) -> (i32, i32) {
    %c0_i32 = arith.constant 0 : i32
    %c0_i32_0 = arith.constant 0 : i32
    %c0_i32_1 = arith.constant 0 : i32
    return %c0_i32, %c0_i32_0 : i32, i32
  }
  func.func @transform_2(%arg0: i32, %arg1: i32) -> (i32, i32) {
    %c0_i32 = arith.constant 0 : i32
    %c0_i32_0 = arith.constant 0 : i32
    %c0_i32_1 = arith.constant 0 : i32
    return %c0_i32, %c0_i32_0 : i32, i32
  }
  func.func @transform_3(%arg0: i32, %arg1: i32) -> (i32, i32) {
    %c0_i32 = arith.constant 0 : i32
    %c0_i32_0 = arith.constant 0 : i32
    %c0_i32_1 = arith.constant 0 : i32
    return %c0_i32, %c0_i32_0 : i32, i32
  }
  func.func @transform_4(%arg0: i32, %arg1: i32) -> (i32, i32) {
    %0 = arith.muli %arg0, %arg1 : i32
    %c0_i32 = arith.constant 0 : i32
    %c0_i32_0 = arith.constant 0 : i32
    return %0, %c0_i32 : i32, i32
  }
}

module attributes {stable_mosaic.version = 11 : i64} {
  func.func @_gemm_bn_act_fused_kernel(%arg0: i32, %arg1: i32, %arg2: memref<16x1024xbf16, #tpu.memory_space<vmem>>, %arg3: memref<1024x128xbf16, #tpu.memory_space<vmem>>, %arg4: memref<1x128xf32, #tpu.memory_space<vmem>>, %arg5: memref<1x128xf32, #tpu.memory_space<vmem>>, %arg6: memref<16x128xbf16, #tpu.memory_space<vmem>>, %arg7: memref<1x16x128xbf16, #tpu.memory_space<vmem>>, %arg8: memref<1x128xf32, #tpu.memory_space<vmem>>, %arg9: memref<1x128xf32, #tpu.memory_space<vmem>>) attributes {dimension_semantics = [#tpu.dimension_semantics<arbitrary>, #tpu.dimension_semantics<arbitrary>], iteration_bounds = array<i64: 2, 1>, scalar_prefetch = 0 : i64, scratch_operands = 3 : i64, tpu.core_type = #tpu.core_type<tc>, window_params = [{transform_indices = @transform_0, window_bounds = array<i64: 16, 1024>}, {pipeline_mode = #tpu.pipeline_mode<synchronous>, transform_indices = @transform_1, window_bounds = array<i64: 1024, 128>}, {pipeline_mode = #tpu.pipeline_mode<synchronous>, transform_indices = @transform_2, window_bounds = array<i64: 1, 128>}, {pipeline_mode = #tpu.pipeline_mode<synchronous>, transform_indices = @transform_3, window_bounds = array<i64: 1, 128>}, {transform_indices = @transform_4, window_bounds = array<i64: 16, 128>}]} {
    %c0_i32 = arith.constant 0 : i32
    %0 = arith.cmpi eq, %arg0, %c0_i32 : i32
    %c0_i32_0 = arith.constant 0 : i32
    %1 = arith.cmpi eq, %arg1, %c0_i32_0 : i32
    %2 = arith.andi %0, %1 : i1
    %3 = arith.extui %2 : i1 to i32
    %c0_i32_1 = arith.constant 0 : i32
    %4 = arith.cmpi ne, %3, %c0_i32_1 : i32
    scf.if %4 {
      %cst = arith.constant 0.000000e+00 : f32
      %11 = vector.broadcast %cst : f32 to vector<1x128xf32>
      %c0 = arith.constant 0 : index
      %c0_5 = arith.constant 0 : index
      %12 = vector.load %arg8[%c0, %c0_5] : memref<1x128xf32, #tpu.memory_space<vmem>>, vector<1x128xf32>
      tpu.vector_store %arg8[%c0, %c0_5], %11 {strides = array<i32>} : memref<1x128xf32, #tpu.memory_space<vmem>>, vector<1x128xf32>,
      %cst_6 = arith.constant 0.000000e+00 : f32
      %13 = vector.broadcast %cst_6 : f32 to vector<1x128xf32>
      %c0_7 = arith.constant 0 : index
      %c0_8 = arith.constant 0 : index
      %14 = vector.load %arg9[%c0_7, %c0_8] : memref<1x128xf32, #tpu.memory_space<vmem>>, vector<1x128xf32>
      tpu.vector_store %arg9[%c0_7, %c0_8], %13 {strides = array<i32>} : memref<1x128xf32, #tpu.memory_space<vmem>>, vector<1x128xf32>,
    } else {
    }
    %c0_i32_2 = arith.constant 0 : i32
    %5 = arith.cmpi eq, %arg0, %c0_i32_2 : i32
    %6 = arith.extui %5 : i1 to i32
    %c0_i32_3 = arith.constant 0 : i32
    %7 = arith.cmpi ne, %6, %c0_i32_3 : i32
    scf.if %7 {
      %c0 = arith.constant 0 : index
      %c0_5 = arith.constant 0 : index
      %11 = vector.load %arg2[%c0, %c0_5] : memref<16x1024xbf16, #tpu.memory_space<vmem>>, vector<16x1024xbf16>
      %c0_6 = arith.constant 0 : index
      %c0_7 = arith.constant 0 : index
      %12 = vector.load %arg3[%c0_6, %c0_7] : memref<1024x128xbf16, #tpu.memory_space<vmem>>, vector<1024x128xbf16>
      %cst = arith.constant dense<0.000000e+00> : vector<16x128xf32>
      %13 = tpu.matmul %11, %12, %cst {dimension_numbers = #tpu.dot_dimension_numbers<[1], [0], [0], [1], [0, 0, 1, 1], [], []>} : vector<16x1024xbf16>, vector<1024x128xbf16>, vector<16x128xf32> -> vector<16x128xf32>
      %14 = arith.truncf %13 : vector<16x128xf32> to vector<16x128xbf16>
      %15 = arith.index_cast %arg1 : i32 to index
      %c0_8 = arith.constant 0 : index
      %c0_9 = arith.constant 0 : index
      %16 = vector.load %arg7[%15, %c0_8, %c0_9] : memref<1x16x128xbf16, #tpu.memory_space<vmem>>, vector<1x16x128xbf16>
      %17 = vector.shape_cast %16 : vector<1x16x128xbf16> to vector<16x128xbf16>
      %18 = vector.shape_cast %14 : vector<16x128xbf16> to vector<1x16x128xbf16>
      tpu.vector_store %arg7[%15, %c0_8, %c0_9], %18 {strides = array<i32>} : memref<1x16x128xbf16, #tpu.memory_space<vmem>>, vector<1x16x128xbf16>,
      %c0_10 = arith.constant 0 : index
      %c0_11 = arith.constant 0 : index
      %19 = vector.load %arg8[%c0_10, %c0_11] : memref<1x128xf32, #tpu.memory_space<vmem>>, vector<1x128xf32>
      %cst_12 = arith.constant dense<0.000000e+00> : vector<128xf32>
      %20 = vector.multi_reduction <add>, %13, %cst_12 [0] : vector<16x128xf32> to vector<128xf32>
      %21 = vector.shape_cast %20 : vector<128xf32> to vector<1x128xf32>
      %22 = arith.addf %19, %21 : vector<1x128xf32>
      %c0_13 = arith.constant 0 : index
      %c0_14 = arith.constant 0 : index
      %23 = vector.load %arg8[%c0_13, %c0_14] : memref<1x128xf32, #tpu.memory_space<vmem>>, vector<1x128xf32>
      tpu.vector_store %arg8[%c0_13, %c0_14], %22 {strides = array<i32>} : memref<1x128xf32, #tpu.memory_space<vmem>>, vector<1x128xf32>,
      %c0_15 = arith.constant 0 : index
      %c0_16 = arith.constant 0 : index
      %24 = vector.load %arg9[%c0_15, %c0_16] : memref<1x128xf32, #tpu.memory_space<vmem>>, vector<1x128xf32>
      %25 = arith.mulf %13, %13 : vector<16x128xf32>
      %cst_17 = arith.constant dense<0.000000e+00> : vector<128xf32>
      %26 = vector.multi_reduction <add>, %25, %cst_17 [0] : vector<16x128xf32> to vector<128xf32>
      %27 = vector.shape_cast %26 : vector<128xf32> to vector<1x128xf32>
      %28 = arith.addf %24, %27 : vector<1x128xf32>
      %c0_18 = arith.constant 0 : index
      %c0_19 = arith.constant 0 : index
      %29 = vector.load %arg9[%c0_18, %c0_19] : memref<1x128xf32, #tpu.memory_space<vmem>>, vector<1x128xf32>
      tpu.vector_store %arg9[%c0_18, %c0_19], %28 {strides = array<i32>} : memref<1x128xf32, #tpu.memory_space<vmem>>, vector<1x128xf32>,
    } else {
    }
    %c1_i32 = arith.constant 1 : i32
    %8 = arith.cmpi eq, %arg0, %c1_i32 : i32
    %9 = arith.extui %8 : i1 to i32
    %c0_i32_4 = arith.constant 0 : i32
    %10 = arith.cmpi ne, %9, %c0_i32_4 : i32
    scf.if %10 {
      %c0 = arith.constant 0 : index
      %c0_5 = arith.constant 0 : index
      %11 = vector.load %arg8[%c0, %c0_5] : memref<1x128xf32, #tpu.memory_space<vmem>>, vector<1x128xf32>
      %cst = arith.constant 5.000000e-01 : f32
      %12 = vector.broadcast %cst : f32 to vector<1x128xf32>
      %13 = arith.mulf %11, %12 : vector<1x128xf32>
      %c0_6 = arith.constant 0 : index
      %c0_7 = arith.constant 0 : index
      %14 = vector.load %arg9[%c0_6, %c0_7] : memref<1x128xf32, #tpu.memory_space<vmem>>, vector<1x128xf32>
      %cst_8 = arith.constant 5.000000e-01 : f32
      %15 = vector.broadcast %cst_8 : f32 to vector<1x128xf32>
      %16 = arith.mulf %14, %15 : vector<1x128xf32>
      %17 = arith.mulf %13, %13 : vector<1x128xf32>
      %18 = arith.subf %16, %17 : vector<1x128xf32>
      %cst_9 = arith.constant 0.000000e+00 : f32
      %19 = vector.broadcast %cst_9 : f32 to vector<1x128xf32>
      %20 = arith.maximumf %18, %19 : vector<1x128xf32>
      %c0_10 = arith.constant 0 : index
      %c0_11 = arith.constant 0 : index
      %21 = vector.load %arg4[%c0_10, %c0_11] : memref<1x128xf32, #tpu.memory_space<vmem>>, vector<1x128xf32>
      %cst_12 = arith.constant 9.99999974E-6 : f32
      %22 = vector.broadcast %cst_12 : f32 to vector<1x128xf32>
      %23 = arith.addf %20, %22 : vector<1x128xf32>
      %24 = math.rsqrt %23 : vector<1x128xf32>
      %25 = arith.mulf %21, %24 : vector<1x128xf32>
      %c0_13 = arith.constant 0 : index
      %c0_14 = arith.constant 0 : index
      %26 = vector.load %arg5[%c0_13, %c0_14] : memref<1x128xf32, #tpu.memory_space<vmem>>, vector<1x128xf32>
      %27 = arith.mulf %13, %25 : vector<1x128xf32>
      %28 = arith.subf %26, %27 : vector<1x128xf32>
      %29 = arith.index_cast %arg1 : i32 to index
      %c0_15 = arith.constant 0 : index
      %c0_16 = arith.constant 0 : index
      %30 = vector.load %arg7[%29, %c0_15, %c0_16] : memref<1x16x128xbf16, #tpu.memory_space<vmem>>, vector<1x16x128xbf16>
      %31 = vector.shape_cast %30 : vector<1x16x128xbf16> to vector<16x128xbf16>
      %32 = arith.extf %31 : vector<16x128xbf16> to vector<16x128xf32>
      %33 = vector.broadcast %25 : vector<1x128xf32> to vector<16x128xf32>
      %34 = arith.mulf %32, %33 : vector<16x128xf32>
      %35 = vector.broadcast %28 : vector<1x128xf32> to vector<16x128xf32>
      %36 = arith.addf %34, %35 : vector<16x128xf32>
      %cst_17 = arith.constant 0.000000e+00 : f32
      %37 = vector.broadcast %cst_17 : f32 to vector<16x128xf32>
      %38 = arith.cmpf oge, %36, %37 : vector<16x128xf32>
      %cst_18 = arith.constant 2.000000e-01 : f32
      %39 = vector.broadcast %cst_18 : f32 to vector<16x128xf32>
      %40 = arith.mulf %39, %36 : vector<16x128xf32>
      %41 = arith.select %38, %36, %40 : vector<16x128xi1>, vector<16x128xf32>
      %42 = arith.truncf %41 : vector<16x128xf32> to vector<16x128xbf16>
      %c0_19 = arith.constant 0 : index
      %c0_20 = arith.constant 0 : index
      %43 = vector.load %arg6[%c0_19, %c0_20] : memref<16x128xbf16, #tpu.memory_space<vmem>>, vector<16x128xbf16>
      tpu.vector_store %arg6[%c0_19, %c0_20], %42 {strides = array<i32>} : memref<16x128xbf16, #tpu.memory_space<vmem>>, vector<16x128xbf16>,
    } else {
    }
    return
  }
  func.func @transform_0(%arg0: i32, %arg1: i32) -> (i32, i32) {
    %c1_i32 = arith.constant 1 : i32
    %0 = arith.subi %c1_i32, %arg0 : i32
    %1 = arith.muli %0, %arg1 : i32
    %c0_i32 = arith.constant 0 : i32
    %2 = arith.muli %arg0, %c0_i32 : i32
    %3 = arith.addi %1, %2 : i32
    %c0_i32_0 = arith.constant 0 : i32
    %c0_i32_1 = arith.constant 0 : i32
    return %3, %c0_i32_0 : i32, i32
  }
  func.func @transform_1(%arg0: i32, %arg1: i32) -> (i32, i32) {
    %c0_i32 = arith.constant 0 : i32
    %c0_i32_0 = arith.constant 0 : i32
    %c0_i32_1 = arith.constant 0 : i32
    return %c0_i32, %c0_i32_0 : i32, i32
  }
  func.func @transform_2(%arg0: i32, %arg1: i32) -> (i32, i32) {
    %c0_i32 = arith.constant 0 : i32
    %c0_i32_0 = arith.constant 0 : i32
    %c0_i32_1 = arith.constant 0 : i32
    return %c0_i32, %c0_i32_0 : i32, i32
  }
  func.func @transform_3(%arg0: i32, %arg1: i32) -> (i32, i32) {
    %c0_i32 = arith.constant 0 : i32
    %c0_i32_0 = arith.constant 0 : i32
    %c0_i32_1 = arith.constant 0 : i32
    return %c0_i32, %c0_i32_0 : i32, i32
  }
  func.func @transform_4(%arg0: i32, %arg1: i32) -> (i32, i32) {
    %0 = arith.muli %arg0, %arg1 : i32
    %c0_i32 = arith.constant 0 : i32
    %c0_i32_0 = arith.constant 0 : i32
    return %0, %c0_i32 : i32, i32
  }
}

</mosaic_0001>

<bundles_post_ra>
// kernel: cnn_encoder_forward.6
= control target key start
LH: loop header
LB: loop body
LE: loop exit
PB: predicated region body
PF: predicated region fallthrough
CT: control target
= control target key end

     0   :  { %s1934_s12 = smov 0   ;;  %s2136_s0 = inlined_call_operand.vmem [shape: bf16[1536,16], index: 0, kind: input, shape index: {}]   ;;  %s2137_s1 = inlined_call_operand.vmem [shape: bf16[16,128], index: 1, kind: input, shape index: {}]   ;;  %s2138_s2 = inlined_call_operand.vmem [shape: f32[1,128], index: 2, kind: input, shape index: {}]   ;;  %s2139_s3 = inlined_call_operand.vmem [shape: bf16[1536,128], index: 3, kind: output, shape index: {}]  }
   0x1 LB: > { %s1368_s13 = sadd.s32 4294967295, %s1912_s12   ;;  %p1372_p0 = scmp.ge.s32.totalorder %s1912_s12, 1  ;;  %s1912_s12 = sphi %s1934_s12, %s13_s12  }
   0x2   : > { %p138_p1 = scmp.lt.s32.totalorder %s1912_s12, 4 }
   0x4   : > { %p139_p2 = pnand %p1372_p0, %p138_p1 }
   0x5   : > { %s1373_s16 = sshll.u32 (!%p139_p2), %s1368_s13, 6 }
   0x6   : > { %142 = sbr.rel (%p139_p2) target bundleno = 286 (0x11e), region = 32  ;;  %p163_p3 = scmp.lt.s32.totalorder (!%p139_p2), %s1373_s16, 191 }
   0xb   : > { %v1873_v0 = vld [vmem:[%s2137_s1] sm:$0xff]   ;;  %s2141_s16 = smov (!%p163_p3, %s1373_s16), 191  ;;  %vm414_vm0 = vcmask 130048  }
   0xc   : > { %1797 = vmatprep.subr.bf16.mxu0 %v1873_v0  ;;  %1863 = vmatprep.subr.bf16.mxu1 %v1873_v0  ;;  %s1374_s17 = sshll.u32 %s2141_s16, 2  ;;  %v2022_v33 = vld [vmem:[%s2138_s2] ss:$0 sm:$0xff] }
   0xd   : > { %1798 = vmatpush3.bf16.msra.mxu0 %v1873_v0  ;;  %1864 = vmatpush3.bf16.msra.mxu1 %v1873_v0  ;;  %s1953_s20 = scalar_lea.vmem %s2136_s0, %s1374_s17  ;;  %s2037_s25 = scalar_lea.vmem %s2139_s3, %s1374_s17 }
   0xe   : > { %v1874_v1 = vld [vmem:[%s1953_s20] sm:$0xff]   ;;  %v1876_v3 = vld [vmem:[%s1953_s20 + $0x8] sm:$0xff]   ;;  %v1878_v5 = vld [vmem:[%s1953_s20 + $0x10] sm:$0xff]  }
   0xf   : > { %v1875_v2 = vld [vmem:[%s1953_s20 + $0x80] sm:$0xff]   ;;  %1799 = vmatprep.mubr.msk.bf16.mxu0 %vm414_vm0, %v1874_v1  ;;  %v1877_v4 = vld [vmem:[%s1953_s20 + $0x88] sm:$0xff]   ;;  %v1879_v6 = vld [vmem:[%s1953_s20 + $0x90] sm:$0xff]  }
  0x10   : > { %1831 = vmatprep.mubr.msk.bf16.mxu1 %vm414_vm0, %v1875_v2  ;;  %1800 = vmatmul.mubr.msk.bf16.vlgmr.msra.gmra.mxu0 %vm414_vm0, %v1876_v3  ;;  %v1880_v7 = vld [vmem:[%s1953_s20 + $0x18] sm:$0xff]   ;;  %v1882_v9 = vld [vmem:[%s1953_s20 + $0x20] sm:$0xff]   ;;  %v1884_v11 = vld [vmem:[%s1953_s20 + $0x28] sm:$0xff]  }
  0x11   : > { %1832 = vmatmul.mubr.msk.bf16.vlgmr.msra.gmra.mxu1 %vm414_vm0, %v1877_v4  ;;  %1803 = vmatprep.mubr.msk.bf16.mxu0 %vm414_vm0, %v1878_v5  ;;  %v1881_v8 = vld [vmem:[%s1953_s20 + $0x98] sm:$0xff]   ;;  %v1883_v10 = vld [vmem:[%s1953_s20 + $0xa0] sm:$0xff]   ;;  %v1885_v12 = vld [vmem:[%s1953_s20 + $0xa8] sm:$0xff]  }
  0x12   : > { %1835 = vmatprep.mubr.msk.bf16.mxu1 %vm414_vm0, %v1879_v6  ;;  %v1886_v13 = vld [vmem:[%s1953_s20 + $0x30] sm:$0xff]   ;;  %v1888_v15 = vld [vmem:[%s1953_s20 + $0x38] sm:$0xff]   ;;  %v1890_v17 = vld [vmem:[%s1953_s20 + $0x40] sm:$0xff]  }
  0x13   : > { %v1887_v14 = vld [vmem:[%s1953_s20 + $0xb0] sm:$0xff]   ;;  %v1889_v16 = vld [vmem:[%s1953_s20 + $0xb8] sm:$0xff]   ;;  %v1891_v18 = vld [vmem:[%s1953_s20 + $0xc0] sm:$0xff]  }
  0x14   : > { %v1892_v19 = vld [vmem:[%s1953_s20 + $0x48] sm:$0xff]   ;;  %v1894_v21 = vld [vmem:[%s1953_s20 + $0x50] sm:$0xff]   ;;  %v1896_v23 = vld [vmem:[%s1953_s20 + $0x58] sm:$0xff]  }
  0x15   : > { %v1893_v20 = vld [vmem:[%s1953_s20 + $0xc8] sm:$0xff]   ;;  %v1895_v22 = vld [vmem:[%s1953_s20 + $0xd0] sm:$0xff]   ;;  %v1897_v24 = vld [vmem:[%s1953_s20 + $0xd8] sm:$0xff]  }
  0x16   : > { %v1898_v25 = vld [vmem:[%s1953_s20 + $0x60] sm:$0xff]   ;;  %v1900_v27 = vld [vmem:[%s1953_s20 + $0x68] sm:$0xff]   ;;  %v1902_v29 = vld [vmem:[%s1953_s20 + $0x70] sm:$0xff]  }
  0x17   : > { %v1899_v26 = vld [vmem:[%s1953_s20 + $0xe0] sm:$0xff]   ;;  %v1901_v28 = vld [vmem:[%s1953_s20 + $0xe8] sm:$0xff]   ;;  %v1903_v30 = vld [vmem:[%s1953_s20 + $0xf0] sm:$0xff]  }
  0x18   : > { %1804 = vmatmul.mubr.msk.bf16.gmra.mxu0 %vm414_vm0, %v1880_v7  ;;  %v1904_v31 = vld [vmem:[%s1953_s20 + $0x78] sm:$0xff]  }
  0x19   : > { %1836 = vmatmul.mubr.msk.bf16.gmra.mxu1 %vm414_vm0, %v1881_v8  ;;  %1807 = vmatprep.mubr.msk.bf16.mxu0 %vm414_vm0, %v1882_v9  ;;  %v1905_v32 = vld [vmem:[%s1953_s20 + $0xf8] sm:$0xff]  }
  0x1a   : > { %1839 = vmatprep.mubr.msk.bf16.mxu1 %vm414_vm0, %v1883_v10 }
  0x20   : > { %1808 = vmatmul.mubr.msk.bf16.gmra.mxu0 %vm414_vm0, %v1884_v11 }
  0x21   : > { %1840 = vmatmul.mubr.msk.bf16.gmra.mxu1 %vm414_vm0, %v1885_v12  ;;  %1811 = vmatprep.mubr.msk.bf16.mxu0 %vm414_vm0, %v1886_v13 }
  0x22   : > { %1843 = vmatprep.mubr.msk.bf16.mxu1 %vm414_vm0, %v1887_v14 }
  0x28   : > { %1812 = vmatmul.mubr.msk.bf16.gmra.mxu0 %vm414_vm0, %v1888_v15 }
  0x29   : > { %1844 = vmatmul.mubr.msk.bf16.gmra.mxu1 %vm414_vm0, %v1889_v16  ;;  %1815 = vmatprep.mubr.msk.bf16.mxu0 %vm414_vm0, %v1890_v17 }
  0x2a   : > { %1847 = vmatprep.mubr.msk.bf16.mxu1 %vm414_vm0, %v1891_v18 }
  0x30   : > { %1816 = vmatmul.mubr.msk.bf16.gmra.mxu0 %vm414_vm0, %v1892_v19 }
  0x31   : > { %1848 = vmatmul.mubr.msk.bf16.gmra.mxu1 %vm414_vm0, %v1893_v20  ;;  %1819 = vmatprep.mubr.msk.bf16.mxu0 %vm414_vm0, %v1894_v21 }
  0x32   : > { %1851 = vmatprep.mubr.msk.bf16.mxu1 %vm414_vm0, %v1895_v22 }
  0x38   : > { %1820 = vmatmul.mubr.msk.bf16.gmra.mxu0 %vm414_vm0, %v1896_v23 }
  0x39   : > { %1852 = vmatmul.mubr.msk.bf16.gmra.mxu1 %vm414_vm0, %v1897_v24  ;;  %1823 = vmatprep.mubr.msk.bf16.mxu0 %vm414_vm0, %v1898_v25 }
  0x3a   : > { %1855 = vmatprep.mubr.msk.bf16.mxu1 %vm414_vm0, %v1899_v26 }
  0x40   : > { %1824 = vmatmul.mubr.msk.bf16.gmra.mxu0 %vm414_vm0, %v1900_v27 }
  0x41   : > { %1856 = vmatmul.mubr.msk.bf16.gmra.mxu1 %vm414_vm0, %v1901_v28  ;;  %1827 = vmatprep.mubr.msk.bf16.mxu0 %vm414_vm0, %v1902_v29 }
  0x42   : > { %1859 = vmatprep.mubr.msk.bf16.mxu1 %vm414_vm0, %v1903_v30 }
  0x48   : > { %1828 = vmatmul.mubr.msk.bf16.gmra.mxu0 %vm414_vm0, %v1904_v31 }
  0x49   : > { %1860 = vmatmul.mubr.msk.bf16.gmra.mxu1 %vm414_vm0, %v1905_v32 }
  0xd0   : > { %v1801_v34 = vpop.f32.mrf.mxu0 }
  0xd1   : > { %v554_v35 = vadd.f32 %v1801_v34, %v2022_v33  ;;  %v1833_v36 = vpop.f32.mrf.mxu1 }
  0xd2   : > { %v682_v37 = vadd.f32 %v1833_v36, %v2022_v33  ;;  %v545_v38 = vpop.f32.mrf.mxu0 }
  0xd3   : > { %vm802_vm1 = vcmp.ge.f32.partialorder %v554_v35, 0.0  ;;  %v866_v39 = vmul.f32 0.2, %v554_v35  ;;  %v546_v40 = vadd.f32 %v2022_v33, %v545_v38  ;;  %v673_v41 = vpop.f32.mrf.mxu1 }
  0xd4   : > { %vm834_vm2 = vcmp.ge.f32.partialorder %v682_v37, 0.0  ;;  %v898_v42 = vmul.f32 0.2, %v682_v37  ;;  %v674_v43 = vadd.f32 %v2022_v33, %v673_v41  ;;  %v1802_v44 = vpop.f32.mrf.mxu0 }
  0xd5   : > { %v930_v45 = vsel %vm802_vm1, %v554_v35, %v866_v39  ;;  %vm800_vm3 = vcmp.ge.f32.partialorder %v546_v40, 0.0  ;;  %v864_v46 = vmul.f32 0.2, %v546_v40  ;;  %v557_v47 = vadd.f32 %v1802_v44, %v2022_v33  ;;  %v1834_v48 = vpop.f32.mrf.mxu1 }
  0xd6   : > { %v962_v49 = vsel %vm834_vm2, %v682_v37, %v898_v42  ;;  %vm832_vm4 = vcmp.ge.f32.partialorder %v674_v43, 0.0  ;;  %v896_v50 = vmul.f32 0.2, %v674_v43  ;;  %v685_v51 = vadd.f32 %v1834_v48, %v2022_v33  ;;  %v548_v52 = vpop.f32.mrf.mxu0 }
  0xd7   : > { %v928_v53 = vsel %vm800_vm3, %v546_v40, %v864_v46  ;;  %vm803_vm5 = vcmp.ge.f32.partialorder %v557_v47, 0.0  ;;  %v867_v54 = vmul.f32 0.2, %v557_v47  ;;  %v549_v55 = vadd.f32 %v2022_v33, %v548_v52  ;;  %v676_v56 = vpop.f32.mrf.mxu1 }
  0xd8   : > { %v960_v57 = vsel %vm832_vm4, %v674_v43, %v896_v50  ;;  %vm835_vm6 = vcmp.ge.f32.partialorder %v685_v51, 0.0  ;;  %v899_v58 = vmul.f32 0.2, %v685_v51  ;;  %v677_v59 = vadd.f32 %v2022_v33, %v676_v56  ;;  %v1805_v60 = vpop.f32.mrf.mxu0 }
  0xd9   : > { %v931_v61 = vsel %vm803_vm5, %v557_v47, %v867_v54  ;;  %vm801_vm7 = vcmp.ge.f32.partialorder %v549_v55, 0.0  ;;  %v865_v62 = vmul.f32 0.2, %v549_v55  ;;  %v570_v63 = vadd.f32 %v1805_v60, %v2022_v33  ;;  %v1837_v0 = vpop.f32.mrf.mxu1 }
  0xda   : > { %v1581_v1 = vpack.c.bf16 %v931_v61, %v930_v45  ;;  %v963_v2 = vsel %vm835_vm6, %v685_v51, %v899_v58  ;;  %vm833_vm8 = vcmp.ge.f32.partialorder %v677_v59, 0.0  ;;  %v897_v3 = vmul.f32 0.2, %v677_v59  ;;  %v561_v4 = vpop.f32.mrf.mxu0 }
  0xdb   : > { %v1661_v5 = vpack.c.bf16 %v963_v2, %v962_v49  ;;  %v929_v6 = vsel %vm801_vm7, %v549_v55, %v865_v62  ;;  %vm806_vm9 = vcmp.ge.f32.partialorder %v570_v63, 0.0  ;;  %v870_v7 = vmul.f32 0.2, %v570_v63  ;;  %v689_v8 = vpop.f32.mrf.mxu1 }
  0xdc   : > { %1733 = vst [vmem:[%s2037_s25 + $0x8] sm:$0xff] %v1581_v1   ;;  %v1576_v9 = vpack.c.bf16 %v929_v6, %v928_v53  ;;  %v961_v10 = vsel %vm833_vm8, %v677_v59, %v897_v3  ;;  %v698_v11 = vadd.f32 %v1837_v0, %v2022_v33  ;;  %v562_v12 = vadd.f32 %v2022_v33, %v561_v4  ;;  %v1806_v13 = vpop.f32.mrf.mxu0 }
  0xdd   : > { %1749 = vst [vmem:[%s2037_s25 + $0x88] sm:$0xff] %v1661_v5   ;;  %v1656_v14 = vpack.c.bf16 %v961_v10, %v960_v57  ;;  %v934_v15 = vsel %vm806_vm9, %v570_v63, %v870_v7  ;;  %v690_v16 = vadd.f32 %v2022_v33, %v689_v8  ;;  %v573_v17 = vadd.f32 %v1806_v13, %v2022_v33  ;;  %v1838_v18 = vpop.f32.mrf.mxu1 }
  0xde   : > { %1577 = vst [vmem:[%s2037_s25] sm:$0xff] %v1576_v9   ;;  %vm838_vm10 = vcmp.ge.f32.partialorder %v698_v11, 0.0  ;;  %v902_v19 = vmul.f32 0.2, %v698_v11  ;;  %vm804_vm11 = vcmp.ge.f32.partialorder %v562_v12, 0.0  ;;  %v868_v20 = vmul.f32 0.2, %v562_v12  ;;  %v564_v21 = vpop.f32.mrf.mxu0 }
  0xdf   : > { %1748 = vst [vmem:[%s2037_s25 + $0x80] sm:$0xff] %v1656_v14   ;;  %vm836_vm12 = vcmp.ge.f32.partialorder %v690_v16, 0.0  ;;  %v900_v22 = vmul.f32 0.2, %v690_v16  ;;  %vm807_vm13 = vcmp.ge.f32.partialorder %v573_v17, 0.0  ;;  %v692_v24 = vpop.f32.mrf.mxu1  ;;  %v701_v27 = vadd.f32 %v1838_v18, %v2022_v33 }
  0xe0   : > { %v871_v23 = vmul.f32 0.2, %v573_v17  ;;  %v966_v25 = vsel %vm838_vm10, %v698_v11, %v902_v19  ;;  %v932_v26 = vsel %vm804_vm11, %v562_v12, %v868_v20  ;;  %v565_v28 = vadd.f32 %v2022_v33, %v564_v21  ;;  %v1809_v29 = vpop.f32.mrf.mxu0 }
  0xe1   : > { %v964_v30 = vsel %vm836_vm12, %v690_v16, %v900_v22  ;;  %v693_v32 = vadd.f32 %v2022_v33, %v692_v24  ;;  %v586_v34 = vadd.f32 %v1809_v29, %v2022_v33  ;;  %v1841_v35 = vpop.f32.mrf.mxu1  ;;  %vm839_vm14 = vcmp.ge.f32.partialorder %v701_v27, 0.0 }
  0xe2   : > { %v935_v31 = vsel %vm807_vm13, %v573_v17, %v871_v23  ;;  %v903_v37 = vmul.f32 0.2, %v701_v27  ;;  %vm805_vm15 = vcmp.ge.f32.partialorder %v565_v28, 0.0  ;;  %v577_v38 = vpop.f32.mrf.mxu0  ;;  %v869_v39 = vmul.f32 0.2, %v565_v28 }
  0xe3   : > { %v1591_v36 = vpack.c.bf16 %v935_v31, %v934_v15  ;;  %vm837_vm0 = vcmp.ge.f32.partialorder %v693_v32, 0.0  ;;  %v901_v40 = vmul.f32 0.2, %v693_v32  ;;  %vm810_vm1 = vcmp.ge.f32.partialorder %v586_v34, 0.0  ;;  %v705_v41 = vpop.f32.mrf.mxu1 }
  0xe4   : > { %v967_v42 = vsel %vm839_vm14, %v701_v27, %v903_v37  ;;  %v874_v43 = vmul.f32 0.2, %v586_v34  ;;  %v714_v44 = vadd.f32 %v1841_v35, %v2022_v33  ;;  %v578_v45 = vadd.f32 %v2022_v33, %v577_v38  ;;  %v1810_v46 = vpop.f32.mrf.mxu0 }
  0xe5   : > { %1735 = vst [vmem:[%s2037_s25 + $0x18] sm:$0xff] %v1591_v36   ;;  %v1671_v47 = vpack.c.bf16 %v967_v42, %v966_v25  ;;  %v933_v48 = vsel %vm805_vm15, %v565_v28, %v869_v39  ;;  %v965_v49 = vsel %vm837_vm0, %v693_v32, %v901_v40  ;;  %v706_v50 = vadd.f32 %v2022_v33, %v705_v41  ;;  %v1842_v51 = vpop.f32.mrf.mxu1 }
  0xe6   : > { %v1586_v52 = vpack.c.bf16 %v933_v48, %v932_v26  ;;  %v1666_v53 = vpack.c.bf16 %v965_v49, %v964_v30  ;;  %v938_v54 = vsel %vm810_vm1, %v586_v34, %v874_v43  ;;  %vm842_vm2 = vcmp.ge.f32.partialorder %v714_v44, 0.0  ;;  %v580_v55 = vpop.f32.mrf.mxu0 }
  0xe7   : > { %1751 = vst [vmem:[%s2037_s25 + $0x98] sm:$0xff] %v1671_v47   ;;  %v906_v56 = vmul.f32 0.2, %v714_v44  ;;  %vm808_vm3 = vcmp.ge.f32.partialorder %v578_v45, 0.0  ;;  %v872_v57 = vmul.f32 0.2, %v578_v45  ;;  %v708_v58 = vpop.f32.mrf.mxu1  ;;  %v589_v60 = vadd.f32 %v1810_v46, %v2022_v33 }
  0xe8   : > { %vm840_vm4 = vcmp.ge.f32.partialorder %v706_v50, 0.0  ;;  %1734 = vst [vmem:[%s2037_s25 + $0x10] sm:$0xff] %v1586_v52   ;;  %1750 = vst [vmem:[%s2037_s25 + $0x90] sm:$0xff] %v1666_v53   ;;  %v904_v59 = vmul.f32 0.2, %v706_v50  ;;  %v717_v61 = vadd.f32 %v1842_v51, %v2022_v33  ;;  %v581_v62 = vadd.f32 %v2022_v33, %v580_v55  ;;  %v1813_v63 = vpop.f32.mrf.mxu0 }
  0xe9   : > { %v970_v0 = vsel %vm842_vm2, %v714_v44, %v906_v56  ;;  %v936_v1 = vsel %vm808_vm3, %v578_v45, %v872_v57  ;;  %v709_v2 = vadd.f32 %v2022_v33, %v708_v58  ;;  %v602_v3 = vadd.f32 %v1813_v63, %v2022_v33  ;;  %v1845_v4 = vpop.f32.mrf.mxu1 }
  0xea   : > { %v968_v5 = vsel %vm840_vm4, %v706_v50, %v904_v59  ;;  %vm811_vm5 = vcmp.ge.f32.partialorder %v589_v60, 0.0  ;;  %v875_v6 = vmul.f32 0.2, %v589_v60  ;;  %vm843_vm6 = vcmp.ge.f32.partialorder %v717_v61, 0.0  ;;  %v593_v7 = vpop.f32.mrf.mxu0 }
  0xeb   : > { %v907_v8 = vmul.f32 0.2, %v717_v61  ;;  %vm809_vm7 = vcmp.ge.f32.partialorder %v581_v62, 0.0  ;;  %v873_v9 = vmul.f32 0.2, %v581_v62  ;;  %vm841_vm8 = vcmp.ge.f32.partialorder %v709_v2, 0.0  ;;  %v721_v10 = vpop.f32.mrf.mxu1 }
  0xec   : > { %v939_v11 = vsel %vm811_vm5, %v589_v60, %v875_v6  ;;  %v905_v12 = vmul.f32 0.2, %v709_v2  ;;  %vm814_vm9 = vcmp.ge.f32.partialorder %v602_v3, 0.0  ;;  %v878_v13 = vmul.f32 0.2, %v602_v3  ;;  %v1814_v14 = vpop.f32.mrf.mxu0 }
  0xed   : > { %v1601_v15 = vpack.c.bf16 %v939_v11, %v938_v54  ;;  %v971_v16 = vsel %vm843_vm6, %v717_v61, %v907_v8  ;;  %v937_v17 = vsel %vm809_vm7, %v581_v62, %v873_v9  ;;  %v730_v18 = vadd.f32 %v1845_v4, %v2022_v33  ;;  %v1846_v19 = vpop.f32.mrf.mxu1 }
  0xee   : > { %v1681_v20 = vpack.c.bf16 %v971_v16, %v970_v0  ;;  %v1596_v21 = vpack.c.bf16 %v937_v17, %v936_v1  ;;  %v969_v22 = vsel %vm841_vm8, %v709_v2, %v905_v12  ;;  %v942_v23 = vsel %vm814_vm9, %v602_v3, %v878_v13  ;;  %v596_v24 = vpop.f32.mrf.mxu0 }
  0xef   : > { %1737 = vst [vmem:[%s2037_s25 + $0x28] sm:$0xff] %v1601_v15   ;;  %v1676_v25 = vpack.c.bf16 %v969_v22, %v968_v5  ;;  %vm846_vm10 = vcmp.ge.f32.partialorder %v730_v18, 0.0  ;;  %v910_v26 = vmul.f32 0.2, %v730_v18  ;;  %v594_v27 = vadd.f32 %v2022_v33, %v593_v7  ;;  %v724_v28 = vpop.f32.mrf.mxu1 }
  0xf0   : > { %1753 = vst [vmem:[%s2037_s25 + $0xa8] sm:$0xff] %v1681_v20   ;;  %1736 = vst [vmem:[%s2037_s25 + $0x20] sm:$0xff] %v1596_v21   ;;  %v722_v29 = vadd.f32 %v2022_v33, %v721_v10  ;;  %v605_v30 = vadd.f32 %v1814_v14, %v2022_v33  ;;  %v733_v31 = vadd.f32 %v1846_v19, %v2022_v33  ;;  %v1817_v34 = vpop.f32.mrf.mxu0 }
  0xf1   : > { %v597_v32 = vadd.f32 %v2022_v33, %v596_v24  ;;  %1752 = vst [vmem:[%s2037_s25 + $0xa0] sm:$0xff] %v1676_v25   ;;  %v974_v35 = vsel %vm846_vm10, %v730_v18, %v910_v26  ;;  %vm812_vm11 = vcmp.ge.f32.partialorder %v594_v27, 0.0  ;;  %v876_v36 = vmul.f32 0.2, %v594_v27  ;;  %v1849_v38 = vpop.f32.mrf.mxu1 }
  0xf2   : > { %v725_v37 = vadd.f32 %v2022_v33, %v724_v28  ;;  %vm844_vm12 = vcmp.ge.f32.partialorder %v722_v29, 0.0  ;;  %v908_v39 = vmul.f32 0.2, %v722_v29  ;;  %vm815_vm13 = vcmp.ge.f32.partialorder %v605_v30, 0.0  ;;  %v609_v41 = vpop.f32.mrf.mxu0 }
  0xf3   : > { %v879_v40 = vmul.f32 0.2, %v605_v30  ;;  %v940_v42 = vsel %vm812_vm11, %v594_v27, %v876_v36  ;;  %vm847_vm14 = vcmp.ge.f32.partialorder %v733_v31, 0.0  ;;  %v911_v43 = vmul.f32 0.2, %v733_v31  ;;  %v737_v44 = vpop.f32.mrf.mxu1 }
  0xf4   : > { %vm813_vm15 = vcmp.ge.f32.partialorder %v597_v32, 0.0  ;;  %v972_v45 = vsel %vm844_vm12, %v722_v29, %v908_v39  ;;  %v877_v47 = vmul.f32 0.2, %v597_v32  ;;  %vm845_vm0 = vcmp.ge.f32.partialorder %v725_v37, 0.0  ;;  %v1818_v48 = vpop.f32.mrf.mxu0 }
  0xf5   : > { %v943_v46 = vsel %vm815_vm13, %v605_v30, %v879_v40  ;;  %v975_v50 = vsel %vm847_vm14, %v733_v31, %v911_v43  ;;  %v909_v51 = vmul.f32 0.2, %v725_v37  ;;  %v618_v52 = vadd.f32 %v1817_v34, %v2022_v33  ;;  %v1850_v53 = vpop.f32.mrf.mxu1 }
  0xf6   : > { %v1611_v49 = vpack.c.bf16 %v943_v46, %v942_v23  ;;  %v1691_v54 = vpack.c.bf16 %v975_v50, %v974_v35  ;;  %v941_v55 = vsel %vm813_vm15, %v597_v32, %v877_v47  ;;  %v746_v56 = vadd.f32 %v1849_v38, %v2022_v33  ;;  %v612_v58 = vpop.f32.mrf.mxu0 }
  0xf7   : > { %v610_v57 = vadd.f32 %v2022_v33, %v609_v41  ;;  %v1606_v59 = vpack.c.bf16 %v941_v55, %v940_v42  ;;  %v973_v60 = vsel %vm845_vm0, %v725_v37, %v909_v51  ;;  %vm818_vm1 = vcmp.ge.f32.partialorder %v618_v52, 0.0  ;;  %v740_v62 = vpop.f32.mrf.mxu1 }
  0xf8   : > { %1739 = vst [vmem:[%s2037_s25 + $0x38] sm:$0xff] %v1611_v49   ;;  %v882_v61 = vmul.f32 0.2, %v618_v52  ;;  %1755 = vst [vmem:[%s2037_s25 + $0xb8] sm:$0xff] %v1691_v54   ;;  %v1686_v63 = vpack.c.bf16 %v973_v60, %v972_v45  ;;  %vm850_vm2 = vcmp.ge.f32.partialorder %v746_v56, 0.0  ;;  %v1821_v1 = vpop.f32.mrf.mxu0  ;;  %v738_v4 = vadd.f32 %v2022_v33, %v737_v44 }
  0xf9   : > { %v914_v0 = vmul.f32 0.2, %v746_v56  ;;  %vm816_vm3 = vcmp.ge.f32.partialorder %v610_v57, 0.0  ;;  %1738 = vst [vmem:[%s2037_s25 + $0x30] sm:$0xff] %v1606_v59   ;;  %v880_v3 = vmul.f32 0.2, %v610_v57  ;;  %v621_v5 = vadd.f32 %v1818_v48, %v2022_v33  ;;  %v1853_v6 = vpop.f32.mrf.mxu1 }
  0xfa   : > { %v946_v2 = vsel %vm818_vm1, %v618_v52, %v882_v61  ;;  %1754 = vst [vmem:[%s2037_s25 + $0xb0] sm:$0xff] %v1686_v63   ;;  %v749_v8 = vadd.f32 %v1850_v53, %v2022_v33  ;;  %v613_v9 = vadd.f32 %v2022_v33, %v612_v58  ;;  %v741_v10 = vadd.f32 %v2022_v33, %v740_v62  ;;  %v625_v11 = vpop.f32.mrf.mxu0 }
  0xfb   : > { %v978_v7 = vsel %vm850_vm2, %v746_v56, %v914_v0  ;;  %v944_v12 = vsel %vm816_vm3, %v610_v57, %v880_v3  ;;  %vm848_vm4 = vcmp.ge.f32.partialorder %v738_v4, 0.0  ;;  %v912_v13 = vmul.f32 0.2, %v738_v4  ;;  %v753_v14 = vpop.f32.mrf.mxu1 }
  0xfc   : > { %vm819_vm5 = vcmp.ge.f32.partialorder %v621_v5, 0.0  ;;  %v883_v15 = vmul.f32 0.2, %v621_v5  ;;  %vm851_vm6 = vcmp.ge.f32.partialorder %v749_v8, 0.0  ;;  %v915_v16 = vmul.f32 0.2, %v749_v8  ;;  %v1822_v17 = vpop.f32.mrf.mxu0 }
  0xfd   : > { %vm817_vm7 = vcmp.ge.f32.partialorder %v613_v9, 0.0  ;;  %v976_v18 = vsel %vm848_vm4, %v738_v4, %v912_v13  ;;  %v881_v19 = vmul.f32 0.2, %v613_v9  ;;  %vm849_vm8 = vcmp.ge.f32.partialorder %v741_v10, 0.0  ;;  %v1854_v21 = vpop.f32.mrf.mxu1 }
  0xfe   : > { %v913_v20 = vmul.f32 0.2, %v741_v10  ;;  %v947_v22 = vsel %vm819_vm5, %v621_v5, %v883_v15  ;;  %v979_v23 = vsel %vm851_vm6, %v749_v8, %v915_v16  ;;  %v634_v24 = vadd.f32 %v1821_v1, %v2022_v33  ;;  %v628_v26 = vpop.f32.mrf.mxu0 }
  0xff   : > { %v762_v25 = vadd.f32 %v1853_v6, %v2022_v33  ;;  %v1621_v27 = vpack.c.bf16 %v947_v22, %v946_v2  ;;  %v1701_v28 = vpack.c.bf16 %v979_v23, %v978_v7  ;;  %v945_v29 = vsel %vm817_vm7, %v613_v9, %v881_v19  ;;  %v756_v31 = vpop.f32.mrf.mxu1 }
 0x100   : > { %v977_v30 = vsel %vm849_vm8, %v741_v10, %v913_v20  ;;  %v1616_v32 = vpack.c.bf16 %v945_v29, %v944_v12  ;;  %vm822_vm9 = vcmp.ge.f32.partialorder %v634_v24, 0.0  ;;  %v886_v35 = vmul.f32 0.2, %v634_v24  ;;  %v1825_v36 = vpop.f32.mrf.mxu0 }
 0x101   : > { %v1696_v34 = vpack.c.bf16 %v977_v30, %v976_v18  ;;  %1741 = vst [vmem:[%s2037_s25 + $0x48] sm:$0xff] %v1621_v27   ;;  %1757 = vst [vmem:[%s2037_s25 + $0xc8] sm:$0xff] %v1701_v28   ;;  %vm854_vm10 = vcmp.ge.f32.partialorder %v762_v25, 0.0  ;;  %v918_v37 = vmul.f32 0.2, %v762_v25  ;;  %v626_v38 = vadd.f32 %v2022_v33, %v625_v11  ;;  %v1857_v40 = vpop.f32.mrf.mxu1 }
 0x102   : > { %v754_v39 = vadd.f32 %v2022_v33, %v753_v14  ;;  %1740 = vst [vmem:[%s2037_s25 + $0x40] sm:$0xff] %v1616_v32   ;;  %v950_v41 = vsel %vm822_vm9, %v634_v24, %v886_v35  ;;  %v637_v42 = vadd.f32 %v1822_v17, %v2022_v33  ;;  %v765_v43 = vadd.f32 %v1854_v21, %v2022_v33  ;;  %v641_v45 = vpop.f32.mrf.mxu0 }
 0x103   : > { %1756 = vst [vmem:[%s2037_s25 + $0xc0] sm:$0xff] %v1696_v34   ;;  %v629_v44 = vadd.f32 %v2022_v33, %v628_v26  ;;  %v982_v46 = vsel %vm854_vm10, %v762_v25, %v918_v37  ;;  %vm820_vm11 = vcmp.ge.f32.partialorder %v626_v38, 0.0  ;;  %v884_v47 = vmul.f32 0.2, %v626_v38  ;;  %v769_v48 = vpop.f32.mrf.mxu1 }
 0x104   : > { %vm852_vm12 = vcmp.ge.f32.partialorder %v754_v39, 0.0  ;;  %v916_v49 = vmul.f32 0.2, %v754_v39  ;;  %vm823_vm13 = vcmp.ge.f32.partialorder %v637_v42, 0.0  ;;  %v887_v50 = vmul.f32 0.2, %v637_v42  ;;  %v1826_v51 = vpop.f32.mrf.mxu0 }
 0x105   : > { %vm855_vm14 = vcmp.ge.f32.partialorder %v765_v43, 0.0  ;;  %v948_v52 = vsel %vm820_vm11, %v626_v38, %v884_v47  ;;  %v919_v53 = vmul.f32 0.2, %v765_v43  ;;  %vm821_vm15 = vcmp.ge.f32.partialorder %v629_v44, 0.0  ;;  %v1858_v55 = vpop.f32.mrf.mxu1 }
 0x106   : > { %v885_v54 = vmul.f32 0.2, %v629_v44  ;;  %v980_v56 = vsel %vm852_vm12, %v754_v39, %v916_v49  ;;  %v951_v57 = vsel %vm823_vm13, %v637_v42, %v887_v50  ;;  %v757_v58 = vadd.f32 %v2022_v33, %v756_v31  ;;  %v644_v60 = vpop.f32.mrf.mxu0 }
 0x107   : > { %v650_v59 = vadd.f32 %v1825_v36, %v2022_v33  ;;  %v1631_v61 = vpack.c.bf16 %v951_v57, %v950_v41  ;;  %v983_v62 = vsel %vm855_vm14, %v765_v43, %v919_v53  ;;  %v778_v0 = vadd.f32 %v1857_v40, %v2022_v33  ;;  %v772_v1 = vpop.f32.mrf.mxu1 }
 0x108   : > { %v949_v63 = vsel %vm821_vm15, %v629_v44, %v885_v54  ;;  %v1711_v2 = vpack.c.bf16 %v983_v62, %v982_v46  ;;  %vm853_vm0 = vcmp.ge.f32.partialorder %v757_v58, 0.0  ;;  %v917_v4 = vmul.f32 0.2, %v757_v58  ;;  %v1829_v5 = vpop.f32.mrf.mxu0 }
 0x109   : > { %v1626_v3 = vpack.c.bf16 %v949_v63, %v948_v52  ;;  %1743 = vst [vmem:[%s2037_s25 + $0x58] sm:$0xff] %v1631_v61   ;;  %vm826_vm1 = vcmp.ge.f32.partialorder %v650_v59, 0.0  ;;  %v890_v6 = vmul.f32 0.2, %v650_v59  ;;  %vm858_vm2 = vcmp.ge.f32.partialorder %v778_v0, 0.0  ;;  %v1861_v8 = vpop.f32.mrf.mxu1 }
 0x10a   : > { %v922_v7 = vmul.f32 0.2, %v778_v0  ;;  %1759 = vst [vmem:[%s2037_s25 + $0xd8] sm:$0xff] %v1711_v2   ;;  %v981_v9 = vsel %vm853_vm0, %v757_v58, %v917_v4  ;;  %v642_v10 = vadd.f32 %v2022_v33, %v641_v45  ;;  %v770_v11 = vadd.f32 %v2022_v33, %v769_v48  ;;  %v657_v15 = vpop.f32.mrf.mxu0 }
 0x10b   : > { %1742 = vst [vmem:[%s2037_s25 + $0x50] sm:$0xff] %v1626_v3   ;;  %v653_v12 = vadd.f32 %v1826_v51, %v2022_v33  ;;  %v1706_v13 = vpack.c.bf16 %v981_v9, %v980_v56  ;;  %v781_v14 = vadd.f32 %v1858_v55, %v2022_v33  ;;  %v785_v16 = vpop.f32.mrf.mxu1  ;;  %v954_v17 = vsel %vm826_vm1, %v650_v59, %v890_v6 }
 0x10c   : > { %v986_v18 = vsel %vm858_vm2, %v778_v0, %v922_v7  ;;  %vm824_vm3 = vcmp.ge.f32.partialorder %v642_v10, 0.0  ;;  %v888_v19 = vmul.f32 0.2, %v642_v10  ;;  %vm856_vm6 = vcmp.ge.f32.partialorder %v770_v11, 0.0  ;;  %v1830_v29 = vpop.f32.mrf.mxu0 }
 0x10d   : > { %1758 = vst [vmem:[%s2037_s25 + $0xd0] sm:$0xff] %v1706_v13   ;;  %vm827_vm4 = vcmp.ge.f32.partialorder %v653_v12, 0.0  ;;  %v891_v20 = vmul.f32 0.2, %v653_v12  ;;  %vm859_vm5 = vcmp.ge.f32.partialorder %v781_v14, 0.0  ;;  %v645_v23 = vadd.f32 %v2022_v33, %v644_v60  ;;  %v1862_v30 = vpop.f32.mrf.mxu1 }
 0x10e   : > { %v923_v21 = vmul.f32 0.2, %v781_v14  ;;  %v920_v22 = vmul.f32 0.2, %v770_v11  ;;  %v773_v24 = vadd.f32 %v2022_v33, %v772_v1  ;;  %v666_v27 = vadd.f32 %v1829_v5, %v2022_v33  ;;  %v660_v43 = vpop.f32.mrf.mxu0 }
 0x10f   : > { %v955_v25 = vsel %vm827_vm4, %v653_v12, %v891_v20  ;;  %v794_v28 = vadd.f32 %v1861_v8, %v2022_v33  ;;  %vm825_vm7 = vcmp.ge.f32.partialorder %v645_v23, 0.0  ;;  %v889_v34 = vmul.f32 0.2, %v645_v23  ;;  %v788_v44 = vpop.f32.mrf.mxu1 }
 0x110   : > { %v987_v26 = vsel %vm859_vm5, %v781_v14, %v923_v21  ;;  %v1641_v31 = vpack.c.bf16 %v955_v25, %v954_v17  ;;  %vm857_vm8 = vcmp.ge.f32.partialorder %v773_v24, 0.0  ;;  %v921_v35 = vmul.f32 0.2, %v773_v24 }
 0x111   : > { %v1721_v32 = vpack.c.bf16 %v987_v26, %v986_v18  ;;  %v952_v36 = vsel %vm824_vm3, %v642_v10, %v888_v19  ;;  %v953_v37 = vsel %vm825_vm7, %v645_v23, %v889_v34  ;;  %v658_v38 = vadd.f32 %v2022_v33, %v657_v15 }
 0x112   : > { %1745 = vst [vmem:[%s2037_s25 + $0x68] sm:$0xff] %v1641_v31   ;;  %v984_v39 = vsel %vm856_vm6, %v770_v11, %v920_v22  ;;  %v1636_v40 = vpack.c.bf16 %v953_v37, %v952_v36  ;;  %v985_v41 = vsel %vm857_vm8, %v773_v24, %v921_v35  ;;  %v786_v42 = vadd.f32 %v2022_v33, %v785_v16 }
 0x113   : > { %1761 = vst [vmem:[%s2037_s25 + $0xe8] sm:$0xff] %v1721_v32   ;;  %v1716_v45 = vpack.c.bf16 %v985_v41, %v984_v39  ;;  %vm830_vm9 = vcmp.ge.f32.partialorder %v666_v27, 0.0  ;;  %v894_v46 = vmul.f32 0.2, %v666_v27  ;;  %vm862_vm10 = vcmp.ge.f32.partialorder %v794_v28, 0.0 }
 0x114   : > { %1744 = vst [vmem:[%s2037_s25 + $0x60] sm:$0xff] %v1636_v40   ;;  %v926_v47 = vmul.f32 0.2, %v794_v28  ;;  %vm828_vm11 = vcmp.ge.f32.partialorder %v658_v38, 0.0  ;;  %v669_v48 = vadd.f32 %v1830_v29, %v2022_v33  ;;  %v797_v49 = vadd.f32 %v1862_v30, %v2022_v33 }
 0x115   : > { %1760 = vst [vmem:[%s2037_s25 + $0xe0] sm:$0xff] %v1716_v45   ;;  %v892_v50 = vmul.f32 0.2, %v658_v38  ;;  %vm860_vm12 = vcmp.ge.f32.partialorder %v786_v42, 0.0  ;;  %v661_v51 = vadd.f32 %v2022_v33, %v660_v43  ;;  %v789_v52 = vadd.f32 %v2022_v33, %v788_v44 }
 0x116   : > { %v924_v53 = vmul.f32 0.2, %v786_v42  ;;  %vm831_vm13 = vcmp.ge.f32.partialorder %v669_v48, 0.0  ;;  %v895_v54 = vmul.f32 0.2, %v669_v48  ;;  %vm863_vm14 = vcmp.ge.f32.partialorder %v797_v49, 0.0 }
 0x117   : > { %v927_v55 = vmul.f32 0.2, %v797_v49  ;;  %vm829_vm15 = vcmp.ge.f32.partialorder %v661_v51, 0.0  ;;  %v893_v56 = vmul.f32 0.2, %v661_v51  ;;  %vm861_vm0 = vcmp.ge.f32.partialorder %v789_v52, 0.0 }
 0x118   : > { %v958_v57 = vsel %vm830_vm9, %v666_v27, %v894_v46  ;;  %v990_v58 = vsel %vm862_vm10, %v794_v28, %v926_v47  ;;  %v959_v59 = vsel %vm831_vm13, %v669_v48, %v895_v54  ;;  %v925_v60 = vmul.f32 0.2, %v789_v52 }
 0x119   : > { %v956_v33 = vsel %vm828_vm11, %v658_v38, %v892_v50  ;;  %v1651_v61 = vpack.c.bf16 %v959_v59, %v958_v57  ;;  %v991_v62 = vsel %vm863_vm14, %v797_v49, %v927_v55  ;;  %v957_v63 = vsel %vm829_vm15, %v661_v51, %v893_v56 }
 0x11a   : > { %v988_v0 = vsel %vm860_vm12, %v786_v42, %v924_v53  ;;  %v1731_v1 = vpack.c.bf16 %v991_v62, %v990_v58  ;;  %v1646_v2 = vpack.c.bf16 %v957_v63, %v956_v33  ;;  %v989_v3 = vsel %vm861_vm0, %v789_v52, %v925_v60 }
 0x11b   : > { %1747 = vst [vmem:[%s2037_s25 + $0x78] sm:$0xff] %v1651_v61   ;;  %v1726_v4 = vpack.c.bf16 %v989_v3, %v988_v0 }
 0x11c   : > { %1763 = vst [vmem:[%s2037_s25 + $0xf8] sm:$0xff] %v1731_v1   ;;  %1746 = vst [vmem:[%s2037_s25 + $0x70] sm:$0xff] %v1646_v2  }
 0x11d   : > { %1762 = vst [vmem:[%s2037_s25 + $0xf0] sm:$0xff] %v1726_v4  }
 0x11e PF: > { %s13_s12 = sadd.s32 1, %s1912_s12  }
 0x11f   : > { %p10_p4 = scmp.ge.s32.totalorder %s13_s12, 5  }
 0x121   :  { %12 = sbr.rel (!%p10_p4) target bundleno = 1 (0x1), region = 62 }

// kernel: cnn_encoder_forward.7
= control target key start
LH: loop header
LB: loop body
LE: loop exit
PB: predicated region body
PF: predicated region fallthrough
CT: control target
= control target key end

     0   :  { %s2666_s15 = smov 0   ;;  %s2668_s16 = smov 0   ;;  %s3460_s0 = inlined_call_operand.vmem [shape: bf16[352,256], index: 0, kind: input, shape index: {}]   ;;  %s3461_s1 = inlined_call_operand.vmem [shape: bf16[256,128], index: 1, kind: input, shape index: {}]   ;;  %s3462_s2 = inlined_call_operand.vmem [shape: f32[1,128], index: 2, kind: input, shape index: {}]   ;;  %s3463_s3 = inlined_call_operand.vmem [shape: f32[1,128], index: 3, kind: input, shape index: {}]   ;;  %s3464_s4 = inlined_call_operand.vmem [shape: bf16[352,128], index: 4, kind: output, shape index: {}]  }
   0x1   :  { %s2670_s17 = smov 0  }
   0x2 LB: > { %s26_s18 = sadd.s32 1, %s2633_s16  ;;  %p1857_p0 = scmp.ge.s32.totalorder %s2637_s17, 1  ;;  %s2637_s17 = sphi %s2670_s17, %s14_s17   ;;  %s2633_s16 = sphi %s2668_s16, %s3478_s16   ;;  %s2629_s15 = sphi %s2666_s15, %s3477_s15  }
   0x3   : > { %p28_p1 = scmp.ge.s32.totalorder %s26_s18, 2  ;;  %p186_p2 = scmp.lt.s32.totalorder %s2637_s17, 3 }
   0x5   : > { %s3480_s18 = smov (%p28_p1, %s26_s18), 0  ;;  %p187_p3 = pnand %p1857_p0, %p186_p2 }
   0x6   : > { %p236_p4 = scmp.eq.s32.totalorder (!%p187_p3), %s2629_s15, 0 }
   0x7   : > { %190 = sbr.rel (%p187_p3) target bundleno = 533 (0x215), region = 36 }
   0xc   : > { %241 = sbr.rel (!%p236_p4) target bundleno = 17 (0x11), region = 40  ;;  %v2639_v0 = vmov (%p236_p4), 0.0  }
   0xd   : > { %242 = vst [vmem:[#allocation3] sm:$0x1] (%p236_p4), %v2639_v0  ;;  %243 = vst [vmem:[#allocation4] sm:$0x1] (%p236_p4), %v2639_v0 }
  0x11 PF: > { %p1859_p5 = scmp.ne.s32.totalorder %s2629_s15, 0 }
  0x13   : > { %246 = sbr.rel (%p1859_p5) target bundleno = 429 (0x1ad), region = 44 }
  0x18   : > { %v2531_v1 = vld [vmem:[%s3461_s1 + $0x38] sm:$0xff]   ;;  %v2640_v2 = vmov 0   ;;  %v2532_v3 = vld [vmem:[%s3461_s1 + $0x30] sm:$0xff]   ;;  %v2533_v4 = vld [vmem:[%s3461_s1 + $0x28] sm:$0xff]  }
  0x19   : > { %639 = vmatprep.subr.bf16.mxu0 %v2640_v2  ;;  %2473 = vmatprep.subr.bf16.mxu1 %v2640_v2  ;;  %v2534_v5 = vld [vmem:[%s3461_s1 + $0x20] sm:$0xff]   ;;  %v2535_v6 = vld [vmem:[%s3461_s1 + $0x18] sm:$0xff]   ;;  %v2536_v8 = vld [vmem:[%s3461_s1 + $0x10] sm:$0xff]  }
  0x1a   : > { %640 = vmatpush1.bf16.msra.mxu0 %v2531_v1  ;;  %2489 = vmatpush1.bf16.msra.mxu1 %v2531_v1  ;;  %v2549_v7 = vld [vmem:[%s3460_s0 + $0x4] ss:$8 sps:$4 sm:$0xff]   ;;  %v2564_v10 = vld [vmem:[%s3460_s0 + $0xb4] ss:$8 sps:$4 sm:$0xff]   ;;  %v2547_v20 = vld [vmem:[%s3460_s0] ss:$8 sps:$4 sm:$0xff]  }
  0x1b   : > { %641 = vmatprep.subr.bf16.mxu0 %v2640_v2  ;;  %2474 = vmatprep.subr.bf16.mxu1 %v2640_v2  ;;  %v2537_v9 = vld [vmem:[%s3461_s1 + $0x8] sm:$0xff]   ;;  %v2538_v11 = vld [vmem:[%s3461_s1] sm:$0xff]   ;;  %v2539_v12 = vld [vmem:[%s3461_s1 + $0x78] sm:$0xff]  }
  0x1c   : > { %671 = vmatprep.mubr.bf16.mxu0 %v2549_v7  ;;  %759 = vmatprep.mubr.bf16.mxu1 %v2564_v10  ;;  %v2540_v13 = vld [vmem:[%s3461_s1 + $0x70] sm:$0xff]   ;;  %v2541_v14 = vld [vmem:[%s3461_s1 + $0x68] sm:$0xff]   ;;  %v2542_v15 = vld [vmem:[%s3461_s1 + $0x60] sm:$0xff]  }
  0x1d   : > { %v2543_v16 = vld [vmem:[%s3461_s1 + $0x58] sm:$0xff]   ;;  %v2544_v17 = vld [vmem:[%s3461_s1 + $0x50] sm:$0xff]   ;;  %v2545_v18 = vld [vmem:[%s3461_s1 + $0x48] sm:$0xff]  }
  0x1e   : > { %642 = vmatpush1.bf16.msra.mxu0 %v2532_v3  ;;  %2490 = vmatpush1.bf16.msra.mxu1 %v2532_v3  ;;  %v2546_v19 = vld [vmem:[%s3461_s1 + $0x40] sm:$0xff]   ;;  %v2562_v21 = vld [vmem:[%s3460_s0 + $0xb0] ss:$8 sps:$4 sm:$0xff]   ;;  %v2550_v22 = vld [vmem:[%s3460_s0 + $0x14] ss:$8 sps:$4 sm:$0xff]  }
  0x1f   : > { %643 = vmatprep.subr.bf16.mxu0 %v2640_v2  ;;  %2475 = vmatprep.subr.bf16.mxu1 %v2640_v2  ;;  %v2568_v23 = vld [vmem:[%s3460_s0 + $0xc4] ss:$8 sps:$4 sm:$0xff]   ;;  %v2552_v24 = vld [vmem:[%s3460_s0 + $0x10] ss:$8 sps:$4 sm:$0xff]   ;;  %v2570_v25 = vld [vmem:[%s3460_s0 + $0xc0] ss:$8 sps:$4 sm:$0xff]  }
  0x20   : > { %v2553_v26 = vld [vmem:[%s3460_s0 + $0x24] ss:$8 sps:$4 sm:$0xff]   ;;  %v2574_v27 = vld [vmem:[%s3460_s0 + $0xd4] ss:$8 sps:$4 sm:$0xff]   ;;  %v2555_v28 = vld [vmem:[%s3460_s0 + $0x20] ss:$8 sps:$4 sm:$0xff]  }
  0x21   : > { %v2576_v29 = vld [vmem:[%s3460_s0 + $0xd0] ss:$8 sps:$4 sm:$0xff]   ;;  %v2556_v30 = vld [vmem:[%s3460_s0 + $0x34] ss:$8 sps:$4 sm:$0xff]   ;;  %v2580_v31 = vld [vmem:[%s3460_s0 + $0xe4] ss:$8 sps:$4 sm:$0xff]  }
  0x22   : > { %644 = vmatpush1.bf16.msra.mxu0 %v2533_v4  ;;  %2491 = vmatpush1.bf16.msra.mxu1 %v2533_v4  ;;  %v2558_v32 = vld [vmem:[%s3460_s0 + $0x30] ss:$8 sps:$4 sm:$0xff]   ;;  %v2582_v33 = vld [vmem:[%s3460_s0 + $0xe0] ss:$8 sps:$4 sm:$0xff]   ;;  %v2559_v34 = vld [vmem:[%s3460_s0 + $0x44] ss:$8 sps:$4 sm:$0xff]  }
  0x23   : > { %645 = vmatprep.subr.bf16.mxu0 %v2640_v2  ;;  %2476 = vmatprep.subr.bf16.mxu1 %v2640_v2  ;;  %v2586_v35 = vld [vmem:[%s3460_s0 + $0xf4] ss:$8 sps:$4 sm:$0xff]   ;;  %v2561_v36 = vld [vmem:[%s3460_s0 + $0x40] ss:$8 sps:$4 sm:$0xff]   ;;  %v2588_v37 = vld [vmem:[%s3460_s0 + $0xf0] ss:$8 sps:$4 sm:$0xff]  }
  0x24   : > { %v2565_v38 = vld [vmem:[%s3460_s0 + $0x54] ss:$8 sps:$4 sm:$0xff]   ;;  %v2592_v39 = vld [vmem:[%s3460_s0 + $0x104] ss:$8 sps:$4 sm:$0xff]   ;;  %v2567_v40 = vld [vmem:[%s3460_s0 + $0x50] ss:$8 sps:$4 sm:$0xff]  }
  0x25   : > { %v2594_v41 = vld [vmem:[%s3460_s0 + $0x100] ss:$8 sps:$4 sm:$0xff]   ;;  %v2571_v42 = vld [vmem:[%s3460_s0 + $0x64] ss:$8 sps:$4 sm:$0xff]   ;;  %v2598_v43 = vld [vmem:[%s3460_s0 + $0x114] ss:$8 sps:$4 sm:$0xff]  }
  0x26   : > { %646 = vmatpush1.bf16.msra.mxu0 %v2534_v5  ;;  %2492 = vmatpush1.bf16.msra.mxu1 %v2534_v5  ;;  %v2573_v44 = vld [vmem:[%s3460_s0 + $0x60] ss:$8 sps:$4 sm:$0xff]   ;;  %v2600_v45 = vld [vmem:[%s3460_s0 + $0x110] ss:$8 sps:$4 sm:$0xff]   ;;  %v2577_v46 = vld [vmem:[%s3460_s0 + $0x74] ss:$8 sps:$4 sm:$0xff]  }
  0x27   : > { %647 = vmatprep.subr.bf16.mxu0 %v2640_v2  ;;  %2477 = vmatprep.subr.bf16.mxu1 %v2640_v2  ;;  %v2601_v47 = vld [vmem:[%s3460_s0 + $0x124] ss:$8 sps:$4 sm:$0xff]   ;;  %v2579_v48 = vld [vmem:[%s3460_s0 + $0x70] ss:$8 sps:$4 sm:$0xff]   ;;  %v2603_v49 = vld [vmem:[%s3460_s0 + $0x120] ss:$8 sps:$4 sm:$0xff]  }
  0x28   : > { %v2583_v50 = vld [vmem:[%s3460_s0 + $0x84] ss:$8 sps:$4 sm:$0xff]   ;;  %v2604_v51 = vld [vmem:[%s3460_s0 + $0x134] ss:$8 sps:$4 sm:$0xff]   ;;  %v2585_v52 = vld [vmem:[%s3460_s0 + $0x80] ss:$8 sps:$4 sm:$0xff]  }
  0x29   : > { %v2606_v53 = vld [vmem:[%s3460_s0 + $0x130] ss:$8 sps:$4 sm:$0xff]   ;;  %v2589_v54 = vld [vmem:[%s3460_s0 + $0x94] ss:$8 sps:$4 sm:$0xff]   ;;  %v2607_v55 = vld [vmem:[%s3460_s0 + $0x144] ss:$8 sps:$4 sm:$0xff]  }
  0x2a   : > { %648 = vmatpush1.bf16.msra.mxu0 %v2535_v6  ;;  %2493 = vmatpush1.bf16.msra.mxu1 %v2535_v6  ;;  %v2591_v56 = vld [vmem:[%s3460_s0 + $0x90] ss:$8 sps:$4 sm:$0xff]   ;;  %v2609_v57 = vld [vmem:[%s3460_s0 + $0x140] ss:$8 sps:$4 sm:$0xff]   ;;  %v2595_v58 = vld [vmem:[%s3460_s0 + $0xa4] ss:$8 sps:$4 sm:$0xff]  }
  0x2b   : > { %649 = vmatprep.subr.bf16.mxu0 %v2640_v2  ;;  %2478 = vmatprep.subr.bf16.mxu1 %v2640_v2  ;;  %v2610_v59 = vld [vmem:[%s3460_s0 + $0x154] ss:$8 sps:$4 sm:$0xff]   ;;  %v2597_v60 = vld [vmem:[%s3460_s0 + $0xa0] ss:$8 sps:$4 sm:$0xff]   ;;  %v2612_v61 = vld [vmem:[%s3460_s0 + $0x150] ss:$8 sps:$4 sm:$0xff]  }
  0x2e   : > { %650 = vmatpush1.bf16.msra.mxu0 %v2536_v8  ;;  %2494 = vmatpush1.bf16.msra.mxu1 %v2536_v8 }
  0x2f   : > { %651 = vmatprep.subr.bf16.mxu0 %v2640_v2  ;;  %2479 = vmatprep.subr.bf16.mxu1 %v2640_v2 }
  0x32   : > { %652 = vmatpush1.bf16.msra.mxu0 %v2537_v9  ;;  %2495 = vmatpush1.bf16.msra.mxu1 %v2537_v9 }
  0x33   : > { %653 = vmatprep.subr.bf16.mxu0 %v2640_v2  ;;  %2480 = vmatprep.subr.bf16.mxu1 %v2640_v2 }
  0x36   : > { %654 = vmatpush1.bf16.msra.mxu0 %v2538_v11  ;;  %2496 = vmatpush1.bf16.msra.mxu1 %v2538_v11 }
  0x37   : > { %655 = vmatprep.subr.bf16.mxu0 %v2640_v2  ;;  %2481 = vmatprep.subr.bf16.mxu1 %v2640_v2 }
  0x3a   : > { %656 = vmatpush2.bf16.msra.mxu0 %v2539_v12  ;;  %2497 = vmatpush2.bf16.msra.mxu1 %v2539_v12 }
  0x3b   : > { %657 = vmatprep.subr.bf16.mxu0 %v2640_v2  ;;  %2482 = vmatprep.subr.bf16.mxu1 %v2640_v2 }
  0x3e   : > { %658 = vmatpush2.bf16.msra.mxu0 %v2540_v13  ;;  %2498 = vmatpush2.bf16.msra.mxu1 %v2540_v13 }
  0x3f   : > { %659 = vmatprep.subr.bf16.mxu0 %v2640_v2  ;;  %2483 = vmatprep.subr.bf16.mxu1 %v2640_v2 }
  0x42   : > { %660 = vmatpush2.bf16.msra.mxu0 %v2541_v14  ;;  %2499 = vmatpush2.bf16.msra.mxu1 %v2541_v14 }
  0x43   : > { %661 = vmatprep.subr.bf16.mxu0 %v2640_v2  ;;  %2484 = vmatprep.subr.bf16.mxu1 %v2640_v2 }
  0x46   : > { %662 = vmatpush2.bf16.msra.mxu0 %v2542_v15  ;;  %2500 = vmatpush2.bf16.msra.mxu1 %v2542_v15 }
  0x47   : > { %663 = vmatprep.subr.bf16.mxu0 %v2640_v2  ;;  %2485 = vmatprep.subr.bf16.mxu1 %v2640_v2 }
  0x4a   : > { %664 = vmatpush2.bf16.msra.mxu0 %v2543_v16  ;;  %2501 = vmatpush2.bf16.msra.mxu1 %v2543_v16 }
  0x4b   : > { %665 = vmatprep.subr.bf16.mxu0 %v2640_v2  ;;  %2486 = vmatprep.subr.bf16.mxu1 %v2640_v2 }
  0x4e   : > { %666 = vmatpush2.bf16.msra.mxu0 %v2544_v17  ;;  %2502 = vmatpush2.bf16.msra.mxu1 %v2544_v17 }
  0x4f   : > { %667 = vmatprep.subr.bf16.mxu0 %v2640_v2  ;;  %2487 = vmatprep.subr.bf16.mxu1 %v2640_v2 }
  0x52   : > { %668 = vmatpush2.bf16.msra.mxu0 %v2545_v18  ;;  %2503 = vmatpush2.bf16.msra.mxu1 %v2545_v18 }
  0x53   : > { %669 = vmatprep.subr.bf16.mxu0 %v2640_v2  ;;  %2488 = vmatprep.subr.bf16.mxu1 %v2640_v2 }
  0x56   : > { %670 = vmatpush2.bf16.msra.mxu0 %v2546_v19  ;;  %2504 = vmatpush2.bf16.msra.mxu1 %v2546_v19 }
  0x59   : > { %672 = vmatmul.mubr.bf16.vlgmr.msra.gmra.mxu0 %v2547_v20  ;;  %760 = vmatmul.mubr.bf16.vlgmr.msra.gmra.mxu1 %v2562_v21 }
  0x5a   : > { %679 = vmatprep.mubr.bf16.mxu0 %v2550_v22  ;;  %767 = vmatprep.mubr.bf16.mxu1 %v2568_v23 }
  0x61   : > { %680 = vmatmul.mubr.bf16.gmra.mxu0 %v2552_v24  ;;  %768 = vmatmul.mubr.bf16.gmra.mxu1 %v2570_v25 }
  0x62   : > { %687 = vmatprep.mubr.bf16.mxu0 %v2553_v26  ;;  %775 = vmatprep.mubr.bf16.mxu1 %v2574_v27 }
  0x69   : > { %688 = vmatmul.mubr.bf16.gmra.mxu0 %v2555_v28  ;;  %776 = vmatmul.mubr.bf16.gmra.mxu1 %v2576_v29 }
  0x6a   : > { %695 = vmatprep.mubr.bf16.mxu0 %v2556_v30  ;;  %783 = vmatprep.mubr.bf16.mxu1 %v2580_v31 }
  0x71   : > { %696 = vmatmul.mubr.bf16.gmra.mxu0 %v2558_v32  ;;  %784 = vmatmul.mubr.bf16.gmra.mxu1 %v2582_v33 }
  0x72   : > { %703 = vmatprep.mubr.bf16.mxu0 %v2559_v34  ;;  %791 = vmatprep.mubr.bf16.mxu1 %v2586_v35 }
  0x79   : > { %704 = vmatmul.mubr.bf16.gmra.mxu0 %v2561_v36  ;;  %792 = vmatmul.mubr.bf16.gmra.mxu1 %v2588_v37 }
  0x7a   : > { %711 = vmatprep.mubr.bf16.mxu0 %v2565_v38  ;;  %799 = vmatprep.mubr.bf16.mxu1 %v2592_v39 }
  0x81   : > { %712 = vmatmul.mubr.bf16.gmra.mxu0 %v2567_v40  ;;  %800 = vmatmul.mubr.bf16.gmra.mxu1 %v2594_v41 }
  0x82   : > { %719 = vmatprep.mubr.bf16.mxu0 %v2571_v42  ;;  %807 = vmatprep.mubr.bf16.mxu1 %v2598_v43 }
  0x89   : > { %720 = vmatmul.mubr.bf16.gmra.mxu0 %v2573_v44  ;;  %808 = vmatmul.mubr.bf16.gmra.mxu1 %v2600_v45 }
  0x8a   : > { %727 = vmatprep.mubr.bf16.mxu0 %v2577_v46  ;;  %815 = vmatprep.mubr.bf16.mxu1 %v2601_v47 }
  0x91   : > { %728 = vmatmul.mubr.bf16.gmra.mxu0 %v2579_v48  ;;  %816 = vmatmul.mubr.bf16.gmra.mxu1 %v2603_v49 }
  0x92   : > { %735 = vmatprep.mubr.bf16.mxu0 %v2583_v50  ;;  %823 = vmatprep.mubr.bf16.mxu1 %v2604_v51 }
  0x99   : > { %736 = vmatmul.mubr.bf16.gmra.mxu0 %v2585_v52  ;;  %824 = vmatmul.mubr.bf16.gmra.mxu1 %v2606_v53 }
  0x9a   : > { %743 = vmatprep.mubr.bf16.mxu0 %v2589_v54  ;;  %831 = vmatprep.mubr.bf16.mxu1 %v2607_v55 }
  0xa1   : > { %744 = vmatmul.mubr.bf16.gmra.mxu0 %v2591_v56  ;;  %832 = vmatmul.mubr.bf16.gmra.mxu1 %v2609_v57 }
  0xa2   : > { %751 = vmatprep.mubr.bf16.mxu0 %v2595_v58  ;;  %839 = vmatprep.mubr.bf16.mxu1 %v2610_v59 }
  0xa9   : > { %752 = vmatmul.mubr.bf16.gmra.mxu0 %v2597_v60  ;;  %840 = vmatmul.mubr.bf16.gmra.mxu1 %v2612_v61 }
 0x119   : > { %v2900_v62 = vpop.f32.mrf.mxu0  ;;  %v2902_v63 = vpop.f32.mrf.mxu1 }
 0x11a   : > { %v1124_v53 = vmul.f32 %v2900_v62, %v2900_v62 }
 0x11b   : > { %v675_v0 = vpop.f32.mrf.mxu0  ;;  %v763_v1 = vpop.f32.mrf.mxu1 }
 0x11d   : > { %v2904_v2 = vpop.f32.mrf.mxu0  ;;  %v2906_v3 = vpop.f32.mrf.mxu1 }
 0x11e   : > { %v2105_v4 = vpack.c.bf16 %v2904_v2, %v2900_v62  ;;  %v2160_v5 = vpack.c.bf16 %v2906_v3, %v2902_v63  ;;  %v1125_v50 = vmul.f32 %v2904_v2, %v2904_v2  ;;  %v1072_v57 = vadd.f32 %v2904_v2, %v2900_v62 }
 0x11f   : > { %v678_v6 = vpop.f32.mrf.mxu0  ;;  %v766_v7 = vpop.f32.mrf.mxu1 }
 0x120   : > { %2106 = vst [vmem:[#allocation2 + $0xa8] sm:$0xff] %v2105_v4   ;;  %2420 = vst [vmem:[#allocation2 + $0x30] sm:$0xff] %v2160_v5   ;;  %v1168_v60 = vadd.f32 %v1125_v50, %v1124_v53 }
 0x121   : > { %v2912_v8 = vpop.f32.mrf.mxu0  ;;  %v2914_v9 = vpop.f32.mrf.mxu1 }
 0x122   : > { %v1126_v54 = vmul.f32 %v2912_v8, %v2912_v8  ;;  %v1073_v4 = vadd.f32 %v1072_v57, %v2912_v8 }
 0x123   : > { %v683_v10 = vpop.f32.mrf.mxu0  ;;  %v771_v11 = vpop.f32.mrf.mxu1 }
 0x124   : > { %v1169_v5 = vadd.f32 %v1168_v60, %v1126_v54 }
 0x125   : > { %v2916_v12 = vpop.f32.mrf.mxu0  ;;  %v2918_v13 = vpop.f32.mrf.mxu1 }
 0x126   : > { %v2110_v14 = vpack.c.bf16 %v2916_v12, %v2912_v8  ;;  %v2165_v15 = vpack.c.bf16 %v2918_v13, %v2914_v9  ;;  %v1127_v61 = vmul.f32 %v2916_v12, %v2916_v12  ;;  %v1074_v7 = vadd.f32 %v1073_v4, %v2916_v12 }
 0x127   : > { %v686_v16 = vpop.f32.mrf.mxu0  ;;  %v774_v17 = vpop.f32.mrf.mxu1 }
 0x128   : > { %2410 = vst [vmem:[#allocation2 + $0x8] sm:$0xff] %v2110_v14   ;;  %2421 = vst [vmem:[#allocation2 + $0x48] sm:$0xff] %v2165_v15   ;;  %v1170_v10 = vadd.f32 %v1169_v5, %v1127_v61 }
 0x129   : > { %v2924_v18 = vpop.f32.mrf.mxu0  ;;  %v2926_v19 = vpop.f32.mrf.mxu1 }
 0x12a   : > { %v1128_v62 = vmul.f32 %v2924_v18, %v2924_v18  ;;  %v1075_v16 = vadd.f32 %v1074_v7, %v2924_v18 }
 0x12b   : > { %v691_v20 = vpop.f32.mrf.mxu0  ;;  %v779_v21 = vpop.f32.mrf.mxu1 }
 0x12c   : > { %v1171_v8 = vadd.f32 %v1170_v10, %v1128_v62 }
 0x12d   : > { %v2928_v22 = vpop.f32.mrf.mxu0  ;;  %v2930_v23 = vpop.f32.mrf.mxu1 }
 0x12e   : > { %v2115_v24 = vpack.c.bf16 %v2928_v22, %v2924_v18  ;;  %v2170_v25 = vpack.c.bf16 %v2930_v23, %v2926_v19  ;;  %v1129_v11 = vmul.f32 %v2928_v22, %v2928_v22 }
 0x12f   : > { %v694_v26 = vpop.f32.mrf.mxu0  ;;  %v782_v27 = vpop.f32.mrf.mxu1 }
 0x130   : > { %2411 = vst [vmem:[#allocation2 + $0x40] sm:$0xff] %v2115_v24   ;;  %2422 = vst [vmem:[#allocation2 + $0x68] sm:$0xff] %v2170_v25   ;;  %v1076_v24 = vadd.f32 %v1075_v16, %v2928_v22  ;;  %v1172_v26 = vadd.f32 %v1171_v8, %v1129_v11 }
 0x131   : > { %v2936_v28 = vpop.f32.mrf.mxu0  ;;  %v2938_v29 = vpop.f32.mrf.mxu1 }
 0x132   : > { %v1130_v17 = vmul.f32 %v2936_v28, %v2936_v28  ;;  %v1077_v18 = vadd.f32 %v1076_v24, %v2936_v28 }
 0x133   : > { %v699_v30 = vpop.f32.mrf.mxu0  ;;  %v787_v31 = vpop.f32.mrf.mxu1 }
 0x135   : > { %v2940_v32 = vpop.f32.mrf.mxu0  ;;  %v2942_v33 = vpop.f32.mrf.mxu1 }
 0x136   : > { %v2120_v34 = vpack.c.bf16 %v2940_v32, %v2936_v28  ;;  %v2175_v35 = vpack.c.bf16 %v2942_v33, %v2938_v29  ;;  %v1131_v27 = vmul.f32 %v2940_v32, %v2940_v32 }
 0x137   : > { %v702_v36 = vpop.f32.mrf.mxu0  ;;  %v790_v37 = vpop.f32.mrf.mxu1 }
 0x138   : > { %2412 = vst [vmem:[#allocation2 + $0x58] sm:$0xff] %v2120_v34   ;;  %2423 = vst [vmem:[#allocation2 + $0x98] sm:$0xff] %v2175_v35   ;;  %v1173_v34 = vadd.f32 %v1172_v26, %v1130_v17  ;;  %v1078_v37 = vadd.f32 %v1077_v18, %v2940_v32 }
 0x139   : > { %v2948_v38 = vpop.f32.mrf.mxu0  ;;  %v2950_v39 = vpop.f32.mrf.mxu1 }
 0x13a   : > { %v1132_v35 = vmul.f32 %v2948_v38, %v2948_v38 }
 0x13b   : > { %v707_v40 = vpop.f32.mrf.mxu0  ;;  %v795_v41 = vpop.f32.mrf.mxu1 }
 0x13c   : > { %v1174_v40 = vadd.f32 %v1173_v34, %v1131_v27 }
 0x13d   : > { %v2952_v42 = vpop.f32.mrf.mxu0  ;;  %v2954_v43 = vpop.f32.mrf.mxu1 }
 0x13e   : > { %v2125_v44 = vpack.c.bf16 %v2952_v42, %v2948_v38  ;;  %v2180_v45 = vpack.c.bf16 %v2954_v43, %v2950_v39  ;;  %v1133_v41 = vmul.f32 %v2952_v42, %v2952_v42  ;;  %v1175_v28 = vadd.f32 %v1174_v40, %v1132_v35 }
 0x13f   : > { %v710_v46 = vpop.f32.mrf.mxu0  ;;  %v798_v47 = vpop.f32.mrf.mxu1 }
 0x140   : > { %2413 = vst [vmem:[#allocation2 + $0x20] sm:$0xff] %v2125_v44   ;;  %2424 = vst [vmem:[#allocation2 + $0xa0] sm:$0xff] %v2180_v45   ;;  %v1079_v46 = vadd.f32 %v1078_v37, %v2948_v38  ;;  %v1176_v54 = vadd.f32 %v1175_v28, %v1133_v41 }
 0x141   : > { %v2960_v48 = vpop.f32.mrf.mxu0  ;;  %v2962_v49 = vpop.f32.mrf.mxu1 }
 0x142   : > { %v1134_v47 = vmul.f32 %v2960_v48, %v2960_v48 }
 0x143   : > { %v715_v51 = vpop.f32.mrf.mxu0  ;;  %v803_v52 = vpop.f32.mrf.mxu1 }
 0x144   : > { %v1080_v52 = vadd.f32 %v1079_v46, %v2952_v42  ;;  %v1177_v60 = vadd.f32 %v1176_v54, %v1134_v47 }
 0x145   : > { %v2970_v55 = vpop.f32.mrf.mxu0  ;;  %v2972_v56 = vpop.f32.mrf.mxu1 }
 0x146   : > { %v2130_v58 = vpack.c.bf16 %v2970_v55, %v2960_v48  ;;  %v2185_v59 = vpack.c.bf16 %v2972_v56, %v2962_v49  ;;  %v1135_v57 = vmul.f32 %v2970_v55, %v2970_v55  ;;  %v1081_v38 = vadd.f32 %v1080_v52, %v2960_v48 }
 0x147   : > { %v718_v0 = vpop.f32.mrf.mxu0  ;;  %v806_v1 = vpop.f32.mrf.mxu1 }
 0x148   : > { %2414 = vst [vmem:[#allocation2 + $0x38] sm:$0xff] %v2130_v58   ;;  %2425 = vst [vmem:[#allocation2 + $0x60] sm:$0xff] %v2185_v59   ;;  %v1082_v42 = vadd.f32 %v1081_v38, %v2970_v55  ;;  %v1178_v4 = vadd.f32 %v1177_v60, %v1135_v57 }
 0x149   : > { %v721_v2 = vpop.f32.mrf.mxu0  ;;  %v2985_v6 = vpop.f32.mrf.mxu1 }
 0x14a   : > { %v1136_v61 = vmul.f32 %v721_v2, %v721_v2  ;;  %v1083_v10 = vadd.f32 %v1082_v42, %v721_v2 }
 0x14b   : > { %v723_v14 = vpop.f32.mrf.mxu0  ;;  %v811_v15 = vpop.f32.mrf.mxu1 }
 0x14c   : > { %v1179_v11 = vadd.f32 %v1178_v4, %v1136_v61 }
 0x14d   : > { %v724_v20 = vpop.f32.mrf.mxu0  ;;  %v2993_v21 = vpop.f32.mrf.mxu1 }
 0x14e   : > { %v2135_v25 = vpack.c.bf16 %v724_v20, %v721_v2  ;;  %v2190_v12 = vpack.c.bf16 %v2993_v21, %v2985_v6  ;;  %v1137_v5 = vmul.f32 %v724_v20, %v724_v20  ;;  %v1084_v48 = vadd.f32 %v1083_v10, %v724_v20 }
 0x14f   : > { %v726_v30 = vpop.f32.mrf.mxu0  ;;  %v814_v31 = vpop.f32.mrf.mxu1 }
 0x150   : > { %2415 = vst [vmem:[#allocation2 + $0x70] sm:$0xff] %v2135_v25   ;;  %2426 = vst [vmem:[#allocation2 + $0x28] sm:$0xff] %v2190_v12   ;;  %v1180_v24 = vadd.f32 %v1179_v11, %v1137_v5 }
 0x151   : > { %v729_v36 = vpop.f32.mrf.mxu0  ;;  %v3003_v22 = vpop.f32.mrf.mxu1 }
 0x152   : > { %v1138_v14 = vmul.f32 %v729_v36, %v729_v36  ;;  %v1085_v55 = vadd.f32 %v1084_v48, %v729_v36 }
 0x153   : > { %v731_v44 = vpop.f32.mrf.mxu0  ;;  %v819_v45 = vpop.f32.mrf.mxu1 }
 0x154   : > { %v1181_v27 = vadd.f32 %v1180_v24, %v1138_v14 }
 0x155   : > { %v732_v50 = vpop.f32.mrf.mxu0  ;;  %v3011_v51 = vpop.f32.mrf.mxu1 }
 0x156   : > { %v2140_v53 = vpack.c.bf16 %v732_v50, %v729_v36  ;;  %v2195_v32 = vpack.c.bf16 %v3011_v51, %v3003_v22  ;;  %v1139_v25 = vmul.f32 %v732_v50, %v732_v50  ;;  %v1086_v18 = vadd.f32 %v1085_v55, %v732_v50 }
 0x157   : > { %v734_v58 = vpop.f32.mrf.mxu0  ;;  %v822_v59 = vpop.f32.mrf.mxu1 }
 0x158   : > { %2416 = vst [vmem:[#allocation2 + $0x80] sm:$0xff] %v2140_v53   ;;  %2427 = vst [vmem:[#allocation2 + $0x50] sm:$0xff] %v2195_v32   ;;  %v1182_v34 = vadd.f32 %v1181_v27, %v1139_v25  ;;  %v1148_v27 = vmul.f32 %v2914_v9, %v2914_v9 }
 0x159   : > { %v737_v0 = vpop.f32.mrf.mxu0  ;;  %v3019_v1 = vpop.f32.mrf.mxu1 }
 0x15a   : > { %v1140_v30 = vmul.f32 %v737_v0, %v737_v0  ;;  %v1087_v40 = vadd.f32 %v1086_v18, %v737_v0  ;;  %v1149_v18 = vmul.f32 %v2918_v13, %v2918_v13 }
 0x15b   : > { %v739_v62 = vpop.f32.mrf.mxu0  ;;  %v827_v7 = vpop.f32.mrf.mxu1 }
 0x15c   : > { %v1183_v41 = vadd.f32 %v1182_v34, %v1140_v30 }
 0x15d   : > { %v740_v15 = vpop.f32.mrf.mxu0  ;;  %v3022_v16 = vpop.f32.mrf.mxu1 }
 0x15e   : > { %v2145_v8 = vpack.c.bf16 %v740_v15, %v737_v0  ;;  %v2200_v17 = vpack.c.bf16 %v3022_v16, %v3019_v1  ;;  %v1141_v35 = vmul.f32 %v740_v15, %v740_v15  ;;  %v1088_v28 = vadd.f32 %v1087_v40, %v740_v15 }
 0x15f   : > { %v742_v12 = vpop.f32.mrf.mxu0  ;;  %v830_v26 = vpop.f32.mrf.mxu1 }
 0x160   : > { %2417 = vst [vmem:[#allocation2 + $0x88] sm:$0xff] %v2145_v8   ;;  %2428 = vst [vmem:[#allocation2 + $0x78] sm:$0xff] %v2200_v17   ;;  %v1184_v52 = vadd.f32 %v1183_v41, %v1141_v35  ;;  %v1146_v17 = vmul.f32 %v2902_v63, %v2902_v63  ;;  %v1147_v12 = vmul.f32 %v2906_v3, %v2906_v3 }
 0x161   : > { %v745_v2 = vpop.f32.mrf.mxu0  ;;  %v3026_v31 = vpop.f32.mrf.mxu1  ;;  %v1150_v35 = vmul.f32 %v2926_v19, %v2926_v19 }
 0x162   : > { %v1142_v44 = vmul.f32 %v745_v2, %v745_v2  ;;  %v1089_v50 = vadd.f32 %v1088_v28, %v745_v2 }
 0x163   : > { %v747_v20 = vpop.f32.mrf.mxu0  ;;  %v835_v37 = vpop.f32.mrf.mxu1 }
 0x164   : > { %v1185_v57 = vadd.f32 %v1184_v52, %v1142_v44 }
 0x165   : > { %v748_v45 = vpop.f32.mrf.mxu0  ;;  %v3028_v46 = vpop.f32.mrf.mxu1 }
 0x166   : > { %v2150_v36 = vpack.c.bf16 %v748_v45, %v745_v2  ;;  %v2205_v47 = vpack.c.bf16 %v3028_v46, %v3026_v31  ;;  %v1143_v53 = vmul.f32 %v748_v45, %v748_v45  ;;  %v1090_v38 = vadd.f32 %v1089_v50, %v748_v45 }
 0x167   : > { %v750_v32 = vpop.f32.mrf.mxu0  ;;  %v838_v54 = vpop.f32.mrf.mxu1 }
 0x168   : > { %2418 = vst [vmem:[#allocation2 + $0x10] sm:$0xff] %v2150_v36   ;;  %2429 = vst [vmem:[#allocation2 + $0x18] sm:$0xff] %v2205_v47   ;;  %v1186_v61 = vadd.f32 %v1185_v57, %v1143_v53 }
 0x169   : > { %v753_v58 = vpop.f32.mrf.mxu0  ;;  %v3032_v59 = vpop.f32.mrf.mxu1 }
 0x16a   : > { %v1144_v60 = vmul.f32 %v753_v58, %v753_v58  ;;  %v1091_v4 = vadd.f32 %v1090_v38, %v753_v58  ;;  %v1158_v38 = vmul.f32 %v2985_v6, %v2985_v6 }
 0x16b   : > { %v755_v0 = vpop.f32.mrf.mxu0  ;;  %v843_v42 = vpop.f32.mrf.mxu1 }
 0x16c   : > { %v1187_v5 = vadd.f32 %v1186_v61, %v1144_v60  ;;  %v1159_v0 = vmul.f32 %v2993_v21, %v2993_v21 }
 0x16d   : > { %v756_v62 = vpop.f32.mrf.mxu0  ;;  %v3034_v7 = vpop.f32.mrf.mxu1 }
 0x16e   : > { %v2155_v10 = vpack.c.bf16 %v756_v62, %v753_v58  ;;  %v1092_v11 = vadd.f32 %v1091_v4, %v756_v62  ;;  %v1145_v14 = vmul.f32 %v756_v62, %v756_v62  ;;  %v2210_v15 = vpack.c.bf16 %v3034_v7, %v3032_v59 }
 0x16f   : > { %v758_v48 = vpop.f32.mrf.mxu0  ;;  %v846_v8 = vpop.f32.mrf.mxu1  ;;  %v1160_v4 = vmul.f32 %v3003_v22, %v3003_v22  ;;  %v1161_v62 = vmul.f32 %v3011_v51, %v3011_v51 }
 0x170   : > { %2419 = vst [vmem:[#allocation2 + $0x90] sm:$0xff] %v2155_v10   ;;  %v1093_v24 = vadd.f32 %v1092_v11, %v2902_v63  ;;  %v1188_v25 = vadd.f32 %v1187_v5, %v1145_v14  ;;  %2430 = vst [vmem:[#allocation2] sm:$0xff] %v2210_v15   ;;  %v1162_v11 = vmul.f32 %v3019_v1, %v3019_v1 }
 0x171   : > { %v1163_v15 = vmul.f32 %v3022_v16, %v3022_v16  ;;  %v1164_v8 = vmul.f32 %v3026_v31, %v3026_v31 }
 0x172   : > { %v1094_v26 = vadd.f32 %v1093_v24, %v2906_v3  ;;  %v1189_v55 = vadd.f32 %v1188_v25, %v1146_v17  ;;  %v1151_v3 = vmul.f32 %v2930_v23, %v2930_v23  ;;  %v1165_v24 = vmul.f32 %v3028_v46, %v3028_v46 }
 0x174   : > { %v1095_v30 = vadd.f32 %v1094_v26, %v2914_v9  ;;  %v1190_v2 = vadd.f32 %v1189_v55, %v1147_v12  ;;  %v1152_v9 = vmul.f32 %v2938_v29, %v2938_v29  ;;  %v1166_v12 = vmul.f32 %v3032_v59, %v3032_v59 }
 0x175   : > { %v1167_v55 = vmul.f32 %v3034_v7, %v3034_v7 }
 0x176   : > { %v1096_v34 = vadd.f32 %v1095_v30, %v2918_v13  ;;  %v1191_v63 = vadd.f32 %v1190_v2, %v1148_v27  ;;  %v1153_v13 = vmul.f32 %v2942_v33, %v2942_v33 }
 0x178   : > { %v1097_v20 = vadd.f32 %v1096_v34, %v2926_v19  ;;  %v1192_v37 = vadd.f32 %v1191_v63, %v1149_v18  ;;  %v1154_v19 = vmul.f32 %v2950_v39, %v2950_v39 }
 0x17a   : > { %v1098_v40 = vadd.f32 %v1097_v20, %v2930_v23  ;;  %v1193_v41 = vadd.f32 %v1192_v37, %v1150_v35  ;;  %v1155_v23 = vmul.f32 %v2954_v43, %v2954_v43  ;;  %v1071_v37 = vld [vmem:[#allocation3] sm:$0x1] }
 0x17c   : > { %v1194_v44 = vadd.f32 %v1193_v41, %v1151_v3  ;;  %v1099_v45 = vadd.f32 %v1098_v40, %v2938_v29  ;;  %v1156_v29 = vmul.f32 %v2962_v49, %v2962_v49 }
 0x17e   : > { %v1100_v28 = vadd.f32 %v1099_v45, %v2942_v33  ;;  %v1195_v36 = vadd.f32 %v1194_v44, %v1152_v9  ;;  %v1157_v33 = vmul.f32 %v2972_v56, %v2972_v56 }
 0x180   : > { %v1101_v47 = vadd.f32 %v1100_v28, %v2950_v39  ;;  %v1196_v52 = vadd.f32 %v1195_v36, %v1153_v13 }
 0x182   : > { %v1102_v53 = vadd.f32 %v1101_v47, %v2954_v43  ;;  %v1197_v32 = vadd.f32 %v1196_v52, %v1154_v19 }
 0x184   : > { %v1103_v54 = vadd.f32 %v1102_v53, %v2962_v49  ;;  %v1198_v50 = vadd.f32 %v1197_v32, %v1155_v23 }
 0x186   : > { %v1104_v57 = vadd.f32 %v1103_v54, %v2972_v56  ;;  %v1199_v58 = vadd.f32 %v1198_v50, %v1156_v29 }
 0x188   : > { %v1105_v39 = vadd.f32 %v1104_v57, %v2985_v6  ;;  %v1200_v60 = vadd.f32 %v1199_v58, %v1157_v33 }
 0x18a   : > { %v1201_v43 = vadd.f32 %v1200_v60, %v1158_v38  ;;  %v1106_v61 = vadd.f32 %v1105_v39, %v2993_v21 }
 0x18c   : > { %v1202_v49 = vadd.f32 %v1201_v43, %v1159_v0  ;;  %v1107_v42 = vadd.f32 %v1106_v61, %v3003_v22 }
 0x18e   : > { %v1203_v56 = vadd.f32 %v1202_v49, %v1160_v4  ;;  %v1108_v5 = vadd.f32 %v1107_v42, %v3011_v51 }
 0x190   : > { %v1204_v6 = vadd.f32 %v1203_v56, %v1161_v62  ;;  %v1109_v10 = vadd.f32 %v1108_v5, %v3019_v1 }
 0x192   : > { %v1205_v14 = vadd.f32 %v1204_v6, %v1162_v11  ;;  %v1110_v21 = vadd.f32 %v1109_v10, %v3022_v16 }
 0x194   : > { %v1206_v48 = vadd.f32 %v1205_v14, %v1163_v15  ;;  %v1111_v22 = vadd.f32 %v1110_v21, %v3026_v31 }
 0x196   : > { %v1207_v17 = vadd.f32 %v1206_v48, %v1164_v8  ;;  %v1112_v51 = vadd.f32 %v1111_v22, %v3028_v46 }
 0x198   : > { %v1208_v25 = vadd.f32 %v1207_v17, %v1165_v24  ;;  %v1113_v1 = vadd.f32 %v1112_v51, %v3032_v59  ;;  %v1123_v59 = vld [vmem:[#allocation4] sm:$0x1] }
 0x19a   : > { %v1209_v26 = vadd.f32 %v1208_v25, %v1166_v12  ;;  %v1114_v16 = vadd.f32 %v1113_v1, %v3034_v7 }
 0x19c   : > { %v1115_v27 = vrot.slane %v1114_v16, 4  ;;  %v1210_v31 = vadd.f32 %v1209_v26, %v1167_v55 }
 0x19e   : > { %v1116_v30 = vadd.f32 %v1115_v27, %v1114_v16  ;;  %v1211_v2 = vrot.slane %v1210_v31, 4 }
 0x1a0   : > { %v1117_v18 = vrot.slane %v1116_v30, 2  ;;  %v1212_v34 = vadd.f32 %v1211_v2, %v1210_v31 }
 0x1a2   : > { %v1118_v63 = vadd.f32 %v1117_v18, %v1116_v30  ;;  %v1213_v46 = vrot.slane %v1212_v34, 2 }
 0x1a4   : > { %v1119_v35 = vrot.slane %v1118_v63, 1  ;;  %v1214_v20 = vadd.f32 %v1213_v46, %v1212_v34 }
 0x1a6   : > { %v1120_v3 = vadd.f32 %v1119_v35, %v1118_v63  ;;  %v1215_v40 = vrot.slane %v1214_v20, 1 }
 0x1a8   : > { %v1121_v41 = vadd.f32 %v1120_v3, %v1071_v37  ;;  %v1216_v9 = vadd.f32 %v1215_v40, %v1214_v20 }
 0x1aa   : > { %1122 = vst [vmem:[#allocation3] sm:$0x1] %v1121_v41  ;;  %v1217_v44 = vadd.f32 %v1216_v9, %v1123_v59 }
 0x1ac   : > { %1218 = vst [vmem:[#allocation4] sm:$0x1] %v1217_v44 }
 0x1ad PF: > { %p1964_p6 = scmp.ne.s32.totalorder %s2629_s15, 1 }
 0x1af   : > { %1222 = sbr.rel (%p1964_p6) target bundleno = 533 (0x215), region = 48 }
 0x1b4   : > { %v1223_v7 = vld [vmem:[#allocation3] sm:$0x1]  ;;  %v1225_v45 = vld [vmem:[#allocation4] sm:$0x1]  ;;  %v1329_v23 = vlaneseq  ;;  %v3111_v32 = vld [vmem:[#allocation2 + $0xa8] sm:$0xff]  }
 0x1b5   : > { %v3105_v13 = vmul.f32 0.00295858, %v1223_v7  ;;  %v1226_v28 = vmul.f32 0.00295858, %v1225_v45  ;;  %v3113_v29 = vld [vmem:[#allocation2 + $0x8] sm:$0xff]   ;;  %v3115_v54 = vld [vmem:[#allocation2 + $0x40] sm:$0xff]   ;;  %v2214_v58 = vunpack.c.l.bf16 %v3111_v32  ;;  %v2215_v39 = vunpack.c.h.bf16 %v3111_v32 }
 0x1b6   : > { %v3109_v53 = vshrl.u32 %v1329_v23, 7  ;;  %v3117_v50 = vld [vmem:[#allocation2 + $0x58] sm:$0xff]   ;;  %v3119_v33 = vld [vmem:[#allocation2 + $0x20] sm:$0xff]   ;;  %v2218_v60 = vunpack.c.l.bf16 %v3113_v29  ;;  %v3127_v43 = vld [vmem:[#allocation2 + $0x70] sm:$0xff]   ;;  %v2219_v0 = vunpack.c.h.bf16 %v3113_v29  ;;  %v2222_v49 = vunpack.c.l.bf16 %v3115_v54 }
 0x1b7   : > { %v1227_v36 = vmul.f32 %v3105_v13, %v3105_v13  ;;  %v3121_v57 = vld [vmem:[#allocation2 + $0x38] sm:$0xff]   ;;  %v3129_v61 = vld [vmem:[#allocation2 + $0x80] sm:$0xff]   ;;  %v2223_v42 = vunpack.c.h.bf16 %v3115_v54  ;;  %v2226_v4 = vunpack.c.l.bf16 %v3117_v50  ;;  %v3135_v56 = vld [vmem:[#allocation2 + $0x88] sm:$0xff]   ;;  %v2227_v62 = vunpack.c.h.bf16 %v3117_v50 }
 0x1b8   : > { %v1331_v38 = vsub.s32 0, %v3109_v53  ;;  %v3137_v5 = vld [vmem:[#allocation2 + $0x10] sm:$0xff]   ;;  %v2230_v6 = vunpack.c.l.bf16 %v3119_v33  ;;  %v2231_v10 = vunpack.c.h.bf16 %v3119_v33  ;;  %v2234_v11 = vunpack.c.l.bf16 %v3121_v57  ;;  %v3151_v17 = vld [vmem:[#allocation2 + $0x48] sm:$0xff]   ;;  %v3159_v26 = vld [vmem:[#allocation2 + $0x98] sm:$0xff]  }
 0x1b9   : > { %v1228_v19 = vsub.f32 %v1226_v28, %v1227_v36  ;;  %v3143_v14 = vld [vmem:[#allocation2 + $0x90] sm:$0xff]   ;;  %v2235_v15 = vunpack.c.h.bf16 %v3121_v57  ;;  %v2238_v48 = vunpack.c.l.bf16 %v3127_v43  ;;  %v2239_v22 = vunpack.c.h.bf16 %v3127_v43  ;;  %v3153_v51 = vld [vmem:[#allocation2 + $0x68] sm:$0xff]   ;;  %v3161_v16 = vld [vmem:[#allocation2 + $0xa0] sm:$0xff]  }
 0x1ba   : > { %v3145_v21 = vld [vmem:[#allocation2 + $0x30] sm:$0xff]   ;;  %v2242_v8 = vunpack.c.l.bf16 %v3129_v61  ;;  %v2243_v24 = vunpack.c.h.bf16 %v3129_v61  ;;  %v2246_v25 = vunpack.c.l.bf16 %v3135_v56  ;;  %v2247_v1 = vunpack.c.h.bf16 %v3135_v56  ;;  %v1230_v55 = vld [vmem:[%s3462_s2] sm:$0x1]  ;;  %v3176_v20 = vld [vmem:[#allocation2 + $0x28] sm:$0xff]  }
 0x1bb   : > { %v1229_v47 = vmax.f32 %v1228_v19, 0.0  ;;  %v2250_v12 = vunpack.c.l.bf16 %v3137_v5  ;;  %v2251_v27 = vunpack.c.h.bf16 %v3137_v5  ;;  %v2254_v31 = vunpack.c.l.bf16 %v3143_v14  ;;  %v3170_v18 = vld [vmem:[#allocation2 + $0x60] sm:$0xff]   ;;  %v3178_v37 = vld [vmem:[#allocation2 + $0x50] sm:$0xff]   ;;  %v3184_v44 = vld [vmem:[#allocation2 + $0x78] sm:$0xff]  }
 0x1bc   : > { %v2255_v30 = vunpack.c.h.bf16 %v3143_v14  ;;  %v2258_v2 = vunpack.c.l.bf16 %v3145_v21  ;;  %v2259_v34 = vunpack.c.h.bf16 %v3145_v21  ;;  %v2262_v63 = vunpack.c.l.bf16 %v3151_v17  ;;  %v3189_v19 = vld [vmem:[#allocation2 + $0x18] sm:$0xff]  }
 0x1bd   : > { %v1231_v52 = vadd.f32 1e-05, %v1229_v47  ;;  %v2263_v46 = vunpack.c.h.bf16 %v3151_v17  ;;  %v2266_v35 = vunpack.c.l.bf16 %v3153_v51  ;;  %v2267_v40 = vunpack.c.h.bf16 %v3153_v51  ;;  %v3191_v47 = vld [vmem:[#allocation2] sm:$0xff]  }
 0x1be   : > { %v2290_v45 = vunpack.c.l.bf16 %v3184_v44  ;;  %v2294_v41 = vunpack.c.l.bf16 %v3189_v19  ;;  %v2298_v43 = vunpack.c.l.bf16 %v3191_v47 }
 0x1bf   : > { %2613 = vrsqrt.f32 %v1231_v52  ;;  %v1234_v52 = vld [vmem:[%s3463_s3] sm:$0x1] }
 0x1cc   : > { %v2614_v3 = vpop.eup %2613 }
 0x1cd   : > { %v1233_v7 = vmul.f32 %v2614_v3, %v1230_v55  ;;  %v2287_v3 = vunpack.c.h.bf16 %v3178_v37 }
 0x1cf   : > { %v1235_v28 = vmul.f32 %v1233_v7, %v3105_v13  ;;  %v3203_v36 = vrot.slane %v1233_v7, %v1331_v38 }
 0x1d1   : > { %v1236_v59 = vsub.f32 %v1234_v52, %v1235_v28  ;;  %v1334_v13 = vmul.f32 %v2214_v58, %v3203_v36  ;;  %v1335_v7 = vmul.f32 %v2215_v39, %v3203_v36  ;;  %v1336_v9 = vmul.f32 %v2218_v60, %v3203_v36 }
 0x1d2   : > { %v1337_v23 = vmul.f32 %v2219_v0, %v3203_v36  ;;  %v1338_v28 = vmul.f32 %v2222_v49, %v3203_v36  ;;  %v1339_v58 = vmul.f32 %v2223_v42, %v3203_v36  ;;  %v1340_v32 = vmul.f32 %v2226_v4, %v3203_v36 }
 0x1d3   : > { %v3234_v39 = vrot.slane %v1236_v59, %v1331_v38  ;;  %v1341_v29 = vmul.f32 %v2227_v62, %v3203_v36  ;;  %v1342_v60 = vmul.f32 %v2230_v6, %v3203_v36  ;;  %v1343_v54 = vmul.f32 %v2231_v10, %v3203_v36 }
 0x1d4   : > { %v1344_v0 = vmul.f32 %v2234_v11, %v3203_v36  ;;  %v1345_v53 = vmul.f32 %v2235_v15, %v3203_v36  ;;  %v1346_v38 = vmul.f32 %v2238_v48, %v3203_v36  ;;  %v1347_v49 = vmul.f32 %v2239_v22, %v3203_v36 }
 0x1d5   : > { %v1384_v50 = vadd.f32 %v3234_v39, %v1334_v13  ;;  %v1385_v42 = vadd.f32 %v3234_v39, %v1335_v7  ;;  %v1386_v4 = vadd.f32 %v3234_v39, %v1336_v9  ;;  %v1387_v62 = vadd.f32 %v3234_v39, %v1337_v23 }
 0x1d6   : > { %v1388_v33 = vadd.f32 %v3234_v39, %v1338_v28  ;;  %v1389_v6 = vadd.f32 %v3234_v39, %v1339_v58  ;;  %v1390_v57 = vadd.f32 %v3234_v39, %v1340_v32  ;;  %v1391_v10 = vadd.f32 %v3234_v39, %v1341_v29 }
 0x1d7   : > { %vm1428_vm0 = vcmp.ge.f32.partialorder %v1384_v50, 0.0  ;;  %vm1429_vm1 = vcmp.ge.f32.partialorder %v1385_v42, 0.0  ;;  %v1472_v11 = vmul.f32 0.2, %v1384_v50  ;;  %v1473_v15 = vmul.f32 0.2, %v1385_v42 }
 0x1d8   : > { %vm1430_vm2 = vcmp.ge.f32.partialorder %v1386_v4, 0.0  ;;  %vm1431_vm3 = vcmp.ge.f32.partialorder %v1387_v62, 0.0  ;;  %v1474_v48 = vmul.f32 0.2, %v1386_v4  ;;  %v1475_v22 = vmul.f32 0.2, %v1387_v62 }
 0x1d9   : > { %v1516_v59 = vsel %vm1428_vm0, %v1384_v50, %v1472_v11  ;;  %v1517_v9 = vsel %vm1429_vm1, %v1385_v42, %v1473_v15  ;;  %vm1432_vm4 = vcmp.ge.f32.partialorder %v1388_v33, 0.0  ;;  %vm1433_vm5 = vcmp.ge.f32.partialorder %v1389_v6, 0.0 }
 0x1da   : > { %v2303_v52 = vpack.c.bf16 %v1517_v9, %v1516_v59  ;;  %v1518_v23 = vsel %vm1430_vm2, %v1386_v4, %v1474_v48  ;;  %v1519_v13 = vsel %vm1431_vm3, %v1387_v62, %v1475_v22  ;;  %v1476_v7 = vmul.f32 0.2, %v1388_v33 }
 0x1db   : > { %v2308_v28 = vpack.c.bf16 %v1519_v13, %v1518_v23  ;;  %v1477_v58 = vmul.f32 0.2, %v1389_v6  ;;  %vm1434_vm6 = vcmp.ge.f32.partialorder %v1390_v57, 0.0  ;;  %vm1435_vm7 = vcmp.ge.f32.partialorder %v1391_v10, 0.0 }
 0x1dc   : > { %2304 = vst [vmem:[%s3464_s4] sm:$0xff] %v2303_v52   ;;  %v1520_v32 = vsel %vm1432_vm4, %v1388_v33, %v1476_v7  ;;  %v1478_v29 = vmul.f32 0.2, %v1390_v57  ;;  %v1479_v55 = vmul.f32 0.2, %v1391_v10  ;;  %v1392_v50 = vadd.f32 %v3234_v39, %v1342_v60 }
 0x1dd   : > { %2452 = vst [vmem:[%s3464_s4 + $0x8] sm:$0xff] %v2308_v28   ;;  %v1521_v42 = vsel %vm1433_vm5, %v1389_v6, %v1477_v58  ;;  %v1393_v4 = vadd.f32 %v3234_v39, %v1343_v54  ;;  %v1394_v62 = vadd.f32 %v3234_v39, %v1344_v0  ;;  %v1395_v11 = vadd.f32 %v3234_v39, %v1345_v53 }
 0x1de   : > { %v2313_v15 = vpack.c.bf16 %v1521_v42, %v1520_v32  ;;  %v1522_v48 = vsel %vm1434_vm6, %v1390_v57, %v1478_v29  ;;  %v1523_v22 = vsel %vm1435_vm7, %v1391_v10, %v1479_v55  ;;  %vm1436_vm8 = vcmp.ge.f32.partialorder %v1392_v50, 0.0 }
 0x1df   : > { %v2318_v33 = vpack.c.bf16 %v1523_v22, %v1522_v48  ;;  %vm1437_vm9 = vcmp.ge.f32.partialorder %v1393_v4, 0.0  ;;  %v1480_v59 = vmul.f32 0.2, %v1392_v50  ;;  %v1481_v9 = vmul.f32 0.2, %v1393_v4 }
 0x1e0   : > { %2453 = vst [vmem:[%s3464_s4 + $0x10] sm:$0xff] %v2313_v15   ;;  %vm1438_vm10 = vcmp.ge.f32.partialorder %v1394_v62, 0.0  ;;  %vm1439_vm11 = vcmp.ge.f32.partialorder %v1395_v11, 0.0  ;;  %v1482_v60 = vmul.f32 0.2, %v1394_v62  ;;  %v1396_v55 = vadd.f32 %v3234_v39, %v1346_v38 }
 0x1e1   : > { %v1483_v54 = vmul.f32 0.2, %v1395_v11  ;;  %2454 = vst [vmem:[%s3464_s4 + $0x18] sm:$0xff] %v2318_v33   ;;  %v1524_v0 = vsel %vm1436_vm8, %v1392_v50, %v1480_v59  ;;  %v1525_v53 = vsel %vm1437_vm9, %v1393_v4, %v1481_v9  ;;  %v1397_v6 = vadd.f32 %v3234_v39, %v1347_v49 }
 0x1e2   : > { %v2323_v57 = vpack.c.bf16 %v1525_v53, %v1524_v0  ;;  %v1526_v10 = vsel %vm1438_vm10, %v1394_v62, %v1482_v60  ;;  %v1348_v23 = vmul.f32 %v2242_v8, %v3203_v36  ;;  %vm1440_vm12 = vcmp.ge.f32.partialorder %v1396_v55, 0.0 }
 0x1e3   : > { %v1527_v52 = vsel %vm1439_vm11, %v1395_v11, %v1483_v54  ;;  %vm1441_vm13 = vcmp.ge.f32.partialorder %v1397_v6, 0.0  ;;  %v1484_v7 = vmul.f32 0.2, %v1396_v55  ;;  %v1485_v28 = vmul.f32 0.2, %v1397_v6 }
 0x1e4   : > { %v2328_v13 = vpack.c.bf16 %v1527_v52, %v1526_v10  ;;  %2455 = vst [vmem:[%s3464_s4 + $0x20] sm:$0xff] %v2323_v57   ;;  %v1349_v38 = vmul.f32 %v2243_v24, %v3203_v36  ;;  %v1398_v49 = vadd.f32 %v3234_v39, %v1348_v23  ;;  %v1350_v58 = vmul.f32 %v2246_v25, %v3203_v36 }
 0x1e5   : > { %v1528_v8 = vsel %vm1440_vm12, %v1396_v55, %v1484_v7  ;;  %v1351_v32 = vmul.f32 %v2247_v1, %v3203_v36  ;;  %v1352_v61 = vmul.f32 %v2250_v12, %v3203_v36  ;;  %v1353_v24 = vmul.f32 %v2251_v27, %v3203_v36 }
 0x1e6   : > { %2456 = vst [vmem:[%s3464_s4 + $0x28] sm:$0xff] %v2328_v13   ;;  %v1529_v29 = vsel %vm1441_vm13, %v1397_v6, %v1485_v28  ;;  %v1399_v25 = vadd.f32 %v3234_v39, %v1349_v38  ;;  %vm1442_vm14 = vcmp.ge.f32.partialorder %v1398_v49, 0.0  ;;  %v1486_v50 = vmul.f32 0.2, %v1398_v49 }
 0x1e7   : > { %v2333_v42 = vpack.c.bf16 %v1529_v29, %v1528_v8  ;;  %v1400_v4 = vadd.f32 %v3234_v39, %v1350_v58  ;;  %v1401_v62 = vadd.f32 %v3234_v39, %v1351_v32  ;;  %v1402_v56 = vadd.f32 %v3234_v39, %v1352_v61 }
 0x1e8   : > { %vm1443_vm15 = vcmp.ge.f32.partialorder %v1399_v25, 0.0  ;;  %v1487_v1 = vmul.f32 0.2, %v1399_v25  ;;  %v1530_v11 = vsel %vm1442_vm14, %v1398_v49, %v1486_v50  ;;  %v1403_v12 = vadd.f32 %v3234_v39, %v1353_v24 }
 0x1e9   : > { %2457 = vst [vmem:[%s3464_s4 + $0x30] sm:$0xff] %v2333_v42   ;;  %vm1444_vm0 = vcmp.ge.f32.partialorder %v1400_v4, 0.0  ;;  %vm1445_vm1 = vcmp.ge.f32.partialorder %v1401_v62, 0.0  ;;  %v1488_v5 = vmul.f32 0.2, %v1400_v4  ;;  %vm1446_vm2 = vcmp.ge.f32.partialorder %v1402_v56, 0.0 }
 0x1ea   : > { %v1489_v27 = vmul.f32 0.2, %v1401_v62  ;;  %v1531_v15 = vsel %vm1443_vm15, %v1399_v25, %v1487_v1  ;;  %vm1447_vm3 = vcmp.ge.f32.partialorder %v1403_v12, 0.0  ;;  %v1490_v48 = vmul.f32 0.2, %v1402_v56 }
 0x1eb   : > { %v2338_v22 = vpack.c.bf16 %v1531_v15, %v1530_v11  ;;  %v1532_v33 = vsel %vm1444_vm0, %v1400_v4, %v1488_v5  ;;  %v1491_v9 = vmul.f32 0.2, %v1403_v12  ;;  %v1354_v0 = vmul.f32 %v2254_v31, %v3203_v36 }
 0x1ec   : > { %v1533_v59 = vsel %vm1445_vm1, %v1401_v62, %v1489_v27  ;;  %v1534_v54 = vsel %vm1446_vm2, %v1402_v56, %v1490_v48  ;;  %v1355_v53 = vmul.f32 %v2255_v30, %v3203_v36  ;;  %v1356_v6 = vmul.f32 %v2258_v2, %v3203_v36 }
 0x1ed   : > { %v2343_v60 = vpack.c.bf16 %v1533_v59, %v1532_v33  ;;  %2458 = vst [vmem:[%s3464_s4 + $0x38] sm:$0xff] %v2338_v22   ;;  %v1535_v55 = vsel %vm1447_vm3, %v1403_v12, %v1491_v9  ;;  %v1357_v57 = vmul.f32 %v2259_v34, %v3203_v36  ;;  %v1358_v31 = vmul.f32 %v2262_v63, %v3203_v36 }
 0x1ee   : > { %v2348_v14 = vpack.c.bf16 %v1535_v55, %v1534_v54  ;;  %v1404_v30 = vadd.f32 %v3234_v39, %v1354_v0  ;;  %v1405_v10 = vadd.f32 %v3234_v39, %v1355_v53  ;;  %v1359_v2 = vmul.f32 %v2263_v46, %v3203_v36 }
 0x1ef   : > { %2459 = vst [vmem:[%s3464_s4 + $0x40] sm:$0xff] %v2343_v60   ;;  %v1406_v21 = vadd.f32 %v3234_v39, %v1356_v6  ;;  %v1407_v34 = vadd.f32 %v3234_v39, %v1357_v57  ;;  %v1408_v52 = vadd.f32 %v3234_v39, %v1358_v31  ;;  %v1360_v63 = vmul.f32 %v2266_v35, %v3203_v36 }
 0x1f0   : > { %2460 = vst [vmem:[%s3464_s4 + $0x48] sm:$0xff] %v2348_v14   ;;  %vm1448_vm4 = vcmp.ge.f32.partialorder %v1404_v30, 0.0  ;;  %vm1449_vm5 = vcmp.ge.f32.partialorder %v1405_v10, 0.0  ;;  %v1492_v23 = vmul.f32 0.2, %v1404_v30  ;;  %v1409_v38 = vadd.f32 %v3234_v39, %v1359_v2 }
 0x1f1   : > { %v1493_v13 = vmul.f32 0.2, %v1405_v10  ;;  %vm1450_vm6 = vcmp.ge.f32.partialorder %v1406_v21, 0.0  ;;  %vm1451_vm7 = vcmp.ge.f32.partialorder %v1407_v34, 0.0  ;;  %v1494_v17 = vmul.f32 0.2, %v1406_v21 }
 0x1f2   : > { %v1495_v46 = vmul.f32 0.2, %v1407_v34  ;;  %v1536_v7 = vsel %vm1448_vm4, %v1404_v30, %v1492_v23  ;;  %vm1452_vm8 = vcmp.ge.f32.partialorder %v1408_v52, 0.0  ;;  %v1496_v8 = vmul.f32 0.2, %v1408_v52 }
 0x1f3   : > { %v1537_v28 = vsel %vm1449_vm5, %v1405_v10, %v1493_v13  ;;  %v1538_v58 = vsel %vm1450_vm6, %v1406_v21, %v1494_v17  ;;  %vm1453_vm9 = vcmp.ge.f32.partialorder %v1409_v38, 0.0  ;;  %v1497_v61 = vmul.f32 0.2, %v1409_v38 }
 0x1f4   : > { %v2353_v49 = vpack.c.bf16 %v1537_v28, %v1536_v7  ;;  %v1539_v35 = vsel %vm1451_vm7, %v1407_v34, %v1495_v46  ;;  %v1361_v24 = vmul.f32 %v2267_v40, %v3203_v36  ;;  %v1540_v29 = vsel %vm1452_vm8, %v1408_v52, %v1496_v8 }
 0x1f5   : > { %v2358_v32 = vpack.c.bf16 %v1539_v35, %v1538_v58  ;;  %v1410_v25 = vadd.f32 %v3234_v39, %v1360_v63  ;;  %v3465_v50 = vunpack.c.l.bf16 %v3159_v26  ;;  %v3466_v4 = vunpack.c.h.bf16 %v3159_v26 }
 0x1f6   : > { %2461 = vst [vmem:[%s3464_s4 + $0x50] sm:$0xff] %v2353_v49   ;;  %v1541_v51 = vsel %vm1453_vm9, %v1409_v38, %v1497_v61  ;;  %v1411_v40 = vadd.f32 %v3234_v39, %v1361_v24  ;;  %v3467_v56 = vunpack.c.l.bf16 %v3161_v16  ;;  %v3468_v11 = vunpack.c.h.bf16 %v3161_v16 }
 0x1f7   : > { %v1362_v42 = vmul.f32 %v3465_v50, %v3203_v36  ;;  %v1363_v62 = vmul.f32 %v3466_v4, %v3203_v36  ;;  %2462 = vst [vmem:[%s3464_s4 + $0x58] sm:$0xff] %v2358_v32   ;;  %v2363_v5 = vpack.c.bf16 %v1541_v51, %v1540_v29  ;;  %vm1454_vm10 = vcmp.ge.f32.partialorder %v1410_v25, 0.0 }
 0x1f8   : > { %v1364_v1 = vmul.f32 %v3467_v56, %v3203_v36  ;;  %v1365_v12 = vmul.f32 %v3468_v11, %v3203_v36  ;;  %v1498_v27 = vmul.f32 0.2, %v1410_v25  ;;  %vm1455_vm11 = vcmp.ge.f32.partialorder %v1411_v40, 0.0 }
 0x1f9   : > { %v1412_v26 = vadd.f32 %v3234_v39, %v1362_v42  ;;  %v1499_v15 = vmul.f32 0.2, %v1411_v40  ;;  %v1413_v48 = vadd.f32 %v3234_v39, %v1363_v62  ;;  %2463 = vst [vmem:[%s3464_s4 + $0x60] sm:$0xff] %v2363_v5   ;;  %v3469_v57 = vunpack.c.l.bf16 %v3170_v18 }
 0x1fa   : > { %v1414_v22 = vadd.f32 %v3234_v39, %v1364_v1  ;;  %v1542_v33 = vsel %vm1454_vm10, %v1410_v25, %v1498_v27  ;;  %v1415_v16 = vadd.f32 %v3234_v39, %v1365_v12  ;;  %v3470_v14 = vunpack.c.h.bf16 %v3170_v18 }
 0x1fb   : > { %vm1456_vm12 = vcmp.ge.f32.partialorder %v1412_v26, 0.0  ;;  %v1500_v59 = vmul.f32 0.2, %v1412_v26  ;;  %v1543_v9 = vsel %vm1455_vm11, %v1411_v40, %v1499_v15  ;;  %vm1457_vm13 = vcmp.ge.f32.partialorder %v1413_v48, 0.0 }
 0x1fc   : > { %v1501_v60 = vmul.f32 0.2, %v1413_v48  ;;  %vm1458_vm14 = vcmp.ge.f32.partialorder %v1414_v22, 0.0  ;;  %v2368_v54 = vpack.c.bf16 %v1543_v9, %v1542_v33  ;;  %vm1459_vm15 = vcmp.ge.f32.partialorder %v1415_v16, 0.0 }
 0x1fd   : > { %v1544_v0 = vsel %vm1456_vm12, %v1412_v26, %v1500_v59  ;;  %v1502_v53 = vmul.f32 0.2, %v1414_v22  ;;  %v1503_v6 = vmul.f32 0.2, %v1415_v16  ;;  %v1366_v31 = vmul.f32 %v3469_v57, %v3203_v36 }
 0x1fe   : > { %v1545_v55 = vsel %vm1457_vm13, %v1413_v48, %v1501_v60  ;;  %v1367_v30 = vmul.f32 %v3470_v14, %v3203_v36  ;;  %2464 = vst [vmem:[%s3464_s4 + $0x68] sm:$0xff] %v2368_v54   ;;  %v3471_v21 = vunpack.c.l.bf16 %v3176_v20  ;;  %v3472_v52 = vunpack.c.h.bf16 %v3176_v20 }
 0x1ff   : > { %v2373_v10 = vpack.c.bf16 %v1545_v55, %v1544_v0  ;;  %v1546_v2 = vsel %vm1458_vm14, %v1414_v22, %v1502_v53  ;;  %v1547_v23 = vsel %vm1459_vm15, %v1415_v16, %v1503_v6  ;;  %v1416_v13 = vadd.f32 %v3234_v39, %v1366_v31 }
 0x200   : > { %v1368_v34 = vmul.f32 %v3471_v21, %v3203_v36  ;;  %v1369_v63 = vmul.f32 %v3472_v52, %v3203_v36  ;;  %v1417_v18 = vadd.f32 %v3234_v39, %v1367_v30  ;;  %v3473_v17 = vunpack.c.l.bf16 %v3178_v37 }
 0x201   : > { %2465 = vst [vmem:[%s3464_s4 + $0x70] sm:$0xff] %v2373_v10   ;;  %v2378_v7 = vpack.c.bf16 %v1547_v23, %v1546_v2  ;;  %v1371_v20 = vmul.f32 %v2287_v3, %v3203_v36  ;;  %vm1460_vm0 = vcmp.ge.f32.partialorder %v1416_v13, 0.0  ;;  %v1504_v49 = vmul.f32 0.2, %v1416_v13 }
 0x202   : > { %v1370_v46 = vmul.f32 %v3473_v17, %v3203_v36  ;;  %v1418_v28 = vadd.f32 %v3234_v39, %v1368_v34  ;;  %v1419_v38 = vadd.f32 %v3234_v39, %v1369_v63  ;;  %vm1461_vm1 = vcmp.ge.f32.partialorder %v1417_v18, 0.0 }
 0x203   : > { %v1505_v58 = vmul.f32 0.2, %v1417_v18  ;;  %2466 = vst [vmem:[%s3464_s4 + $0x78] sm:$0xff] %v2378_v7   ;;  %v1548_v32 = vsel %vm1460_vm0, %v1416_v13, %v1504_v49  ;;  %v1421_v29 = vadd.f32 %v3234_v39, %v1371_v20  ;;  %v1372_v50 = vmul.f32 %v2290_v45, %v3203_v36 }
 0x204   : > { %vm1462_vm2 = vcmp.ge.f32.partialorder %v1418_v28, 0.0  ;;  %vm1463_vm3 = vcmp.ge.f32.partialorder %v1419_v38, 0.0  ;;  %v1506_v35 = vmul.f32 0.2, %v1418_v28  ;;  %v1507_v8 = vmul.f32 0.2, %v1419_v38 }
 0x205   : > { %v1549_v61 = vsel %vm1461_vm1, %v1417_v18, %v1505_v58  ;;  %v1420_v24 = vadd.f32 %v3234_v39, %v1370_v46  ;;  %vm1465_vm5 = vcmp.ge.f32.partialorder %v1421_v29, 0.0  ;;  %v1509_v62 = vmul.f32 0.2, %v1421_v29 }
 0x206   : > { %v2383_v37 = vpack.c.bf16 %v1549_v61, %v1548_v32  ;;  %v1550_v3 = vsel %vm1462_vm2, %v1418_v28, %v1506_v35  ;;  %v1551_v25 = vsel %vm1463_vm3, %v1419_v38, %v1507_v8  ;;  %v3474_v51 = vunpack.c.h.bf16 %v3184_v44 }
 0x207   : > { %v2388_v42 = vpack.c.bf16 %v1551_v25, %v1550_v3  ;;  %vm1464_vm4 = vcmp.ge.f32.partialorder %v1420_v24, 0.0  ;;  %v1508_v4 = vmul.f32 0.2, %v1420_v24  ;;  %v1422_v56 = vadd.f32 %v3234_v39, %v1372_v50 }
 0x208   : > { %2467 = vst [vmem:[%s3464_s4 + $0x80] sm:$0xff] %v2383_v37   ;;  %v1373_v40 = vmul.f32 %v3474_v51, %v3203_v36  ;;  %v1374_v1 = vmul.f32 %v2294_v41, %v3203_v36  ;;  %v3475_v11 = vunpack.c.h.bf16 %v3189_v19  ;;  %v1376_v44 = vmul.f32 %v2298_v43, %v3203_v36 }
 0x209   : > { %2468 = vst [vmem:[%s3464_s4 + $0x88] sm:$0xff] %v2388_v42   ;;  %v1552_v45 = vsel %vm1464_vm4, %v1420_v24, %v1508_v4  ;;  %v3476_v5 = vunpack.c.h.bf16 %v3191_v47  ;;  %v1553_v26 = vsel %vm1465_vm5, %v1421_v29, %v1509_v62  ;;  %vm1466_vm6 = vcmp.ge.f32.partialorder %v1422_v56, 0.0 }
 0x20a   : > { %v1375_v12 = vmul.f32 %v3475_v11, %v3203_v36  ;;  %v1423_v41 = vadd.f32 %v3234_v39, %v1373_v40  ;;  %v1510_v15 = vmul.f32 0.2, %v1422_v56  ;;  %v2393_v48 = vpack.c.bf16 %v1553_v26, %v1552_v45 }
 0x20b   : > { %v1377_v27 = vmul.f32 %v3476_v5, %v3203_v36  ;;  %v1424_v22 = vadd.f32 %v3234_v39, %v1374_v1  ;;  %v1426_v19 = vadd.f32 %v3234_v39, %v1376_v44 }
 0x20c   : > { %v1425_v33 = vadd.f32 %v3234_v39, %v1375_v12  ;;  %vm1467_vm7 = vcmp.ge.f32.partialorder %v1423_v41, 0.0  ;;  %v1511_v59 = vmul.f32 0.2, %v1423_v41  ;;  %v1554_v16 = vsel %vm1466_vm6, %v1422_v56, %v1510_v15  ;;  %2469 = vst [vmem:[%s3464_s4 + $0x90] sm:$0xff] %v2393_v48  }
 0x20d   : > { %v1427_v43 = vadd.f32 %v3234_v39, %v1377_v27  ;;  %vm1468_vm8 = vcmp.ge.f32.partialorder %v1424_v22, 0.0  ;;  %v1512_v36 = vmul.f32 0.2, %v1424_v22  ;;  %vm1470_vm10 = vcmp.ge.f32.partialorder %v1426_v19, 0.0 }
 0x20e   : > { %vm1469_vm9 = vcmp.ge.f32.partialorder %v1425_v33, 0.0  ;;  %v1513_v47 = vmul.f32 0.2, %v1425_v33  ;;  %v1555_v9 = vsel %vm1467_vm7, %v1423_v41, %v1511_v59  ;;  %v1514_v60 = vmul.f32 0.2, %v1426_v19 }
 0x20f   : > { %vm1471_vm11 = vcmp.ge.f32.partialorder %v1427_v43, 0.0  ;;  %v2398_v54 = vpack.c.bf16 %v1555_v9, %v1554_v16  ;;  %v1556_v0 = vsel %vm1468_vm8, %v1424_v22, %v1512_v36  ;;  %v1515_v55 = vmul.f32 0.2, %v1427_v43 }
 0x210   : > { %v1557_v53 = vsel %vm1469_vm9, %v1425_v33, %v1513_v47  ;;  %v1558_v57 = vsel %vm1470_vm10, %v1426_v19, %v1514_v60 }
 0x211   : > { %v2403_v6 = vpack.c.bf16 %v1557_v53, %v1556_v0  ;;  %2470 = vst [vmem:[%s3464_s4 + $0x98] sm:$0xff] %v2398_v54   ;;  %v1559_v39 = vsel %vm1471_vm11, %v1427_v43, %v1515_v55 }
 0x212   : > { %v2408_v31 = vpack.c.bf16 %v1559_v39, %v1558_v57 }
 0x213   : > { %2471 = vst [vmem:[%s3464_s4 + $0xa0] sm:$0xff] %v2403_v6  }
 0x214   : > { %2472 = vst [vmem:[%s3464_s4 + $0xa8] sm:$0xff] %v2408_v31  }
 0x215 PF: > { %s14_s17 = sadd.s32 1, %s2637_s17   ;;  %s3477_s15 = smov %s2633_s16 }
 0x216   : > { %p11_p7 = scmp.ge.s32.totalorder %s14_s17, 4   ;;  %s3478_s16 = smov %s3480_s18 }
 0x218   :  { %13 = sbr.rel (!%p11_p7) target bundleno = 2 (0x2), region = 80 }

// kernel: cnn_encoder_forward.8
= control target key start
LH: loop header
LB: loop body
LE: loop exit
PB: predicated region body
PF: predicated region fallthrough
CT: control target
= control target key end

     0   :  { %s1512_s15 = smov 0   ;;  %s1514_s16 = smov 0   ;;  %s1721_s0 = inlined_call_operand.vmem [shape: bf16[80,512], index: 0, kind: input, shape index: {}]   ;;  %s1722_s1 = inlined_call_operand.vmem [shape: bf16[512,128], index: 1, kind: input, shape index: {}]   ;;  %s1723_s2 = inlined_call_operand.vmem [shape: f32[1,128], index: 2, kind: input, shape index: {}]   ;;  %s1724_s3 = inlined_call_operand.vmem [shape: f32[1,128], index: 3, kind: input, shape index: {}]   ;;  %s1725_s4 = inlined_call_operand.vmem [shape: bf16[80,128], index: 4, kind: output, shape index: {}]  }
   0x1   :  { %s1516_s17 = smov 0  }
   0x2 LB: > { %s26_s18 = sadd.s32 1, %s1480_s16  ;;  %p1098_p0 = scmp.ge.s32.totalorder %s1484_s17, 1  ;;  %s1484_s17 = sphi %s1516_s17, %s14_s17   ;;  %s1480_s16 = sphi %s1514_s16, %s1727_s16   ;;  %s1476_s15 = sphi %s1512_s15, %s1726_s15  }
   0x3   : > { %p28_p1 = scmp.ge.s32.totalorder %s26_s18, 2  ;;  %p186_p2 = scmp.lt.s32.totalorder %s1484_s17, 3 }
   0x5   : > { %s1729_s18 = smov (%p28_p1, %s26_s18), 0  ;;  %p187_p3 = pnand %p1098_p0, %p186_p2 }
   0x6   : > { %p236_p4 = scmp.eq.s32.totalorder (!%p187_p3), %s1476_s15, 0 }
   0x7   : > { %190 = sbr.rel (%p187_p3) target bundleno = 369 (0x171), region = 36 }
   0xc   : > { %241 = sbr.rel (!%p236_p4) target bundleno = 17 (0x11), region = 40  ;;  %v1486_v0 = vmov (%p236_p4), 0.0  }
   0xd   : > { %242 = vst [vmem:[#allocation3] sm:$0x1] (%p236_p4), %v1486_v0  ;;  %243 = vst [vmem:[#allocation4] sm:$0x1] (%p236_p4), %v1486_v0 }
  0x11 PF: > { %p1100_p5 = scmp.ne.s32.totalorder %s1476_s15, 0 }
  0x13   : > { %246 = sbr.rel (%p1100_p5) target bundleno = 313 (0x139), region = 44 }
  0x18   : > { %v1398_v1 = vld [vmem:[%s1722_s1 + $0x78] sm:$0xff]   ;;  %v1402_v5 = vld [vmem:[%s1722_s1 + $0x70] sm:$0xff]   ;;  %v1406_v9 = vld [vmem:[%s1722_s1 + $0x68] sm:$0xff]  }
  0x19   : > { %v1399_v2 = vld [vmem:[%s1722_s1 + $0xf8] sm:$0xff]   ;;  %1281 = vmatprep.subr.bf16.mxu0 %v1398_v1  ;;  %v1403_v6 = vld [vmem:[%s1722_s1 + $0xf0] sm:$0xff]   ;;  %v1407_v10 = vld [vmem:[%s1722_s1 + $0xe8] sm:$0xff]  }
  0x1a   : > { %v1400_v3 = vld [vmem:[%s1722_s1 + $0x38] sm:$0xff]   ;;  %1327 = vmatprep.subr.bf16.mxu1 %v1399_v2  ;;  %v1404_v7 = vld [vmem:[%s1722_s1 + $0x30] sm:$0xff]   ;;  %v1408_v11 = vld [vmem:[%s1722_s1 + $0x28] sm:$0xff]  }
  0x1b   : > { %v1401_v4 = vld [vmem:[%s1722_s1 + $0xb8] sm:$0xff]   ;;  %1282 = vmatpush3.bf16.msra.mxu0 %v1400_v3  ;;  %v1405_v8 = vld [vmem:[%s1722_s1 + $0xb0] sm:$0xff]   ;;  %v1409_v12 = vld [vmem:[%s1722_s1 + $0xa8] sm:$0xff]  }
  0x1c   : > { %1328 = vmatpush3.bf16.msra.mxu1 %v1401_v4  ;;  %1283 = vmatprep.subr.bf16.mxu0 %v1402_v5  ;;  %v1410_v13 = vld [vmem:[%s1722_s1 + $0x60] sm:$0xff]   ;;  %v1414_v17 = vld [vmem:[%s1722_s1 + $0x58] sm:$0xff]   ;;  %v1418_v21 = vld [vmem:[%s1722_s1 + $0x50] sm:$0xff]  }
  0x1d   : > { %1329 = vmatprep.subr.bf16.mxu1 %v1403_v6  ;;  %v1411_v14 = vld [vmem:[%s1722_s1 + $0xe0] sm:$0xff]   ;;  %v1415_v18 = vld [vmem:[%s1722_s1 + $0xd8] sm:$0xff]   ;;  %v1419_v22 = vld [vmem:[%s1722_s1 + $0xd0] sm:$0xff]  }
  0x1e   : > { %v1412_v15 = vld [vmem:[%s1722_s1 + $0x20] sm:$0xff]   ;;  %v1416_v19 = vld [vmem:[%s1722_s1 + $0x18] sm:$0xff]   ;;  %v1420_v23 = vld [vmem:[%s1722_s1 + $0x10] sm:$0xff]  }
  0x1f   : > { %1284 = vmatpush3.bf16.msra.mxu0 %v1404_v7  ;;  %v1413_v16 = vld [vmem:[%s1722_s1 + $0xa0] sm:$0xff]   ;;  %v1417_v20 = vld [vmem:[%s1722_s1 + $0x98] sm:$0xff]   ;;  %v1421_v24 = vld [vmem:[%s1722_s1 + $0x90] sm:$0xff]  }
  0x20   : > { %1330 = vmatpush3.bf16.msra.mxu1 %v1405_v8  ;;  %1285 = vmatprep.subr.bf16.mxu0 %v1406_v9  ;;  %v1422_v25 = vld [vmem:[%s1722_s1 + $0x48] sm:$0xff]   ;;  %v1426_v29 = vld [vmem:[%s1722_s1 + $0x40] sm:$0xff]  }
  0x21   : > { %1331 = vmatprep.subr.bf16.mxu1 %v1407_v10  ;;  %v1423_v26 = vld [vmem:[%s1722_s1 + $0xc8] sm:$0xff]   ;;  %v1427_v30 = vld [vmem:[%s1722_s1 + $0xc0] sm:$0xff]  }
  0x22   : > { %v1424_v27 = vld [vmem:[%s1722_s1 + $0x8] sm:$0xff]   ;;  %v1428_v31 = vld [vmem:[%s1722_s1] sm:$0xff]  }
  0x23   : > { %1286 = vmatpush3.bf16.msra.mxu0 %v1408_v11  ;;  %v1425_v28 = vld [vmem:[%s1722_s1 + $0x88] sm:$0xff]   ;;  %v1429_v32 = vld [vmem:[%s1722_s1 + $0x80] sm:$0xff]  }
  0x24   : > { %1332 = vmatpush3.bf16.msra.mxu1 %v1409_v12  ;;  %1287 = vmatprep.subr.bf16.mxu0 %v1410_v13  ;;  %v1430_v33 = vld [vmem:[%s1721_s0] ss:$16 sps:$4 sm:$0xff]   ;;  %v1432_v34 = vld [vmem:[%s1721_s0 + $0x4] ss:$16 sps:$4 sm:$0xff]   ;;  %v1433_v35 = vld [vmem:[%s1721_s0 + $0x8] ss:$16 sps:$4 sm:$0xff]  }
  0x25   : > { %1333 = vmatprep.subr.bf16.mxu1 %v1411_v14  ;;  %v1435_v36 = vld [vmem:[%s1721_s0 + $0xc] ss:$16 sps:$4 sm:$0xff]   ;;  %655 = vmatprep.mubr.bf16.mxu0 %v1432_v34  ;;  %v1436_v37 = vld [vmem:[%s1721_s0 + $0x24] ss:$16 sps:$4 sm:$0xff]   ;;  %v1440_v39 = vld [vmem:[%s1721_s0 + $0x20] ss:$16 sps:$4 sm:$0xff]  }
  0x26   : > { %728 = vmatprep.mubr.bf16.mxu1 %v1435_v36  ;;  %v1438_v38 = vld [vmem:[%s1721_s0 + $0x2c] ss:$16 sps:$4 sm:$0xff]   ;;  %v1441_v40 = vld [vmem:[%s1721_s0 + $0x28] ss:$16 sps:$4 sm:$0xff]   ;;  %v1442_v41 = vld [vmem:[%s1721_s0 + $0x44] ss:$16 sps:$4 sm:$0xff]  }
  0x27   : > { %1288 = vmatpush3.bf16.msra.mxu0 %v1412_v15  ;;  %v1444_v42 = vld [vmem:[%s1721_s0 + $0x4c] ss:$16 sps:$4 sm:$0xff]   ;;  %v1446_v43 = vld [vmem:[%s1721_s0 + $0x40] ss:$16 sps:$4 sm:$0xff]   ;;  %v1447_v44 = vld [vmem:[%s1721_s0 + $0x48] ss:$16 sps:$4 sm:$0xff]  }
  0x28   : > { %1334 = vmatpush3.bf16.msra.mxu1 %v1413_v16  ;;  %1289 = vmatprep.subr.bf16.mxu0 %v1414_v17  ;;  %v1448_v45 = vld [vmem:[%s1721_s0 + $0x64] ss:$16 sps:$4 sm:$0xff]   ;;  %v1450_v46 = vld [vmem:[%s1721_s0 + $0x6c] ss:$16 sps:$4 sm:$0xff]   ;;  %v1452_v47 = vld [vmem:[%s1721_s0 + $0x60] ss:$16 sps:$4 sm:$0xff]  }
  0x29   : > { %1335 = vmatprep.subr.bf16.mxu1 %v1415_v18  ;;  %v1453_v48 = vld [vmem:[%s1721_s0 + $0x68] ss:$16 sps:$4 sm:$0xff]   ;;  %v1454_v49 = vld [vmem:[%s1721_s0 + $0x84] ss:$16 sps:$4 sm:$0xff]   ;;  %v1456_v50 = vld [vmem:[%s1721_s0 + $0x8c] ss:$16 sps:$4 sm:$0xff]  }
  0x2a   : > { %v1458_v51 = vld [vmem:[%s1721_s0 + $0x80] ss:$16 sps:$4 sm:$0xff]   ;;  %v1459_v52 = vld [vmem:[%s1721_s0 + $0x88] ss:$16 sps:$4 sm:$0xff]  }
  0x2b   : > { %1290 = vmatpush3.bf16.msra.mxu0 %v1416_v19 }
  0x2c   : > { %1336 = vmatpush3.bf16.msra.mxu1 %v1417_v20  ;;  %1291 = vmatprep.subr.bf16.mxu0 %v1418_v21 }
  0x2d   : > { %1337 = vmatprep.subr.bf16.mxu1 %v1419_v22 }
  0x2f   : > { %1292 = vmatpush3.bf16.msra.mxu0 %v1420_v23 }
  0x30   : > { %1338 = vmatpush3.bf16.msra.mxu1 %v1421_v24  ;;  %1293 = vmatprep.subr.bf16.mxu0 %v1422_v25 }
  0x31   : > { %1339 = vmatprep.subr.bf16.mxu1 %v1423_v26 }
  0x33   : > { %1294 = vmatpush3.bf16.msra.mxu0 %v1424_v27 }
  0x34   : > { %1340 = vmatpush3.bf16.msra.mxu1 %v1425_v28  ;;  %1295 = vmatprep.subr.bf16.mxu0 %v1426_v29 }
  0x35   : > { %1341 = vmatprep.subr.bf16.mxu1 %v1427_v30 }
  0x37   : > { %1296 = vmatpush3.bf16.msra.mxu0 %v1428_v31 }
  0x38   : > { %1342 = vmatpush3.bf16.msra.mxu1 %v1429_v32 }
  0x3a   : > { %656 = vmatmul.mubr.bf16.vlgmr.msra.gmra.mxu0 %v1430_v33 }
  0x3b   : > { %729 = vmatmul.mubr.bf16.vlgmr.msra.gmra.mxu1 %v1433_v35  ;;  %663 = vmatprep.mubr.bf16.mxu0 %v1436_v37 }
  0x3c   : > { %736 = vmatprep.mubr.bf16.mxu1 %v1438_v38 }
  0x42   : > { %664 = vmatmul.mubr.bf16.gmra.mxu0 %v1440_v39 }
  0x43   : > { %737 = vmatmul.mubr.bf16.gmra.mxu1 %v1441_v40  ;;  %671 = vmatprep.mubr.bf16.mxu0 %v1442_v41 }
  0x44   : > { %744 = vmatprep.mubr.bf16.mxu1 %v1444_v42 }
  0x4a   : > { %672 = vmatmul.mubr.bf16.gmra.mxu0 %v1446_v43 }
  0x4b   : > { %745 = vmatmul.mubr.bf16.gmra.mxu1 %v1447_v44  ;;  %679 = vmatprep.mubr.bf16.mxu0 %v1448_v45 }
  0x4c   : > { %752 = vmatprep.mubr.bf16.mxu1 %v1450_v46 }
  0x52   : > { %680 = vmatmul.mubr.bf16.gmra.mxu0 %v1452_v47 }
  0x53   : > { %753 = vmatmul.mubr.bf16.gmra.mxu1 %v1453_v48  ;;  %687 = vmatprep.mubr.bf16.mxu0 %v1454_v49 }
  0x54   : > { %760 = vmatprep.mubr.bf16.mxu1 %v1456_v50 }
  0x5a   : > { %688 = vmatmul.mubr.bf16.gmra.mxu0 %v1458_v51 }
  0x5b   : > { %761 = vmatmul.mubr.bf16.gmra.mxu1 %v1459_v52 }
  0xfa   : > { %v1297_v53 = vpop.f32.mrf.mxu0 }
  0xfb   : > { %v1343_v54 = vpop.f32.mrf.mxu1 }
  0xfc   : > { %v1298_v55 = vpop.f32.mrf.mxu0 }
  0xfd   : > { %v1344_v56 = vpop.f32.mrf.mxu1  ;;  %v1299_v59 = vadd.f32 %v1298_v55, %v1297_v53 }
  0xfe   : > { %v1300_v57 = vpop.f32.mrf.mxu0  ;;  %v1345_v60 = vadd.f32 %v1344_v56, %v1343_v54 }
  0xff   : > { %v1346_v58 = vpop.f32.mrf.mxu1 }
 0x100   : > { %v1301_v61 = vpop.f32.mrf.mxu0  ;;  %v731_v3 = vadd.f32 %v1345_v60, %v1299_v59 }
 0x101   : > { %v1302_v62 = vadd.f32 %v1301_v61, %v1300_v57  ;;  %v1347_v63 = vpop.f32.mrf.mxu1 }
 0x102   : > { %v1348_v0 = vadd.f32 %v1347_v63, %v1346_v58  ;;  %v1303_v1 = vpop.f32.mrf.mxu0  ;;  %v841_v37 = vmul.f32 %v731_v3, %v731_v3 }
 0x103   : > { %v1349_v2 = vpop.f32.mrf.mxu1 }
 0x104   : > { %v734_v4 = vadd.f32 %v1348_v0, %v1302_v62  ;;  %v1304_v5 = vpop.f32.mrf.mxu0 }
 0x105   : > { %v1350_v6 = vpop.f32.mrf.mxu1  ;;  %v1305_v10 = vadd.f32 %v1304_v5, %v1303_v1 }
 0x106   : > { %v1202_v7 = vpack.c.bf16 %v734_v4, %v731_v3  ;;  %v1306_v8 = vpop.f32.mrf.mxu0  ;;  %v1351_v11 = vadd.f32 %v1350_v6, %v1349_v2  ;;  %v842_v32 = vmul.f32 %v734_v4, %v734_v4  ;;  %v823_v40 = vadd.f32 %v734_v4, %v731_v3 }
 0x107   : > { %v1352_v9 = vpop.f32.mrf.mxu1 }
 0x108   : > { %1203 = vst [vmem:[#allocation2 + $0x8] sm:$0xff] %v1202_v7   ;;  %v1307_v12 = vpop.f32.mrf.mxu0  ;;  %v739_v18 = vadd.f32 %v1351_v11, %v1305_v10  ;;  %v851_v45 = vadd.f32 %v842_v32, %v841_v37  ;;  %v822_v37 = vld [vmem:[#allocation3] sm:$0x1] }
 0x109   : > { %v1308_v13 = vadd.f32 %v1307_v12, %v1306_v8  ;;  %v1353_v14 = vpop.f32.mrf.mxu1 }
 0x10a   : > { %v1354_v15 = vadd.f32 %v1353_v14, %v1352_v9  ;;  %v1309_v16 = vpop.f32.mrf.mxu0  ;;  %v843_v38 = vmul.f32 %v739_v18, %v739_v18  ;;  %v824_v48 = vadd.f32 %v823_v40, %v739_v18  ;;  %v840_v40 = vld [vmem:[#allocation4] sm:$0x1] }
 0x10b   : > { %v1355_v17 = vpop.f32.mrf.mxu1 }
 0x10c   : > { %v742_v19 = vadd.f32 %v1354_v15, %v1308_v13  ;;  %v1310_v20 = vpop.f32.mrf.mxu0  ;;  %v852_v50 = vadd.f32 %v851_v45, %v843_v38 }
 0x10d   : > { %v1356_v21 = vpop.f32.mrf.mxu1  ;;  %v1311_v25 = vadd.f32 %v1310_v20, %v1309_v16 }
 0x10e   : > { %v1207_v22 = vpack.c.bf16 %v742_v19, %v739_v18  ;;  %v1312_v23 = vpop.f32.mrf.mxu0  ;;  %v1357_v26 = vadd.f32 %v1356_v21, %v1355_v17  ;;  %v844_v46 = vmul.f32 %v742_v19, %v742_v19  ;;  %v825_v54 = vadd.f32 %v824_v48, %v742_v19 }
 0x10f   : > { %v1358_v24 = vpop.f32.mrf.mxu1 }
 0x110   : > { %1269 = vst [vmem:[#allocation2] sm:$0xff] %v1207_v22   ;;  %v1313_v27 = vpop.f32.mrf.mxu0  ;;  %v747_v34 = vadd.f32 %v1357_v26, %v1311_v25  ;;  %v853_v58 = vadd.f32 %v852_v50, %v844_v46 }
 0x111   : > { %v1314_v28 = vadd.f32 %v1313_v27, %v1312_v23  ;;  %v1359_v29 = vpop.f32.mrf.mxu1 }
 0x112   : > { %v1360_v30 = vadd.f32 %v1359_v29, %v1358_v24  ;;  %v1315_v31 = vpop.f32.mrf.mxu0  ;;  %v845_v51 = vmul.f32 %v747_v34, %v747_v34  ;;  %v826_v60 = vadd.f32 %v825_v54, %v747_v34 }
 0x113   : > { %v1361_v33 = vpop.f32.mrf.mxu1 }
 0x114   : > { %v750_v35 = vadd.f32 %v1360_v30, %v1314_v28  ;;  %v1316_v36 = vpop.f32.mrf.mxu0  ;;  %v854_v0 = vadd.f32 %v853_v58, %v845_v51 }
 0x115   : > { %v1362_v39 = vpop.f32.mrf.mxu1  ;;  %v1317_v42 = vadd.f32 %v1316_v36, %v1315_v31 }
 0x116   : > { %v1212_v41 = vpack.c.bf16 %v750_v35, %v747_v34  ;;  %v1363_v43 = vadd.f32 %v1362_v39, %v1361_v33  ;;  %v1318_v44 = vpop.f32.mrf.mxu0  ;;  %v846_v61 = vmul.f32 %v750_v35, %v750_v35  ;;  %v827_v3 = vadd.f32 %v826_v60, %v750_v35 }
 0x117   : > { %v1364_v47 = vpop.f32.mrf.mxu1 }
 0x118   : > { %1270 = vst [vmem:[#allocation2 + $0x20] sm:$0xff] %v1212_v41   ;;  %v1319_v49 = vpop.f32.mrf.mxu0  ;;  %v755_v55 = vadd.f32 %v1363_v43, %v1317_v42  ;;  %v855_v9 = vadd.f32 %v854_v0, %v846_v61 }
 0x119   : > { %v1320_v52 = vadd.f32 %v1319_v49, %v1318_v44  ;;  %v1365_v53 = vpop.f32.mrf.mxu1 }
 0x11a   : > { %v1366_v56 = vadd.f32 %v1365_v53, %v1364_v47  ;;  %v1321_v57 = vpop.f32.mrf.mxu0  ;;  %v847_v4 = vmul.f32 %v755_v55, %v755_v55  ;;  %v828_v10 = vadd.f32 %v827_v3, %v755_v55 }
 0x11b   : > { %v1367_v59 = vpop.f32.mrf.mxu1 }
 0x11c   : > { %v758_v62 = vadd.f32 %v1366_v56, %v1320_v52  ;;  %v1322_v63 = vpop.f32.mrf.mxu0  ;;  %v856_v16 = vadd.f32 %v855_v9, %v847_v4 }
 0x11d   : > { %v1323_v1 = vadd.f32 %v1322_v63, %v1321_v57  ;;  %v1368_v2 = vpop.f32.mrf.mxu1 }
 0x11e   : > { %v1217_v5 = vpack.c.bf16 %v758_v62, %v755_v55  ;;  %v1369_v6 = vadd.f32 %v1368_v2, %v1367_v59  ;;  %v1324_v7 = vpop.f32.mrf.mxu0  ;;  %v848_v11 = vmul.f32 %v758_v62, %v758_v62  ;;  %v829_v17 = vadd.f32 %v828_v10, %v758_v62 }
 0x11f   : > { %v1370_v8 = vpop.f32.mrf.mxu1 }
 0x120   : > { %1271 = vst [vmem:[#allocation2 + $0x10] sm:$0xff] %v1217_v5   ;;  %v763_v12 = vadd.f32 %v1369_v6, %v1323_v1  ;;  %v1325_v13 = vpop.f32.mrf.mxu0  ;;  %v857_v20 = vadd.f32 %v856_v16, %v848_v11 }
 0x121   : > { %v1326_v14 = vadd.f32 %v1325_v13, %v1324_v7  ;;  %v1371_v15 = vpop.f32.mrf.mxu1 }
 0x122   : > { %v849_v18 = vmul.f32 %v763_v12, %v763_v12  ;;  %v1372_v19 = vadd.f32 %v1371_v15, %v1370_v8  ;;  %v830_v21 = vadd.f32 %v829_v17, %v763_v12 }
 0x124   : > { %v766_v22 = vadd.f32 %v1372_v19, %v1326_v14  ;;  %v858_v23 = vadd.f32 %v857_v20, %v849_v18 }
 0x126   : > { %v1222_v24 = vpack.c.bf16 %v766_v22, %v763_v12  ;;  %v831_v25 = vadd.f32 %v830_v21, %v766_v22  ;;  %v850_v26 = vmul.f32 %v766_v22, %v766_v22 }
 0x128   : > { %1272 = vst [vmem:[#allocation2 + $0x18] sm:$0xff] %v1222_v24   ;;  %v832_v27 = vrot.slane %v831_v25, 4  ;;  %v859_v28 = vadd.f32 %v858_v23, %v850_v26 }
 0x12a   : > { %v833_v29 = vadd.f32 %v832_v27, %v831_v25  ;;  %v860_v30 = vrot.slane %v859_v28, 4 }
 0x12c   : > { %v834_v31 = vrot.slane %v833_v29, 2  ;;  %v861_v32 = vadd.f32 %v860_v30, %v859_v28 }
 0x12e   : > { %v835_v33 = vadd.f32 %v834_v31, %v833_v29  ;;  %v862_v34 = vrot.slane %v861_v32, 2 }
 0x130   : > { %v836_v35 = vrot.slane %v835_v33, 1  ;;  %v863_v36 = vadd.f32 %v862_v34, %v861_v32 }
 0x132   : > { %v837_v38 = vadd.f32 %v836_v35, %v835_v33  ;;  %v864_v39 = vrot.slane %v863_v36, 1 }
 0x134   : > { %v838_v41 = vadd.f32 %v837_v38, %v822_v37  ;;  %v865_v42 = vadd.f32 %v864_v39, %v863_v36 }
 0x136   : > { %839 = vst [vmem:[#allocation3] sm:$0x1] %v838_v41  ;;  %v866_v43 = vadd.f32 %v865_v42, %v840_v40 }
 0x138   : > { %867 = vst [vmem:[#allocation4] sm:$0x1] %v866_v43 }
 0x139 PF: > { %p1163_p6 = scmp.ne.s32.totalorder %s1476_s15, 1 }
 0x13b   : > { %871 = sbr.rel (%p1163_p6) target bundleno = 369 (0x171), region = 48 }
 0x140   : > { %v872_v44 = vld [vmem:[#allocation3] sm:$0x1]  ;;  %v874_v45 = vld [vmem:[#allocation4] sm:$0x1]  ;;  %v910_v52 = vlaneseq  ;;  %v879_v54 = vld [vmem:[%s1723_s2] sm:$0x1] }
 0x141   : > { %v873_v46 = vmul.f32 0.013888889, %v872_v44  ;;  %v875_v47 = vmul.f32 0.013888889, %v874_v45  ;;  %v1225_v55 = vld [vmem:[#allocation2 + $0x8] sm:$0xff]   ;;  %v1273_v56 = vld [vmem:[#allocation2] sm:$0xff]  }
 0x142   : > { %v911_v53 = vshrl.u32 %v910_v52, 7  ;;  %v1274_v58 = vld [vmem:[#allocation2 + $0x20] sm:$0xff]   ;;  %v1275_v59 = vld [vmem:[#allocation2 + $0x10] sm:$0xff]   ;;  %v1226_v62 = vunpack.c.l.bf16 %v1225_v55  ;;  %v1227_v63 = vunpack.c.h.bf16 %v1225_v55  ;;  %v1230_v0 = vunpack.c.l.bf16 %v1273_v56  ;;  %v1276_v1 = vld [vmem:[#allocation2 + $0x18] sm:$0xff]  }
 0x143   : > { %v876_v48 = vmul.f32 %v873_v46, %v873_v46  ;;  %v883_v2 = vld [vmem:[%s1724_s3] sm:$0x1]  ;;  %v1231_v3 = vunpack.c.h.bf16 %v1273_v56  ;;  %v1234_v4 = vunpack.c.l.bf16 %v1274_v58  ;;  %v1235_v5 = vunpack.c.h.bf16 %v1274_v58 }
 0x144   : > { %v912_v57 = vsub.s32 0, %v911_v53  ;;  %v1238_v6 = vunpack.c.l.bf16 %v1275_v59  ;;  %v1239_v9 = vunpack.c.h.bf16 %v1275_v59  ;;  %v1242_v10 = vunpack.c.l.bf16 %v1276_v1 }
 0x145   : > { %v877_v49 = vsub.f32 %v875_v47, %v876_v48  ;;  %v1243_v11 = vunpack.c.h.bf16 %v1276_v1 }
 0x147   : > { %v878_v50 = vmax.f32 %v877_v49, 0.0 }
 0x149   : > { %v880_v51 = vadd.f32 1e-05, %v878_v50 }
 0x14b   : > { %1460 = vrsqrt.f32 %v880_v51 }
 0x158   : > { %v1461_v60 = vpop.eup %1460 }
 0x159   : > { %v882_v61 = vmul.f32 %v1461_v60, %v879_v54 }
 0x15b   : > { %v884_v7 = vmul.f32 %v882_v61, %v873_v46  ;;  %v913_v8 = vrot.slane %v882_v61, %v912_v57 }
 0x15d   : > { %v885_v12 = vsub.f32 %v883_v2, %v884_v7  ;;  %v915_v13 = vmul.f32 %v1226_v62, %v913_v8  ;;  %v916_v14 = vmul.f32 %v1227_v63, %v913_v8  ;;  %v917_v15 = vmul.f32 %v1230_v0, %v913_v8 }
 0x15e   : > { %v918_v16 = vmul.f32 %v1231_v3, %v913_v8  ;;  %v919_v17 = vmul.f32 %v1234_v4, %v913_v8  ;;  %v920_v18 = vmul.f32 %v1235_v5, %v913_v8  ;;  %v921_v19 = vmul.f32 %v1238_v6, %v913_v8 }
 0x15f   : > { %v929_v20 = vrot.slane %v885_v12, %v912_v57  ;;  %v922_v21 = vmul.f32 %v1239_v9, %v913_v8  ;;  %v923_v22 = vmul.f32 %v1242_v10, %v913_v8  ;;  %v924_v23 = vmul.f32 %v1243_v11, %v913_v8 }
 0x161   : > { %v931_v24 = vadd.f32 %v929_v20, %v915_v13  ;;  %v932_v25 = vadd.f32 %v929_v20, %v916_v14  ;;  %v933_v26 = vadd.f32 %v929_v20, %v917_v15  ;;  %v934_v27 = vadd.f32 %v929_v20, %v918_v16 }
 0x162   : > { %v935_v28 = vadd.f32 %v929_v20, %v919_v17  ;;  %v936_v29 = vadd.f32 %v929_v20, %v920_v18  ;;  %v937_v30 = vadd.f32 %v929_v20, %v921_v19  ;;  %v938_v31 = vadd.f32 %v929_v20, %v922_v21 }
 0x163   : > { %vm941_vm0 = vcmp.ge.f32.partialorder %v931_v24, 0.0  ;;  %vm942_vm1 = vcmp.ge.f32.partialorder %v932_v25, 0.0  ;;  %v951_v32 = vmul.f32 0.2, %v931_v24  ;;  %v952_v33 = vmul.f32 0.2, %v932_v25 }
 0x164   : > { %vm943_vm2 = vcmp.ge.f32.partialorder %v933_v26, 0.0  ;;  %vm944_vm3 = vcmp.ge.f32.partialorder %v934_v27, 0.0  ;;  %v953_v34 = vmul.f32 0.2, %v933_v26  ;;  %v954_v35 = vmul.f32 0.2, %v934_v27 }
 0x165   : > { %v961_v36 = vsel %vm941_vm0, %v931_v24, %v951_v32  ;;  %v962_v37 = vsel %vm942_vm1, %v932_v25, %v952_v33  ;;  %vm945_vm4 = vcmp.ge.f32.partialorder %v935_v28, 0.0  ;;  %vm946_vm5 = vcmp.ge.f32.partialorder %v936_v29, 0.0 }
 0x166   : > { %v1247_v38 = vpack.c.bf16 %v962_v37, %v961_v36  ;;  %v963_v39 = vsel %vm943_vm2, %v933_v26, %v953_v34  ;;  %v964_v40 = vsel %vm944_vm3, %v934_v27, %v954_v35  ;;  %v955_v41 = vmul.f32 0.2, %v935_v28 }
 0x167   : > { %v1252_v42 = vpack.c.bf16 %v964_v40, %v963_v39  ;;  %v956_v43 = vmul.f32 0.2, %v936_v29  ;;  %vm947_vm6 = vcmp.ge.f32.partialorder %v937_v30, 0.0  ;;  %vm948_vm7 = vcmp.ge.f32.partialorder %v938_v31, 0.0 }
 0x168   : > { %1248 = vst [vmem:[%s1725_s4] sm:$0xff] %v1247_v38   ;;  %v965_v44 = vsel %vm945_vm4, %v935_v28, %v955_v41  ;;  %v957_v45 = vmul.f32 0.2, %v937_v30  ;;  %v958_v46 = vmul.f32 0.2, %v938_v31  ;;  %v939_v47 = vadd.f32 %v929_v20, %v923_v22 }
 0x169   : > { %1277 = vst [vmem:[%s1725_s4 + $0x8] sm:$0xff] %v1252_v42   ;;  %v966_v48 = vsel %vm946_vm5, %v936_v29, %v956_v43  ;;  %v940_v49 = vadd.f32 %v929_v20, %v924_v23 }
 0x16a   : > { %v1257_v50 = vpack.c.bf16 %v966_v48, %v965_v44  ;;  %v967_v51 = vsel %vm947_vm6, %v937_v30, %v957_v45  ;;  %v968_v52 = vsel %vm948_vm7, %v938_v31, %v958_v46  ;;  %vm949_vm8 = vcmp.ge.f32.partialorder %v939_v47, 0.0 }
 0x16b   : > { %v1262_v53 = vpack.c.bf16 %v968_v52, %v967_v51  ;;  %vm950_vm9 = vcmp.ge.f32.partialorder %v940_v49, 0.0  ;;  %v959_v54 = vmul.f32 0.2, %v939_v47  ;;  %v960_v55 = vmul.f32 0.2, %v940_v49 }
 0x16c   : > { %1278 = vst [vmem:[%s1725_s4 + $0x10] sm:$0xff] %v1257_v50  }
 0x16d   : > { %1279 = vst [vmem:[%s1725_s4 + $0x18] sm:$0xff] %v1262_v53   ;;  %v969_v56 = vsel %vm949_vm8, %v939_v47, %v959_v54  ;;  %v970_v57 = vsel %vm950_vm9, %v940_v49, %v960_v55 }
 0x16e   : > { %v1267_v58 = vpack.c.bf16 %v970_v57, %v969_v56 }
 0x170   : > { %1280 = vst [vmem:[%s1725_s4 + $0x20] sm:$0xff] %v1267_v58  }
 0x171 PF: > { %s14_s17 = sadd.s32 1, %s1484_s17   ;;  %s1726_s15 = smov %s1480_s16 }
 0x172   : > { %p11_p7 = scmp.ge.s32.totalorder %s14_s17, 4   ;;  %s1727_s16 = smov %s1729_s18 }
 0x174   :  { %13 = sbr.rel (!%p11_p7) target bundleno = 2 (0x2), region = 80 }

// kernel: cnn_encoder_forward.9
= control target key start
LH: loop header
LB: loop body
LE: loop exit
PB: predicated region body
PF: predicated region fallthrough
CT: control target
= control target key end

     0   :  { %s1649_s15 = smov 0   ;;  %s1651_s16 = smov 0   ;;  %s1933_s0 = inlined_call_operand.vmem [shape: bf16[32,1024], index: 0, kind: input, shape index: {}]   ;;  %s1934_s1 = inlined_call_operand.vmem [shape: bf16[1024,128], index: 1, kind: input, shape index: {}]   ;;  %s1935_s2 = inlined_call_operand.vmem [shape: f32[1,128], index: 2, kind: input, shape index: {}]   ;;  %s1936_s3 = inlined_call_operand.vmem [shape: f32[1,128], index: 3, kind: input, shape index: {}]   ;;  %s1937_s4 = inlined_call_operand.vmem [shape: bf16[32,128], index: 4, kind: output, shape index: {}]  }
   0x1   :  { %s1653_s17 = smov 0  }
   0x2 LB: > { %s26_s18 = sadd.s32 1, %s1617_s16  ;;  %p1260_p0 = scmp.ge.s32.totalorder %s1621_s17, 1  ;;  %s1621_s17 = sphi %s1653_s17, %s14_s17   ;;  %s1617_s16 = sphi %s1651_s16, %s1939_s16   ;;  %s1613_s15 = sphi %s1649_s15, %s1938_s15  }
   0x3   : > { %p28_p1 = scmp.ge.s32.totalorder %s26_s18, 2  ;;  %p186_p2 = scmp.lt.s32.totalorder %s1621_s17, 3 }
   0x5   : > { %s1941_s18 = smov (%p28_p1, %s26_s18), 0  ;;  %p187_p3 = pnand %p1260_p0, %p186_p2 }
   0x6   : > { %p236_p4 = scmp.eq.s32.totalorder (!%p187_p3), %s1613_s15, 0 }
   0x7   : > { %190 = sbr.rel (%p187_p3) target bundleno = 371 (0x173), region = 36 }
   0xc   : > { %241 = sbr.rel (!%p236_p4) target bundleno = 17 (0x11), region = 40  ;;  %v1623_v0 = vmov (%p236_p4), 0.0  }
   0xd   : > { %242 = vst [vmem:[#allocation3] sm:$0x1] (%p236_p4), %v1623_v0  ;;  %243 = vst [vmem:[#allocation4] sm:$0x1] (%p236_p4), %v1623_v0 }
  0x11 PF: > { %p1262_p5 = scmp.ne.s32.totalorder %s1613_s15, 0 }
  0x13   : > { %246 = sbr.rel (%p1262_p5) target bundleno = 322 (0x142), region = 44 }
  0x18   : > { %v1533_v1 = vld [vmem:[%s1934_s1 + $0x78] sm:$0xff]   ;;  %v1537_v5 = vld [vmem:[%s1934_s1 + $0x70] sm:$0xff]   ;;  %v1541_v9 = vld [vmem:[%s1934_s1 + $0x68] sm:$0xff]  }
  0x19   : > { %v1534_v2 = vld [vmem:[%s1934_s1 + $0xf8] sm:$0xff]   ;;  %1396 = vmatprep.subr.bf16.mxu0 %v1533_v1  ;;  %v1538_v6 = vld [vmem:[%s1934_s1 + $0xf0] sm:$0xff]   ;;  %v1542_v10 = vld [vmem:[%s1934_s1 + $0xe8] sm:$0xff]  }
  0x1a   : > { %v1535_v3 = vld [vmem:[%s1934_s1 + $0x38] sm:$0xff]   ;;  %1424 = vmatprep.subr.bf16.mxu1 %v1534_v2  ;;  %v1539_v7 = vld [vmem:[%s1934_s1 + $0x30] sm:$0xff]   ;;  %v1543_v11 = vld [vmem:[%s1934_s1 + $0x28] sm:$0xff]  }
  0x1b   : > { %v1536_v4 = vld [vmem:[%s1934_s1 + $0xb8] sm:$0xff]   ;;  %1397 = vmatpush3.bf16.msra.mxu0 %v1535_v3  ;;  %v1540_v8 = vld [vmem:[%s1934_s1 + $0xb0] sm:$0xff]   ;;  %v1544_v12 = vld [vmem:[%s1934_s1 + $0xa8] sm:$0xff]  }
  0x1c   : > { %1425 = vmatpush3.bf16.msra.mxu1 %v1536_v4  ;;  %1398 = vmatprep.subr.bf16.mxu0 %v1537_v5  ;;  %v1545_v13 = vld [vmem:[%s1934_s1 + $0x60] sm:$0xff]   ;;  %v1549_v17 = vld [vmem:[%s1934_s1 + $0x58] sm:$0xff]   ;;  %v1553_v21 = vld [vmem:[%s1934_s1 + $0x50] sm:$0xff]  }
  0x1d   : > { %1426 = vmatprep.subr.bf16.mxu1 %v1538_v6  ;;  %v1546_v14 = vld [vmem:[%s1934_s1 + $0xe0] sm:$0xff]   ;;  %v1550_v18 = vld [vmem:[%s1934_s1 + $0xd8] sm:$0xff]   ;;  %v1554_v22 = vld [vmem:[%s1934_s1 + $0xd0] sm:$0xff]  }
  0x1e   : > { %v1547_v15 = vld [vmem:[%s1934_s1 + $0x20] sm:$0xff]   ;;  %v1551_v19 = vld [vmem:[%s1934_s1 + $0x18] sm:$0xff]   ;;  %v1555_v23 = vld [vmem:[%s1934_s1 + $0x10] sm:$0xff]  }
  0x1f   : > { %1399 = vmatpush3.bf16.msra.mxu0 %v1539_v7  ;;  %v1548_v16 = vld [vmem:[%s1934_s1 + $0xa0] sm:$0xff]   ;;  %v1552_v20 = vld [vmem:[%s1934_s1 + $0x98] sm:$0xff]   ;;  %v1556_v24 = vld [vmem:[%s1934_s1 + $0x90] sm:$0xff]  }
  0x20   : > { %1427 = vmatpush3.bf16.msra.mxu1 %v1540_v8  ;;  %1400 = vmatprep.subr.bf16.mxu0 %v1541_v9  ;;  %v1557_v25 = vld [vmem:[%s1934_s1 + $0x48] sm:$0xff]   ;;  %v1561_v29 = vld [vmem:[%s1934_s1 + $0x40] sm:$0xff]   ;;  %v1565_v41 = vld [vmem:[%s1934_s1 + $0x178] sm:$0xff]  }
  0x21   : > { %1428 = vmatprep.subr.bf16.mxu1 %v1542_v10  ;;  %v1558_v26 = vld [vmem:[%s1934_s1 + $0xc8] sm:$0xff]   ;;  %v1562_v30 = vld [vmem:[%s1934_s1 + $0xc0] sm:$0xff]   ;;  %v1566_v42 = vld [vmem:[%s1934_s1 + $0x1f8] sm:$0xff]  }
  0x22   : > { %v1559_v27 = vld [vmem:[%s1934_s1 + $0x8] sm:$0xff]   ;;  %v1563_v31 = vld [vmem:[%s1934_s1] sm:$0xff]   ;;  %v1567_v43 = vld [vmem:[%s1934_s1 + $0x138] sm:$0xff]  }
  0x23   : > { %1401 = vmatpush3.bf16.msra.mxu0 %v1543_v11  ;;  %v1560_v28 = vld [vmem:[%s1934_s1 + $0x88] sm:$0xff]   ;;  %v1564_v32 = vld [vmem:[%s1934_s1 + $0x80] sm:$0xff]   ;;  %v1568_v44 = vld [vmem:[%s1934_s1 + $0x1b8] sm:$0xff]  }
  0x24   : > { %1429 = vmatpush3.bf16.msra.mxu1 %v1544_v12  ;;  %1402 = vmatprep.subr.bf16.mxu0 %v1545_v13  ;;  %v247_v33 = vld [vmem:[%s1933_s0] sm:$0xff]  ;;  %v248_v35 = vld [vmem:[%s1933_s0 + $0x8] sm:$0xff]  ;;  %v1569_v45 = vld [vmem:[%s1934_s1 + $0x170] sm:$0xff]  }
  0x25   : > { %1430 = vmatprep.subr.bf16.mxu1 %v1546_v14  ;;  %v251_v34 = vld [vmem:[%s1933_s0 + $0x20] sm:$0xff]  ;;  %v252_v38 = vld [vmem:[%s1933_s0 + $0x28] sm:$0xff]  ;;  %v1570_v46 = vld [vmem:[%s1934_s1 + $0x1f0] sm:$0xff]  }
  0x26   : > { %v1263_v36 = vcombine.low %v247_v33, %v251_v34  ;;  %v1264_v37 = vcombine.high %v247_v33, %v251_v34  ;;  %v1265_v39 = vcombine.low %v248_v35, %v252_v38  ;;  %v1266_v40 = vcombine.high %v248_v35, %v252_v38  ;;  %v1571_v47 = vld [vmem:[%s1934_s1 + $0x130] sm:$0xff]   ;;  %v1573_v49 = vld [vmem:[%s1934_s1 + $0x168] sm:$0xff]   ;;  %v1577_v53 = vld [vmem:[%s1934_s1 + $0x160] sm:$0xff]  }
  0x27   : > { %1403 = vmatpush3.bf16.msra.mxu0 %v1547_v15  ;;  %v1572_v48 = vld [vmem:[%s1934_s1 + $0x1b0] sm:$0xff]   ;;  %v1574_v50 = vld [vmem:[%s1934_s1 + $0x1e8] sm:$0xff]   ;;  %v1578_v54 = vld [vmem:[%s1934_s1 + $0x1e0] sm:$0xff]  }
  0x28   : > { %1431 = vmatpush3.bf16.msra.mxu1 %v1548_v16  ;;  %1404 = vmatprep.subr.bf16.mxu0 %v1549_v17  ;;  %v1575_v51 = vld [vmem:[%s1934_s1 + $0x128] sm:$0xff]   ;;  %v1579_v55 = vld [vmem:[%s1934_s1 + $0x120] sm:$0xff]   ;;  %v1581_v57 = vld [vmem:[%s1934_s1 + $0x158] sm:$0xff]  }
  0x29   : > { %1432 = vmatprep.subr.bf16.mxu1 %v1550_v18  ;;  %887 = vmatprep.mubr.bf16.mxu0 %v1264_v37  ;;  %v1576_v52 = vld [vmem:[%s1934_s1 + $0x1a8] sm:$0xff]   ;;  %v1580_v56 = vld [vmem:[%s1934_s1 + $0x1a0] sm:$0xff]   ;;  %v1582_v58 = vld [vmem:[%s1934_s1 + $0x1d8] sm:$0xff]  }
  0x2a   : > { %936 = vmatprep.mubr.bf16.mxu1 %v1266_v40  ;;  %v255_v59 = vld [vmem:[%s1933_s0 + $0x40] sm:$0xff]  ;;  %v256_v62 = vld [vmem:[%s1933_s0 + $0x48] sm:$0xff]  ;;  %v1583_v2 = vld [vmem:[%s1934_s1 + $0x118] sm:$0xff]  }
  0x2b   : > { %1405 = vmatpush3.bf16.msra.mxu0 %v1551_v19  ;;  %v259_v60 = vld [vmem:[%s1933_s0 + $0x60] sm:$0xff]  ;;  %v260_v63 = vld [vmem:[%s1933_s0 + $0x68] sm:$0xff]  ;;  %v1584_v4 = vld [vmem:[%s1934_s1 + $0x198] sm:$0xff]  }
  0x2c   : > { %1433 = vmatpush3.bf16.msra.mxu1 %v1552_v20  ;;  %1406 = vmatprep.subr.bf16.mxu0 %v1553_v21  ;;  %v1272_v61 = vcombine.high %v255_v59, %v259_v60  ;;  %v1271_v0 = vcombine.low %v255_v59, %v259_v60  ;;  %v1274_v1 = vcombine.high %v256_v62, %v260_v63  ;;  %v1585_v5 = vld [vmem:[%s1934_s1 + $0x150] sm:$0xff]   ;;  %v1589_v9 = vld [vmem:[%s1934_s1 + $0x148] sm:$0xff]   ;;  %v1593_v13 = vld [vmem:[%s1934_s1 + $0x140] sm:$0xff]  }
  0x2d   : > { %1434 = vmatprep.subr.bf16.mxu1 %v1554_v22  ;;  %v1273_v3 = vcombine.low %v256_v62, %v260_v63  ;;  %v1586_v6 = vld [vmem:[%s1934_s1 + $0x1d0] sm:$0xff]   ;;  %v1590_v10 = vld [vmem:[%s1934_s1 + $0x1c8] sm:$0xff]   ;;  %v1594_v14 = vld [vmem:[%s1934_s1 + $0x1c0] sm:$0xff]  }
  0x2e   : > { %v1587_v7 = vld [vmem:[%s1934_s1 + $0x110] sm:$0xff]   ;;  %v1591_v11 = vld [vmem:[%s1934_s1 + $0x108] sm:$0xff]   ;;  %v1595_v15 = vld [vmem:[%s1934_s1 + $0x100] sm:$0xff]  }
  0x2f   : > { %1407 = vmatpush3.bf16.msra.mxu0 %v1555_v23  ;;  %v1588_v8 = vld [vmem:[%s1934_s1 + $0x190] sm:$0xff]   ;;  %v1592_v12 = vld [vmem:[%s1934_s1 + $0x188] sm:$0xff]   ;;  %v1596_v16 = vld [vmem:[%s1934_s1 + $0x180] sm:$0xff]  }
  0x30   : > { %1435 = vmatpush3.bf16.msra.mxu1 %v1556_v24  ;;  %1408 = vmatprep.subr.bf16.mxu0 %v1557_v25  ;;  %v249_v17 = vld [vmem:[%s1933_s0 + $0x10] sm:$0xff]  ;;  %v250_v19 = vld [vmem:[%s1933_s0 + $0x18] sm:$0xff] }
  0x31   : > { %1436 = vmatprep.subr.bf16.mxu1 %v1558_v26  ;;  %v253_v18 = vld [vmem:[%s1933_s0 + $0x30] sm:$0xff]  ;;  %v254_v20 = vld [vmem:[%s1933_s0 + $0x38] sm:$0xff] }
  0x32   : > { %v1267_v21 = vcombine.low %v249_v17, %v253_v18  ;;  %v1268_v22 = vcombine.high %v249_v17, %v253_v18  ;;  %v1269_v23 = vcombine.low %v250_v19, %v254_v20  ;;  %v1270_v24 = vcombine.high %v250_v19, %v254_v20  ;;  %v257_v25 = vld [vmem:[%s1933_s0 + $0x50] sm:$0xff] }
  0x33   : > { %1409 = vmatpush3.bf16.msra.mxu0 %v1559_v27  ;;  %v261_v26 = vld [vmem:[%s1933_s0 + $0x70] sm:$0xff]  ;;  %v258_v27 = vld [vmem:[%s1933_s0 + $0x58] sm:$0xff] }
  0x34   : > { %1437 = vmatpush3.bf16.msra.mxu1 %v1560_v28  ;;  %1410 = vmatprep.subr.bf16.mxu0 %v1561_v29  ;;  %v1276_v28 = vcombine.high %v257_v25, %v261_v26  ;;  %v262_v29 = vld [vmem:[%s1933_s0 + $0x78] sm:$0xff] }
  0x35   : > { %1438 = vmatprep.subr.bf16.mxu1 %v1562_v30  ;;  %v1278_v30 = vcombine.high %v258_v27, %v262_v29 }
  0x37   : > { %1411 = vmatpush3.bf16.msra.mxu0 %v1563_v31  ;;  %v1275_v31 = vcombine.low %v257_v25, %v261_v26 }
  0x38   : > { %1439 = vmatpush3.bf16.msra.mxu1 %v1564_v32  ;;  %1452 = vmatprep.subr.bf16.mxu0 %v1565_v41  ;;  %v1277_v32 = vcombine.low %v258_v27, %v262_v29 }
  0x39   : > { %1480 = vmatprep.subr.bf16.mxu1 %v1566_v42 }
  0x3a   : > { %888 = vmatmul.mubr.bf16.vlgmr.msra.gmra.mxu0 %v1263_v36 }
  0x3b   : > { %937 = vmatmul.mubr.bf16.vlgmr.msra.gmra.mxu1 %v1265_v39  ;;  %1453 = vmatpush3.bf16.msra.mxu0 %v1567_v43 }
  0x3c   : > { %1481 = vmatpush3.bf16.msra.mxu1 %v1568_v44  ;;  %1454 = vmatprep.subr.bf16.mxu0 %v1569_v45 }
  0x3d   : > { %1482 = vmatprep.subr.bf16.mxu1 %v1570_v46  ;;  %895 = vmatprep.mubr.bf16.mxu0 %v1272_v61 }
  0x3e   : > { %944 = vmatprep.mubr.bf16.mxu1 %v1274_v1 }
  0x3f   : > { %1455 = vmatpush3.bf16.msra.mxu0 %v1571_v47 }
  0x40   : > { %1483 = vmatpush3.bf16.msra.mxu1 %v1572_v48  ;;  %1456 = vmatprep.subr.bf16.mxu0 %v1573_v49 }
  0x41   : > { %1484 = vmatprep.subr.bf16.mxu1 %v1574_v50 }
  0x42   : > { %896 = vmatmul.mubr.bf16.gmra.mxu0 %v1271_v0 }
  0x43   : > { %1457 = vmatpush3.bf16.msra.mxu0 %v1575_v51  ;;  %945 = vmatmul.mubr.bf16.gmra.mxu1 %v1273_v3 }
  0x44   : > { %1485 = vmatpush3.bf16.msra.mxu1 %v1576_v52  ;;  %1458 = vmatprep.subr.bf16.mxu0 %v1577_v53 }
  0x45   : > { %1486 = vmatprep.subr.bf16.mxu1 %v1578_v54  ;;  %985 = vmatprep.mubr.bf16.mxu0 %v1268_v22 }
  0x46   : > { %1034 = vmatprep.mubr.bf16.mxu1 %v1270_v24 }
  0x47   : > { %1459 = vmatpush3.bf16.msra.mxu0 %v1579_v55 }
  0x48   : > { %1487 = vmatpush3.bf16.msra.mxu1 %v1580_v56  ;;  %1460 = vmatprep.subr.bf16.mxu0 %v1581_v57 }
  0x49   : > { %1488 = vmatprep.subr.bf16.mxu1 %v1582_v58 }
  0x4b   : > { %1461 = vmatpush3.bf16.msra.mxu0 %v1583_v2 }
  0x4c   : > { %1489 = vmatpush3.bf16.msra.mxu1 %v1584_v4  ;;  %1462 = vmatprep.subr.bf16.mxu0 %v1585_v5 }
  0x4d   : > { %1490 = vmatprep.subr.bf16.mxu1 %v1586_v6 }
  0x4f   : > { %1463 = vmatpush3.bf16.msra.mxu0 %v1587_v7 }
  0x50   : > { %1491 = vmatpush3.bf16.msra.mxu1 %v1588_v8  ;;  %1464 = vmatprep.subr.bf16.mxu0 %v1589_v9 }
  0x51   : > { %1492 = vmatprep.subr.bf16.mxu1 %v1590_v10 }
  0x53   : > { %1465 = vmatpush3.bf16.msra.mxu0 %v1591_v11 }
  0x54   : > { %1493 = vmatpush3.bf16.msra.mxu1 %v1592_v12  ;;  %1466 = vmatprep.subr.bf16.mxu0 %v1593_v13 }
  0x55   : > { %1494 = vmatprep.subr.bf16.mxu1 %v1594_v14 }
  0x57   : > { %1467 = vmatpush3.bf16.msra.mxu0 %v1595_v15 }
  0x58   : > { %1495 = vmatpush3.bf16.msra.mxu1 %v1596_v16 }
  0x5a   : > { %986 = vmatmul.mubr.bf16.vlgmr.msra.gmra.mxu0 %v1267_v21 }
  0x5b   : > { %1035 = vmatmul.mubr.bf16.vlgmr.msra.gmra.mxu1 %v1269_v23  ;;  %993 = vmatprep.mubr.bf16.mxu0 %v1276_v28 }
  0x5c   : > { %1042 = vmatprep.mubr.bf16.mxu1 %v1278_v30 }
  0x62   : > { %994 = vmatmul.mubr.bf16.gmra.mxu0 %v1275_v31 }
  0x63   : > { %1043 = vmatmul.mubr.bf16.gmra.mxu1 %v1277_v32 }
  0xfa   : > { %v1412_v33 = vpop.f32.mrf.mxu0 }
  0xfb   : > { %v1440_v34 = vpop.f32.mrf.mxu1 }
  0xfc   : > { %v1413_v35 = vpop.f32.mrf.mxu0 }
  0xfd   : > { %v1441_v36 = vpop.f32.mrf.mxu1  ;;  %v1414_v51 = vadd.f32 %v1413_v35, %v1412_v33 }
  0xfe   : > { %v1415_v37 = vpop.f32.mrf.mxu0  ;;  %v1442_v52 = vadd.f32 %v1441_v36, %v1440_v34 }
  0xff   : > { %v1443_v38 = vpop.f32.mrf.mxu1 }
 0x100   : > { %v1416_v39 = vpop.f32.mrf.mxu0  ;;  %v939_v60 = vadd.f32 %v1442_v52, %v1414_v51 }
 0x101   : > { %v1444_v40 = vpop.f32.mrf.mxu1  ;;  %v1417_v55 = vadd.f32 %v1416_v39, %v1415_v37 }
 0x102   : > { %v1418_v41 = vpop.f32.mrf.mxu0  ;;  %v1445_v56 = vadd.f32 %v1444_v40, %v1443_v38 }
 0x103   : > { %v1446_v42 = vpop.f32.mrf.mxu1 }
 0x104   : > { %v1419_v43 = vpop.f32.mrf.mxu0  ;;  %v942_v1 = vadd.f32 %v1445_v56, %v1417_v55 }
 0x105   : > { %v1447_v44 = vpop.f32.mrf.mxu1  ;;  %v1420_v61 = vadd.f32 %v1419_v43, %v1418_v41 }
 0x106   : > { %v1421_v45 = vpop.f32.mrf.mxu0  ;;  %v1448_v62 = vadd.f32 %v1447_v44, %v1446_v42 }
 0x107   : > { %v1449_v46 = vpop.f32.mrf.mxu1 }
 0x108   : > { %v1422_v47 = vpop.f32.mrf.mxu0  ;;  %v947_v9 = vadd.f32 %v1448_v62, %v1420_v61 }
 0x109   : > { %v1450_v48 = vpop.f32.mrf.mxu1  ;;  %v1423_v10 = vadd.f32 %v1422_v47, %v1421_v45 }
 0x10a   : > { %v1451_v13 = vadd.f32 %v1450_v48, %v1449_v46 }
 0x10c   : > { %v950_v24 = vadd.f32 %v1451_v13, %v1423_v10 }
 0x11a   : > { %v1468_v49 = vpop.f32.mrf.mxu0 }
 0x11b   : > { %v1496_v50 = vpop.f32.mrf.mxu1 }
 0x11c   : > { %v1469_v53 = vpop.f32.mrf.mxu0 }
 0x11d   : > { %v1497_v54 = vpop.f32.mrf.mxu1  ;;  %v1470_v57 = vadd.f32 %v1469_v53, %v1468_v49  ;;  %v1086_v53 = vld [vmem:[#allocation4] sm:$0x1] }
 0x11e   : > { %v1471_v58 = vpop.f32.mrf.mxu0  ;;  %v1498_v6 = vadd.f32 %v1497_v54, %v1496_v50  ;;  %v1074_v50 = vld [vmem:[#allocation3] sm:$0x1] }
 0x11f   : > { %v1499_v59 = vpop.f32.mrf.mxu1  ;;  %v988_v2 = vadd.f32 %v1470_v57, %v939_v60 }
 0x120   : > { %v1472_v63 = vpop.f32.mrf.mxu0 }
 0x121   : > { %v1500_v0 = vpop.f32.mrf.mxu1  ;;  %v1473_v3 = vadd.f32 %v1472_v63, %v1471_v58  ;;  %v1037_v14 = vadd.f32 %v1498_v6, %v988_v2 }
 0x122   : > { %v1474_v4 = vpop.f32.mrf.mxu0  ;;  %v1501_v8 = vadd.f32 %v1500_v0, %v1499_v59 }
 0x123   : > { %v1502_v5 = vpop.f32.mrf.mxu1  ;;  %v991_v7 = vadd.f32 %v1473_v3, %v942_v1  ;;  %v1087_v28 = vmul.f32 %v1037_v14, %v1037_v14 }
 0x124   : > { %v1475_v11 = vpop.f32.mrf.mxu0 }
 0x125   : > { %v1503_v12 = vpop.f32.mrf.mxu1  ;;  %v1040_v15 = vadd.f32 %v1501_v8, %v991_v7  ;;  %v1476_v16 = vadd.f32 %v1475_v11, %v1474_v4 }
 0x126   : > { %v1477_v17 = vpop.f32.mrf.mxu0  ;;  %v1504_v21 = vadd.f32 %v1503_v12, %v1502_v5 }
 0x127   : > { %v1505_v18 = vpop.f32.mrf.mxu1  ;;  %v1368_v19 = vpack.c.bf16 %v1040_v15, %v1037_v14  ;;  %v996_v20 = vadd.f32 %v1476_v16, %v947_v9  ;;  %v1088_v25 = vmul.f32 %v1040_v15, %v1040_v15  ;;  %v1075_v29 = vadd.f32 %v1040_v15, %v1037_v14 }
 0x128   : > { %v1478_v22 = vpop.f32.mrf.mxu0 }
 0x129   : > { %v1506_v23 = vpop.f32.mrf.mxu1  ;;  %1369 = vst [vmem:[#allocation2] sm:$0xff] %v1368_v19   ;;  %v1045_v26 = vadd.f32 %v1504_v21, %v996_v20  ;;  %v1479_v27 = vadd.f32 %v1478_v22, %v1477_v17  ;;  %v1091_v33 = vadd.f32 %v1088_v25, %v1087_v28 }
 0x12a   : > { %v1507_v32 = vadd.f32 %v1506_v23, %v1505_v18 }
 0x12b   : > { %v1089_v30 = vmul.f32 %v1045_v26, %v1045_v26  ;;  %v999_v31 = vadd.f32 %v1479_v27, %v950_v24  ;;  %v1076_v34 = vadd.f32 %v1075_v29, %v1045_v26 }
 0x12d   : > { %v1048_v35 = vadd.f32 %v1507_v32, %v999_v31  ;;  %v1092_v36 = vadd.f32 %v1091_v33, %v1089_v30 }
 0x12f   : > { %v1373_v37 = vpack.c.bf16 %v1048_v35, %v1045_v26  ;;  %v1077_v38 = vadd.f32 %v1076_v34, %v1048_v35  ;;  %v1090_v39 = vmul.f32 %v1048_v35, %v1048_v35 }
 0x131   : > { %1393 = vst [vmem:[#allocation2 + $0x8] sm:$0xff] %v1373_v37   ;;  %v1078_v40 = vrot.slane %v1077_v38, 4  ;;  %v1093_v41 = vadd.f32 %v1092_v36, %v1090_v39 }
 0x133   : > { %v1079_v42 = vadd.f32 %v1078_v40, %v1077_v38  ;;  %v1094_v43 = vrot.slane %v1093_v41, 4 }
 0x135   : > { %v1080_v44 = vrot.slane %v1079_v42, 2  ;;  %v1095_v45 = vadd.f32 %v1094_v43, %v1093_v41 }
 0x137   : > { %v1081_v46 = vadd.f32 %v1080_v44, %v1079_v42  ;;  %v1096_v47 = vrot.slane %v1095_v45, 2 }
 0x139   : > { %v1082_v48 = vrot.slane %v1081_v46, 1  ;;  %v1097_v49 = vadd.f32 %v1096_v47, %v1095_v45 }
 0x13b   : > { %v1083_v51 = vadd.f32 %v1082_v48, %v1081_v46  ;;  %v1098_v52 = vrot.slane %v1097_v49, 1 }
 0x13d   : > { %v1084_v54 = vadd.f32 %v1083_v51, %v1074_v50  ;;  %v1099_v55 = vadd.f32 %v1098_v52, %v1097_v49 }
 0x13f   : > { %1085 = vst [vmem:[#allocation3] sm:$0x1] %v1084_v54  ;;  %v1100_v56 = vadd.f32 %v1099_v55, %v1086_v53 }
 0x141   : > { %1101 = vst [vmem:[#allocation4] sm:$0x1] %v1100_v56 }
 0x142 PF: > { %p1347_p6 = scmp.ne.s32.totalorder %s1613_s15, 1 }
 0x144   : > { %1105 = sbr.rel (%p1347_p6) target bundleno = 371 (0x173), region = 48 }
 0x149   : > { %v1106_v57 = vld [vmem:[#allocation3] sm:$0x1]  ;;  %v1108_v58 = vld [vmem:[#allocation4] sm:$0x1]  ;;  %v1132_v1 = vlaneseq  ;;  %v1113_v3 = vld [vmem:[%s1935_s2] sm:$0x1] }
 0x14a   : > { %v1107_v59 = vmul.f32 0.055555556, %v1106_v57  ;;  %v1109_v60 = vmul.f32 0.055555556, %v1108_v58  ;;  %v1376_v4 = vld [vmem:[#allocation2] sm:$0xff]   ;;  %v1394_v5 = vld [vmem:[#allocation2 + $0x8] sm:$0xff]  }
 0x14b   : > { %v1133_v2 = vshrl.u32 %v1132_v1, 7  ;;  %v1377_v9 = vunpack.c.l.bf16 %v1376_v4  ;;  %v1378_v10 = vunpack.c.h.bf16 %v1376_v4  ;;  %v1381_v11 = vunpack.c.l.bf16 %v1394_v5  ;;  %v1117_v12 = vld [vmem:[%s1936_s3] sm:$0x1] }
 0x14c   : > { %v1110_v61 = vmul.f32 %v1107_v59, %v1107_v59  ;;  %v1382_v13 = vunpack.c.h.bf16 %v1394_v5 }
 0x14d   : > { %v1134_v6 = vsub.s32 0, %v1133_v2 }
 0x14e   : > { %v1111_v62 = vsub.f32 %v1109_v60, %v1110_v61 }
 0x150   : > { %v1112_v63 = vmax.f32 %v1111_v62, 0.0 }
 0x152   : > { %v1114_v0 = vadd.f32 1e-05, %v1112_v63 }
 0x154   : > { %1597 = vrsqrt.f32 %v1114_v0 }
 0x161   : > { %v1598_v7 = vpop.eup %1597 }
 0x162   : > { %v1116_v8 = vmul.f32 %v1598_v7, %v1113_v3 }
 0x164   : > { %v1118_v14 = vmul.f32 %v1116_v8, %v1107_v59  ;;  %v1135_v15 = vrot.slane %v1116_v8, %v1134_v6 }
 0x166   : > { %v1119_v16 = vsub.f32 %v1117_v12, %v1118_v14  ;;  %v1137_v17 = vmul.f32 %v1377_v9, %v1135_v15  ;;  %v1138_v18 = vmul.f32 %v1378_v10, %v1135_v15  ;;  %v1139_v19 = vmul.f32 %v1381_v11, %v1135_v15 }
 0x167   : > { %v1140_v20 = vmul.f32 %v1382_v13, %v1135_v15 }
 0x168   : > { %v1145_v21 = vrot.slane %v1119_v16, %v1134_v6 }
 0x16a   : > { %v1147_v22 = vadd.f32 %v1145_v21, %v1137_v17  ;;  %v1148_v23 = vadd.f32 %v1145_v21, %v1138_v18  ;;  %v1149_v24 = vadd.f32 %v1145_v21, %v1139_v19  ;;  %v1150_v25 = vadd.f32 %v1145_v21, %v1140_v20 }
 0x16c   : > { %vm1151_vm0 = vcmp.ge.f32.partialorder %v1147_v22, 0.0  ;;  %vm1152_vm1 = vcmp.ge.f32.partialorder %v1148_v23, 0.0  ;;  %v1155_v26 = vmul.f32 0.2, %v1147_v22  ;;  %v1156_v27 = vmul.f32 0.2, %v1148_v23 }
 0x16d   : > { %vm1153_vm2 = vcmp.ge.f32.partialorder %v1149_v24, 0.0  ;;  %vm1154_vm3 = vcmp.ge.f32.partialorder %v1150_v25, 0.0  ;;  %v1157_v28 = vmul.f32 0.2, %v1149_v24  ;;  %v1158_v29 = vmul.f32 0.2, %v1150_v25 }
 0x16e   : > { %v1159_v30 = vsel %vm1151_vm0, %v1147_v22, %v1155_v26  ;;  %v1160_v31 = vsel %vm1152_vm1, %v1148_v23, %v1156_v27 }
 0x16f   : > { %v1386_v32 = vpack.c.bf16 %v1160_v31, %v1159_v30  ;;  %v1161_v33 = vsel %vm1153_vm2, %v1149_v24, %v1157_v28  ;;  %v1162_v34 = vsel %vm1154_vm3, %v1150_v25, %v1158_v29 }
 0x170   : > { %v1391_v35 = vpack.c.bf16 %v1162_v34, %v1161_v33 }
 0x171   : > { %1387 = vst [vmem:[%s1937_s4] sm:$0xff] %v1386_v32  }
 0x172   : > { %1395 = vst [vmem:[%s1937_s4 + $0x8] sm:$0xff] %v1391_v35  }
 0x173 PF: > { %s14_s17 = sadd.s32 1, %s1621_s17   ;;  %s1938_s15 = smov %s1617_s16 }
 0x174   : > { %p11_p7 = scmp.ge.s32.totalorder %s14_s17, 4   ;;  %s1939_s16 = smov %s1941_s18 }
 0x176   :  { %13 = sbr.rel (!%p11_p7) target bundleno = 2 (0x2), region = 80 }

// kernel: cnn_encoder_forward.10
= control target key start
LH: loop header
LB: loop body
LE: loop exit
PB: predicated region body
PF: predicated region fallthrough
CT: control target
= control target key end

     0   :  { %s2125_s15 = smov 0   ;;  %s2127_s16 = smov 0   ;;  %s2628_s0 = inlined_call_operand.vmem [shape: bf16[16,1152], index: 0, kind: input, shape index: {}]   ;;  %s2629_s1 = inlined_call_operand.vmem [shape: bf16[1152,256], index: 1, kind: input, shape index: {}]   ;;  %s2630_s2 = inlined_call_operand.vmem [shape: f32[1,256], index: 2, kind: input, shape index: {}]   ;;  %s2631_s3 = inlined_call_operand.vmem [shape: f32[1,256], index: 3, kind: input, shape index: {}]   ;;  %s2632_s4 = inlined_call_operand.vmem [shape: bf16[16,256], index: 4, kind: output, shape index: {}]  }
   0x1   :  { %s2129_s17 = smov 0  }
   0x2 LB: > { %s26_s18 = sadd.s32 1, %s2091_s16  ;;  %p1645_p0 = scmp.ge.s32.totalorder %s2095_s17, 1  ;;  %s2095_s17 = sphi %s2129_s17, %s14_s17   ;;  %s2091_s16 = sphi %s2127_s16, %s2634_s16   ;;  %s2087_s15 = sphi %s2125_s15, %s2633_s15  }
   0x3   : > { %p28_p1 = scmp.ge.s32.totalorder %s26_s18, 2  ;;  %p186_p2 = scmp.lt.s32.totalorder %s2095_s17, 3 }
   0x5   : > { %s2636_s18 = smov (%p28_p1, %s26_s18), 0  ;;  %p187_p3 = pnand %p1645_p0, %p186_p2 }
   0x6   : > { %p238_p4 = scmp.eq.s32.totalorder (!%p187_p3), %s2087_s15, 0 }
   0x7   : > { %190 = sbr.rel (%p187_p3) target bundleno = 461 (0x1cd), region = 36 }
   0xc   : > { %243 = sbr.rel (!%p238_p4) target bundleno = 17 (0x11), region = 40  ;;  %v244_v0 = vlaneseq (%p238_p4)  ;;  %v2097_v1 = vmov (%p238_p4), 0.0  }
   0xe   : > { %vm246_vm0 = vcmp.lt.s32.totalorder (%p238_p4), %v244_v0, 256 }
   0xf   : > { %248 = vst.msk [vmem:[#allocation3] sm:$0x3] (%p238_p4), %vm246_vm0, %v2097_v1  ;;  %249 = vst.msk [vmem:[#allocation4] sm:$0x3] (%p238_p4), %vm246_vm0, %v2097_v1 }
  0x11 PF: > { %p1647_p5 = scmp.ne.s32.totalorder %s2087_s15, 0 }
  0x13   : > { %252 = sbr.rel (%p1647_p5) target bundleno = 412 (0x19c), region = 44 }
  0x18   : > { %v1842_v2 = vld [vmem:[%s2629_s1 + $0x74] ss:$8 sps:$4 sm:$0xff]   ;;  %v1846_v4 = vld [vmem:[%s2629_s1 + $0x70] ss:$8 sps:$4 sm:$0xff]   ;;  %v1848_v6 = vld [vmem:[%s2629_s1 + $0x64] ss:$8 sps:$4 sm:$0xff]  }
  0x19   : > { %v1844_v3 = vld [vmem:[%s2629_s1 + $0x174] ss:$8 sps:$4 sm:$0xff]   ;;  %1173 = vmatprep.subr.bf16.mxu0 %v1842_v2  ;;  %v1847_v5 = vld [vmem:[%s2629_s1 + $0x170] ss:$8 sps:$4 sm:$0xff]   ;;  %v1850_v7 = vld [vmem:[%s2629_s1 + $0x164] ss:$8 sps:$4 sm:$0xff]  }
  0x1a   : > { %1216 = vmatprep.subr.bf16.mxu1 %v1844_v3  ;;  %1174 = vmatpush1.bf16.msra.mxu0 %v1846_v4  ;;  %v1852_v8 = vld [vmem:[%s2629_s1 + $0x60] ss:$8 sps:$4 sm:$0xff]   ;;  %v1854_v10 = vld [vmem:[%s2629_s1 + $0x54] ss:$8 sps:$4 sm:$0xff]   ;;  %v1858_v12 = vld [vmem:[%s2629_s1 + $0x50] ss:$8 sps:$4 sm:$0xff]  }
  0x1b   : > { %1217 = vmatpush1.bf16.msra.mxu1 %v1847_v5  ;;  %1175 = vmatprep.subr.bf16.mxu0 %v1848_v6  ;;  %v1853_v9 = vld [vmem:[%s2629_s1 + $0x160] ss:$8 sps:$4 sm:$0xff]   ;;  %v1856_v11 = vld [vmem:[%s2629_s1 + $0x154] ss:$8 sps:$4 sm:$0xff]   ;;  %v1859_v13 = vld [vmem:[%s2629_s1 + $0x150] ss:$8 sps:$4 sm:$0xff]  }
  0x1c   : > { %1218 = vmatprep.subr.bf16.mxu1 %v1850_v7  ;;  %v1860_v14 = vld [vmem:[%s2629_s1 + $0x44] ss:$8 sps:$4 sm:$0xff]   ;;  %v1864_v16 = vld [vmem:[%s2629_s1 + $0x40] ss:$8 sps:$4 sm:$0xff]   ;;  %v1866_v18 = vld [vmem:[%s2629_s1 + $0x34] ss:$8 sps:$4 sm:$0xff]  }
  0x1d   : > { %v1862_v15 = vld [vmem:[%s2629_s1 + $0x144] ss:$8 sps:$4 sm:$0xff]   ;;  %v1865_v17 = vld [vmem:[%s2629_s1 + $0x140] ss:$8 sps:$4 sm:$0xff]   ;;  %v1868_v19 = vld [vmem:[%s2629_s1 + $0x134] ss:$8 sps:$4 sm:$0xff]  }
  0x1e   : > { %1176 = vmatpush1.bf16.msra.mxu0 %v1852_v8  ;;  %v1870_v20 = vld [vmem:[%s2629_s1 + $0x30] ss:$8 sps:$4 sm:$0xff]   ;;  %v1872_v22 = vld [vmem:[%s2629_s1 + $0x24] ss:$8 sps:$4 sm:$0xff]   ;;  %v1876_v24 = vld [vmem:[%s2629_s1 + $0x20] ss:$8 sps:$4 sm:$0xff]  }
  0x1f   : > { %1219 = vmatpush1.bf16.msra.mxu1 %v1853_v9  ;;  %1177 = vmatprep.subr.bf16.mxu0 %v1854_v10  ;;  %v1871_v21 = vld [vmem:[%s2629_s1 + $0x130] ss:$8 sps:$4 sm:$0xff]   ;;  %v1874_v23 = vld [vmem:[%s2629_s1 + $0x124] ss:$8 sps:$4 sm:$0xff]   ;;  %v1877_v25 = vld [vmem:[%s2629_s1 + $0x120] ss:$8 sps:$4 sm:$0xff]  }
  0x20   : > { %1220 = vmatprep.subr.bf16.mxu1 %v1856_v11  ;;  %v1878_v26 = vld [vmem:[%s2629_s1 + $0x14] ss:$8 sps:$4 sm:$0xff]   ;;  %v1882_v28 = vld [vmem:[%s2629_s1 + $0x10] ss:$8 sps:$4 sm:$0xff]   ;;  %v1884_v30 = vld [vmem:[%s2629_s1 + $0x4] ss:$8 sps:$4 sm:$0xff]  }
  0x21   : > { %v1880_v27 = vld [vmem:[%s2629_s1 + $0x114] ss:$8 sps:$4 sm:$0xff]   ;;  %v1883_v29 = vld [vmem:[%s2629_s1 + $0x110] ss:$8 sps:$4 sm:$0xff]   ;;  %v1886_v31 = vld [vmem:[%s2629_s1 + $0x104] ss:$8 sps:$4 sm:$0xff]  }
  0x22   : > { %1178 = vmatpush1.bf16.msra.mxu0 %v1858_v12  ;;  %v1888_v32 = vld [vmem:[%s2629_s1] ss:$8 sps:$4 sm:$0xff]   ;;  %v1890_v34 = vld [vmem:[%s2629_s1 + $0xf4] ss:$8 sps:$4 sm:$0xff]   ;;  %v1894_v36 = vld [vmem:[%s2629_s1 + $0xf0] ss:$8 sps:$4 sm:$0xff]  }
  0x23   : > { %1221 = vmatpush1.bf16.msra.mxu1 %v1859_v13  ;;  %1179 = vmatprep.subr.bf16.mxu0 %v1860_v14  ;;  %v1889_v33 = vld [vmem:[%s2629_s1 + $0x100] ss:$8 sps:$4 sm:$0xff]   ;;  %v1892_v35 = vld [vmem:[%s2629_s1 + $0x1f4] ss:$8 sps:$4 sm:$0xff]   ;;  %v1895_v37 = vld [vmem:[%s2629_s1 + $0x1f0] ss:$8 sps:$4 sm:$0xff]  }
  0x24   : > { %1222 = vmatprep.subr.bf16.mxu1 %v1862_v15  ;;  %v1896_v38 = vld [vmem:[%s2629_s1 + $0xe4] ss:$8 sps:$4 sm:$0xff]   ;;  %v1900_v40 = vld [vmem:[%s2629_s1 + $0xe0] ss:$8 sps:$4 sm:$0xff]   ;;  %v1902_v42 = vld [vmem:[%s2629_s1 + $0xd4] ss:$8 sps:$4 sm:$0xff]  }
  0x25   : > { %v1898_v39 = vld [vmem:[%s2629_s1 + $0x1e4] ss:$8 sps:$4 sm:$0xff]   ;;  %v1901_v41 = vld [vmem:[%s2629_s1 + $0x1e0] ss:$8 sps:$4 sm:$0xff]   ;;  %v1904_v43 = vld [vmem:[%s2629_s1 + $0x1d4] ss:$8 sps:$4 sm:$0xff]  }
  0x26   : > { %1180 = vmatpush1.bf16.msra.mxu0 %v1864_v16  ;;  %v1906_v44 = vld [vmem:[%s2629_s1 + $0xd0] ss:$8 sps:$4 sm:$0xff]   ;;  %v1908_v46 = vld [vmem:[%s2629_s1 + $0xc4] ss:$8 sps:$4 sm:$0xff]   ;;  %v1912_v48 = vld [vmem:[%s2629_s1 + $0xc0] ss:$8 sps:$4 sm:$0xff]  }
  0x27   : > { %1223 = vmatpush1.bf16.msra.mxu1 %v1865_v17  ;;  %1181 = vmatprep.subr.bf16.mxu0 %v1866_v18  ;;  %v1907_v45 = vld [vmem:[%s2629_s1 + $0x1d0] ss:$8 sps:$4 sm:$0xff]   ;;  %v1910_v47 = vld [vmem:[%s2629_s1 + $0x1c4] ss:$8 sps:$4 sm:$0xff]   ;;  %v1913_v49 = vld [vmem:[%s2629_s1 + $0x1c0] ss:$8 sps:$4 sm:$0xff]  }
  0x28   : > { %1224 = vmatprep.subr.bf16.mxu1 %v1868_v19  ;;  %v1914_v50 = vld [vmem:[%s2629_s1 + $0xb4] ss:$8 sps:$4 sm:$0xff]   ;;  %v1940_v51 = vld [vmem:[%s2628_s0 + $0x4] ss:$36 sps:$4 sm:$0xff]   ;;  %v1943_v53 = vld [vmem:[%s2628_s0 + $0xc] ss:$36 sps:$4 sm:$0xff]  }
  0x29   : > { %v1916_v52 = vld [vmem:[%s2629_s1 + $0x1b4] ss:$8 sps:$4 sm:$0xff]   ;;  %1205 = vmatprep.mubr.bf16.mxu0 %v1940_v51  ;;  %v1918_v54 = vld [vmem:[%s2629_s1 + $0xb0] ss:$8 sps:$4 sm:$0xff]   ;;  %1248 = vmatprep.mubr.bf16.mxu1 %v1943_v53  ;;  %v1920_v56 = vld [vmem:[%s2629_s1 + $0xa4] ss:$8 sps:$4 sm:$0xff]  }
  0x2a   : > { %1182 = vmatpush1.bf16.msra.mxu0 %v1870_v20  ;;  %v1919_v55 = vld [vmem:[%s2629_s1 + $0x1b0] ss:$8 sps:$4 sm:$0xff]   ;;  %v1922_v57 = vld [vmem:[%s2629_s1 + $0x1a4] ss:$8 sps:$4 sm:$0xff]   ;;  %v1924_v58 = vld [vmem:[%s2629_s1 + $0xa0] ss:$8 sps:$4 sm:$0xff]  }
  0x2b   : > { %1225 = vmatpush1.bf16.msra.mxu1 %v1871_v21  ;;  %1183 = vmatprep.subr.bf16.mxu0 %v1872_v22  ;;  %v1925_v59 = vld [vmem:[%s2629_s1 + $0x1a0] ss:$8 sps:$4 sm:$0xff]   ;;  %v1926_v60 = vld [vmem:[%s2629_s1 + $0x94] ss:$8 sps:$4 sm:$0xff]   ;;  %v1930_v62 = vld [vmem:[%s2629_s1 + $0x90] ss:$8 sps:$4 sm:$0xff]  }
  0x2c   : > { %1226 = vmatprep.subr.bf16.mxu1 %v1874_v23  ;;  %v1928_v61 = vld [vmem:[%s2629_s1 + $0x194] ss:$8 sps:$4 sm:$0xff]   ;;  %v1931_v63 = vld [vmem:[%s2629_s1 + $0x190] ss:$8 sps:$4 sm:$0xff]   ;;  %v1932_v0 = vld [vmem:[%s2629_s1 + $0x84] ss:$8 sps:$4 sm:$0xff]  }
  0x2d   : > { %v1934_v1 = vld [vmem:[%s2629_s1 + $0x184] ss:$8 sps:$4 sm:$0xff]   ;;  %v1936_v2 = vld [vmem:[%s2629_s1 + $0x80] ss:$8 sps:$4 sm:$0xff]   ;;  %v1946_v4 = vld [vmem:[%s2629_s1 + $0x274] ss:$8 sps:$4 sm:$0xff]  }
  0x2e   : > { %1184 = vmatpush1.bf16.msra.mxu0 %v1876_v24  ;;  %v1937_v3 = vld [vmem:[%s2629_s1 + $0x180] ss:$8 sps:$4 sm:$0xff]   ;;  %v1949_v5 = vld [vmem:[%s2629_s1 + $0x374] ss:$8 sps:$4 sm:$0xff]   ;;  %v1944_v8 = vld [vmem:[%s2629_s1 + $0x270] ss:$8 sps:$4 sm:$0xff]  }
  0x2f   : > { %1227 = vmatpush1.bf16.msra.mxu1 %v1877_v25  ;;  %1185 = vmatprep.subr.bf16.mxu0 %v1878_v26  ;;  %v1938_v6 = vld [vmem:[%s2628_s0] ss:$36 sps:$4 sm:$0xff]   ;;  %v1941_v7 = vld [vmem:[%s2628_s0 + $0x8] ss:$36 sps:$4 sm:$0xff]   ;;  %v1947_v9 = vld [vmem:[%s2629_s1 + $0x370] ss:$8 sps:$4 sm:$0xff]  }
  0x30   : > { %1228 = vmatprep.subr.bf16.mxu1 %v1880_v27  ;;  %v1952_v10 = vld [vmem:[%s2629_s1 + $0x264] ss:$8 sps:$4 sm:$0xff]   ;;  %v1950_v12 = vld [vmem:[%s2629_s1 + $0x260] ss:$8 sps:$4 sm:$0xff]   ;;  %v1958_v14 = vld [vmem:[%s2629_s1 + $0x254] ss:$8 sps:$4 sm:$0xff]  }
  0x31   : > { %v1955_v11 = vld [vmem:[%s2629_s1 + $0x364] ss:$8 sps:$4 sm:$0xff]   ;;  %v1953_v13 = vld [vmem:[%s2629_s1 + $0x360] ss:$8 sps:$4 sm:$0xff]   ;;  %v1961_v15 = vld [vmem:[%s2629_s1 + $0x354] ss:$8 sps:$4 sm:$0xff]  }
  0x32   : > { %1186 = vmatpush1.bf16.msra.mxu0 %v1882_v28  ;;  %v1956_v16 = vld [vmem:[%s2629_s1 + $0x250] ss:$8 sps:$4 sm:$0xff]   ;;  %v1964_v18 = vld [vmem:[%s2629_s1 + $0x244] ss:$8 sps:$4 sm:$0xff]   ;;  %v1962_v20 = vld [vmem:[%s2629_s1 + $0x240] ss:$8 sps:$4 sm:$0xff]  }
  0x33   : > { %1229 = vmatpush1.bf16.msra.mxu1 %v1883_v29  ;;  %1187 = vmatprep.subr.bf16.mxu0 %v1884_v30  ;;  %v1959_v17 = vld [vmem:[%s2629_s1 + $0x350] ss:$8 sps:$4 sm:$0xff]   ;;  %v1967_v19 = vld [vmem:[%s2629_s1 + $0x344] ss:$8 sps:$4 sm:$0xff]   ;;  %v1965_v21 = vld [vmem:[%s2629_s1 + $0x340] ss:$8 sps:$4 sm:$0xff]  }
  0x34   : > { %1230 = vmatprep.subr.bf16.mxu1 %v1886_v31  ;;  %v1970_v22 = vld [vmem:[%s2629_s1 + $0x234] ss:$8 sps:$4 sm:$0xff]   ;;  %v1968_v24 = vld [vmem:[%s2629_s1 + $0x230] ss:$8 sps:$4 sm:$0xff]   ;;  %v1976_v26 = vld [vmem:[%s2629_s1 + $0x224] ss:$8 sps:$4 sm:$0xff]  }
  0x35   : > { %v1973_v23 = vld [vmem:[%s2629_s1 + $0x334] ss:$8 sps:$4 sm:$0xff]   ;;  %v1971_v25 = vld [vmem:[%s2629_s1 + $0x330] ss:$8 sps:$4 sm:$0xff]   ;;  %v1979_v27 = vld [vmem:[%s2629_s1 + $0x324] ss:$8 sps:$4 sm:$0xff]  }
  0x36   : > { %1188 = vmatpush1.bf16.msra.mxu0 %v1888_v32  ;;  %v1974_v28 = vld [vmem:[%s2629_s1 + $0x220] ss:$8 sps:$4 sm:$0xff]   ;;  %v1982_v30 = vld [vmem:[%s2629_s1 + $0x214] ss:$8 sps:$4 sm:$0xff]   ;;  %v1980_v32 = vld [vmem:[%s2629_s1 + $0x210] ss:$8 sps:$4 sm:$0xff]  }
  0x37   : > { %1231 = vmatpush1.bf16.msra.mxu1 %v1889_v33  ;;  %1189 = vmatprep.subr.bf16.mxu0 %v1890_v34  ;;  %v1977_v29 = vld [vmem:[%s2629_s1 + $0x320] ss:$8 sps:$4 sm:$0xff]   ;;  %v1985_v31 = vld [vmem:[%s2629_s1 + $0x314] ss:$8 sps:$4 sm:$0xff]   ;;  %v1983_v33 = vld [vmem:[%s2629_s1 + $0x310] ss:$8 sps:$4 sm:$0xff]  }
  0x38   : > { %1232 = vmatprep.subr.bf16.mxu1 %v1892_v35  ;;  %v1988_v34 = vld [vmem:[%s2629_s1 + $0x204] ss:$8 sps:$4 sm:$0xff]   ;;  %v2007_v51 = vld [vmem:[%s2629_s1 + $0x3d0] ss:$8 sps:$4 sm:$0xff]  }
  0x39   : > { %v1991_v35 = vld [vmem:[%s2629_s1 + $0x304] ss:$8 sps:$4 sm:$0xff]  }
  0x3a   : > { %1190 = vmatpush2.bf16.msra.mxu0 %v1894_v36  ;;  %v2042_v36 = vld [vmem:[%s2628_s0 + $0x14] ss:$36 sps:$4 sm:$0xff]   ;;  %v2015_v53 = vld [vmem:[%s2629_s1 + $0x3c4] ss:$8 sps:$4 sm:$0xff]  }
  0x3b   : > { %1233 = vmatpush2.bf16.msra.mxu1 %v1895_v37  ;;  %1191 = vmatprep.subr.bf16.mxu0 %v1896_v38  ;;  %v1986_v37 = vld [vmem:[%s2629_s1 + $0x200] ss:$8 sps:$4 sm:$0xff]  }
  0x3c   : > { %1234 = vmatprep.subr.bf16.mxu1 %v1898_v39  ;;  %v1989_v38 = vld [vmem:[%s2629_s1 + $0x300] ss:$8 sps:$4 sm:$0xff]  }
  0x3d   : > { %v2048_v39 = vld [vmem:[%s2628_s0 + $0x1c] ss:$36 sps:$4 sm:$0xff]  }
  0x3e   : > { %1192 = vmatpush2.bf16.msra.mxu0 %v1900_v40  ;;  %v1994_v40 = vld [vmem:[%s2629_s1 + $0x2f4] ss:$8 sps:$4 sm:$0xff]  }
  0x3f   : > { %1235 = vmatpush2.bf16.msra.mxu1 %v1901_v41  ;;  %1193 = vmatprep.subr.bf16.mxu0 %v1902_v42  ;;  %v1997_v41 = vld [vmem:[%s2629_s1 + $0x3f4] ss:$8 sps:$4 sm:$0xff]   ;;  %v1992_v42 = vld [vmem:[%s2629_s1 + $0x2f0] ss:$8 sps:$4 sm:$0xff]  }
  0x40   : > { %1236 = vmatprep.subr.bf16.mxu1 %v1904_v43  ;;  %v1995_v43 = vld [vmem:[%s2629_s1 + $0x3f0] ss:$8 sps:$4 sm:$0xff]  }
  0x42   : > { %1194 = vmatpush2.bf16.msra.mxu0 %v1906_v44  ;;  %v2000_v44 = vld [vmem:[%s2629_s1 + $0x2e4] ss:$8 sps:$4 sm:$0xff]  }
  0x43   : > { %1237 = vmatpush2.bf16.msra.mxu1 %v1907_v45  ;;  %1195 = vmatprep.subr.bf16.mxu0 %v1908_v46  ;;  %v2003_v45 = vld [vmem:[%s2629_s1 + $0x3e4] ss:$8 sps:$4 sm:$0xff]   ;;  %v1998_v46 = vld [vmem:[%s2629_s1 + $0x2e0] ss:$8 sps:$4 sm:$0xff]  }
  0x44   : > { %1238 = vmatprep.subr.bf16.mxu1 %v1910_v47  ;;  %v2001_v47 = vld [vmem:[%s2629_s1 + $0x3e0] ss:$8 sps:$4 sm:$0xff]  }
  0x46   : > { %1196 = vmatpush2.bf16.msra.mxu0 %v1912_v48  ;;  %v2006_v48 = vld [vmem:[%s2629_s1 + $0x2d4] ss:$8 sps:$4 sm:$0xff]  }
  0x47   : > { %1239 = vmatpush2.bf16.msra.mxu1 %v1913_v49  ;;  %1197 = vmatprep.subr.bf16.mxu0 %v1914_v50  ;;  %v2009_v49 = vld [vmem:[%s2629_s1 + $0x3d4] ss:$8 sps:$4 sm:$0xff]   ;;  %v2004_v50 = vld [vmem:[%s2629_s1 + $0x2d0] ss:$8 sps:$4 sm:$0xff]  }
  0x48   : > { %1240 = vmatprep.subr.bf16.mxu1 %v1916_v52  ;;  %v2012_v52 = vld [vmem:[%s2629_s1 + $0x2c4] ss:$8 sps:$4 sm:$0xff]  }
  0x4a   : > { %1198 = vmatpush2.bf16.msra.mxu0 %v1918_v54  ;;  %v2010_v54 = vld [vmem:[%s2629_s1 + $0x2c0] ss:$8 sps:$4 sm:$0xff]  }
  0x4b   : > { %1241 = vmatpush2.bf16.msra.mxu1 %v1919_v55  ;;  %1199 = vmatprep.subr.bf16.mxu0 %v1920_v56  ;;  %v2013_v55 = vld [vmem:[%s2629_s1 + $0x3c0] ss:$8 sps:$4 sm:$0xff]   ;;  %v2018_v56 = vld [vmem:[%s2629_s1 + $0x2b4] ss:$8 sps:$4 sm:$0xff]  }
  0x4c   : > { %1242 = vmatprep.subr.bf16.mxu1 %v1922_v57  ;;  %v2021_v57 = vld [vmem:[%s2629_s1 + $0x3b4] ss:$8 sps:$4 sm:$0xff]  }
  0x4e   : > { %1200 = vmatpush2.bf16.msra.mxu0 %v1924_v58  ;;  %v2016_v58 = vld [vmem:[%s2629_s1 + $0x2b0] ss:$8 sps:$4 sm:$0xff]  }
  0x4f   : > { %1243 = vmatpush2.bf16.msra.mxu1 %v1925_v59  ;;  %1201 = vmatprep.subr.bf16.mxu0 %v1926_v60  ;;  %v2019_v59 = vld [vmem:[%s2629_s1 + $0x3b0] ss:$8 sps:$4 sm:$0xff]   ;;  %v2024_v60 = vld [vmem:[%s2629_s1 + $0x2a4] ss:$8 sps:$4 sm:$0xff]  }
  0x50   : > { %1244 = vmatprep.subr.bf16.mxu1 %v1928_v61  ;;  %v2027_v61 = vld [vmem:[%s2629_s1 + $0x3a4] ss:$8 sps:$4 sm:$0xff]  }
  0x52   : > { %1202 = vmatpush2.bf16.msra.mxu0 %v1930_v62  ;;  %v2022_v62 = vld [vmem:[%s2629_s1 + $0x2a0] ss:$8 sps:$4 sm:$0xff]  }
  0x53   : > { %1245 = vmatpush2.bf16.msra.mxu1 %v1931_v63  ;;  %1203 = vmatprep.subr.bf16.mxu0 %v1932_v0  ;;  %v2025_v63 = vld [vmem:[%s2629_s1 + $0x3a0] ss:$8 sps:$4 sm:$0xff]   ;;  %v2030_v0 = vld [vmem:[%s2629_s1 + $0x294] ss:$8 sps:$4 sm:$0xff]  }
  0x54   : > { %1246 = vmatprep.subr.bf16.mxu1 %v1934_v1  ;;  %v2033_v1 = vld [vmem:[%s2629_s1 + $0x394] ss:$8 sps:$4 sm:$0xff]  }
  0x56   : > { %1204 = vmatpush2.bf16.msra.mxu0 %v1936_v2  ;;  %v2028_v2 = vld [vmem:[%s2629_s1 + $0x290] ss:$8 sps:$4 sm:$0xff]  }
  0x57   : > { %1247 = vmatpush2.bf16.msra.mxu1 %v1937_v3  ;;  %1259 = vmatprep.subr.bf16.mxu0 %v1946_v4  ;;  %v2031_v3 = vld [vmem:[%s2629_s1 + $0x390] ss:$8 sps:$4 sm:$0xff]   ;;  %v2036_v4 = vld [vmem:[%s2629_s1 + $0x284] ss:$8 sps:$4 sm:$0xff]  }
  0x58   : > { %1302 = vmatprep.subr.bf16.mxu1 %v1949_v5  ;;  %v2039_v5 = vld [vmem:[%s2629_s1 + $0x384] ss:$8 sps:$4 sm:$0xff]  }
  0x59   : > { %1206 = vmatmul.mubr.bf16.vlgmr.msra.gmra.mxu0 %v1938_v6  ;;  %v2034_v6 = vld [vmem:[%s2629_s1 + $0x280] ss:$8 sps:$4 sm:$0xff]  }
  0x5a   : > { %1249 = vmatmul.mubr.bf16.vlgmr.msra.gmra.mxu1 %v1941_v7  ;;  %1260 = vmatpush1.bf16.msra.mxu0 %v1944_v8  ;;  %v2037_v7 = vld [vmem:[%s2629_s1 + $0x380] ss:$8 sps:$4 sm:$0xff]   ;;  %v2045_v8 = vld [vmem:[%s2629_s1 + $0x474] ss:$8 sps:$4 sm:$0xff]  }
  0x5b   : > { %1303 = vmatpush1.bf16.msra.mxu1 %v1947_v9  ;;  %1261 = vmatprep.subr.bf16.mxu0 %v1952_v10  ;;  %v2040_v9 = vld [vmem:[%s2628_s0 + $0x10] ss:$36 sps:$4 sm:$0xff]   ;;  %v2046_v10 = vld [vmem:[%s2628_s0 + $0x18] ss:$36 sps:$4 sm:$0xff]  }
  0x5c   : > { %1304 = vmatprep.subr.bf16.mxu1 %v1955_v11  ;;  %1291 = vmatprep.mubr.bf16.mxu0 %v2042_v36  ;;  %v2043_v11 = vld [vmem:[%s2629_s1 + $0x470] ss:$8 sps:$4 sm:$0xff]  }
  0x5d   : > { %1334 = vmatprep.mubr.bf16.mxu1 %v2048_v39 }
  0x5e   : > { %1262 = vmatpush1.bf16.msra.mxu0 %v1950_v12  ;;  %v2051_v12 = vld [vmem:[%s2629_s1 + $0x464] ss:$8 sps:$4 sm:$0xff]  }
  0x5f   : > { %1305 = vmatpush1.bf16.msra.mxu1 %v1953_v13  ;;  %1263 = vmatprep.subr.bf16.mxu0 %v1958_v14  ;;  %v2049_v13 = vld [vmem:[%s2629_s1 + $0x460] ss:$8 sps:$4 sm:$0xff]   ;;  %v2098_v14 = vmov 0  }
  0x60   : > { %1306 = vmatprep.subr.bf16.mxu1 %v1961_v15  ;;  %v2054_v15 = vld [vmem:[%s2629_s1 + $0x454] ss:$8 sps:$4 sm:$0xff]  }
  0x62   : > { %1264 = vmatpush1.bf16.msra.mxu0 %v1956_v16  ;;  %v2052_v16 = vld [vmem:[%s2629_s1 + $0x450] ss:$8 sps:$4 sm:$0xff]  }
  0x63   : > { %1307 = vmatpush1.bf16.msra.mxu1 %v1959_v17  ;;  %1265 = vmatprep.subr.bf16.mxu0 %v1964_v18  ;;  %v2057_v17 = vld [vmem:[%s2629_s1 + $0x444] ss:$8 sps:$4 sm:$0xff]   ;;  %v2055_v18 = vld [vmem:[%s2629_s1 + $0x440] ss:$8 sps:$4 sm:$0xff]  }
  0x64   : > { %1308 = vmatprep.subr.bf16.mxu1 %v1967_v19  ;;  %v2060_v19 = vld [vmem:[%s2629_s1 + $0x434] ss:$8 sps:$4 sm:$0xff]  }
  0x66   : > { %1266 = vmatpush1.bf16.msra.mxu0 %v1962_v20  ;;  %v2058_v20 = vld [vmem:[%s2629_s1 + $0x430] ss:$8 sps:$4 sm:$0xff]  }
  0x67   : > { %1309 = vmatpush1.bf16.msra.mxu1 %v1965_v21  ;;  %1267 = vmatprep.subr.bf16.mxu0 %v1970_v22  ;;  %v2063_v21 = vld [vmem:[%s2629_s1 + $0x424] ss:$8 sps:$4 sm:$0xff]   ;;  %v2061_v22 = vld [vmem:[%s2629_s1 + $0x420] ss:$8 sps:$4 sm:$0xff]  }
  0x68   : > { %1310 = vmatprep.subr.bf16.mxu1 %v1973_v23  ;;  %v2066_v23 = vld [vmem:[%s2629_s1 + $0x414] ss:$8 sps:$4 sm:$0xff]  }
  0x6a   : > { %1268 = vmatpush1.bf16.msra.mxu0 %v1968_v24  ;;  %v2064_v24 = vld [vmem:[%s2629_s1 + $0x410] ss:$8 sps:$4 sm:$0xff]  }
  0x6b   : > { %1311 = vmatpush1.bf16.msra.mxu1 %v1971_v25  ;;  %1269 = vmatprep.subr.bf16.mxu0 %v1976_v26  ;;  %v2069_v25 = vld [vmem:[%s2629_s1 + $0x404] ss:$8 sps:$4 sm:$0xff]   ;;  %v2067_v26 = vld [vmem:[%s2629_s1 + $0x400] ss:$8 sps:$4 sm:$0xff]  }
  0x6c   : > { %1312 = vmatprep.subr.bf16.mxu1 %v1979_v27  ;;  %v2070_v27 = vld [vmem:[%s2628_s0 + $0x20] ss:$36 sps:$4 sm:$0xff]  }
  0x6e   : > { %1270 = vmatpush1.bf16.msra.mxu0 %v1974_v28 }
  0x6f   : > { %1313 = vmatpush1.bf16.msra.mxu1 %v1977_v29  ;;  %1271 = vmatprep.subr.bf16.mxu0 %v1982_v30 }
  0x70   : > { %1314 = vmatprep.subr.bf16.mxu1 %v1985_v31 }
  0x72   : > { %1272 = vmatpush1.bf16.msra.mxu0 %v1980_v32 }
  0x73   : > { %1315 = vmatpush1.bf16.msra.mxu1 %v1983_v33  ;;  %1273 = vmatprep.subr.bf16.mxu0 %v1988_v34 }
  0x74   : > { %1316 = vmatprep.subr.bf16.mxu1 %v1991_v35 }
  0x76   : > { %1274 = vmatpush1.bf16.msra.mxu0 %v1986_v37 }
  0x77   : > { %1317 = vmatpush1.bf16.msra.mxu1 %v1989_v38  ;;  %1275 = vmatprep.subr.bf16.mxu0 %v1994_v40 }
  0x78   : > { %1318 = vmatprep.subr.bf16.mxu1 %v1997_v41 }
  0x7a   : > { %1276 = vmatpush2.bf16.msra.mxu0 %v1992_v42 }
  0x7b   : > { %1319 = vmatpush2.bf16.msra.mxu1 %v1995_v43  ;;  %1277 = vmatprep.subr.bf16.mxu0 %v2000_v44 }
  0x7c   : > { %1320 = vmatprep.subr.bf16.mxu1 %v2003_v45 }
  0x7e   : > { %1278 = vmatpush2.bf16.msra.mxu0 %v1998_v46 }
  0x7f   : > { %1321 = vmatpush2.bf16.msra.mxu1 %v2001_v47  ;;  %1279 = vmatprep.subr.bf16.mxu0 %v2006_v48 }
  0x80   : > { %1322 = vmatprep.subr.bf16.mxu1 %v2009_v49 }
  0x82   : > { %1280 = vmatpush2.bf16.msra.mxu0 %v2004_v50 }
  0x83   : > { %1323 = vmatpush2.bf16.msra.mxu1 %v2007_v51  ;;  %1281 = vmatprep.subr.bf16.mxu0 %v2012_v52 }
  0x84   : > { %1324 = vmatprep.subr.bf16.mxu1 %v2015_v53 }
  0x86   : > { %1282 = vmatpush2.bf16.msra.mxu0 %v2010_v54 }
  0x87   : > { %1325 = vmatpush2.bf16.msra.mxu1 %v2013_v55  ;;  %1283 = vmatprep.subr.bf16.mxu0 %v2018_v56 }
  0x88   : > { %1326 = vmatprep.subr.bf16.mxu1 %v2021_v57 }
  0x8a   : > { %1284 = vmatpush2.bf16.msra.mxu0 %v2016_v58 }
  0x8b   : > { %1327 = vmatpush2.bf16.msra.mxu1 %v2019_v59  ;;  %1285 = vmatprep.subr.bf16.mxu0 %v2024_v60 }
  0x8c   : > { %1328 = vmatprep.subr.bf16.mxu1 %v2027_v61 }
  0x8e   : > { %1286 = vmatpush2.bf16.msra.mxu0 %v2022_v62 }
  0x8f   : > { %1329 = vmatpush2.bf16.msra.mxu1 %v2025_v63  ;;  %1287 = vmatprep.subr.bf16.mxu0 %v2030_v0 }
  0x90   : > { %1330 = vmatprep.subr.bf16.mxu1 %v2033_v1 }
  0x92   : > { %1288 = vmatpush2.bf16.msra.mxu0 %v2028_v2 }
  0x93   : > { %1331 = vmatpush2.bf16.msra.mxu1 %v2031_v3  ;;  %1289 = vmatprep.subr.bf16.mxu0 %v2036_v4 }
  0x94   : > { %1332 = vmatprep.subr.bf16.mxu1 %v2039_v5 }
  0x96   : > { %1290 = vmatpush2.bf16.msra.mxu0 %v2034_v6 }
  0x97   : > { %1333 = vmatpush2.bf16.msra.mxu1 %v2037_v7  ;;  %1345 = vmatprep.subr.bf16.mxu0 %v2045_v8 }
  0x99   : > { %1292 = vmatmul.mubr.bf16.vlgmr.msra.gmra.mxu0 %v2040_v9 }
  0x9a   : > { %1335 = vmatmul.mubr.bf16.vlgmr.msra.gmra.mxu1 %v2046_v10  ;;  %1346 = vmatpush1.bf16.msra.mxu0 %v2043_v11 }
  0x9b   : > { %1377 = vmatprep.mubr.bf16.mxu0 %v2098_v14  ;;  %1347 = vmatprep.subr.bf16.mxu0 %v2051_v12 }
  0x9e   : > { %1348 = vmatpush1.bf16.msra.mxu0 %v2049_v13  ;;  %v2099_v13 = vmov 1966171168  }
  0x9f   : > { %1349 = vmatprep.subr.bf16.mxu0 %v2054_v15  ;;  %v1424_v14 = vunpack.c.l.s4 %v2099_v13 }
  0xa2   : > { %1350 = vmatpush1.bf16.msra.mxu0 %v2052_v16 }
  0xa3   : > { %1351 = vmatprep.subr.bf16.mxu0 %v2057_v17 }
  0xa6   : > { %1352 = vmatpush1.bf16.msra.mxu0 %v2055_v18 }
  0xa7   : > { %1353 = vmatprep.subr.bf16.mxu0 %v2060_v19  ;;  %v1426_v19 = vlaneseq }
  0xa9   : > { %vm1441_vm1 = vcmp.lt.s32.totalorder %v1426_v19, 256 }
  0xaa   : > { %1354 = vmatpush1.bf16.msra.mxu0 %v2058_v20 }
  0xab   : > { %1355 = vmatprep.subr.bf16.mxu0 %v2063_v21 }
  0xae   : > { %1356 = vmatpush1.bf16.msra.mxu0 %v2061_v22 }
  0xaf   : > { %1357 = vmatprep.subr.bf16.mxu0 %v2066_v23 }
  0xb2   : > { %1358 = vmatpush1.bf16.msra.mxu0 %v2064_v24  ;;  %v1425_v24 = vunpack.c.0.s8 %v1424_v14 }
  0xb3   : > { %1359 = vmatprep.subr.bf16.mxu0 %v2069_v25 }
  0xb6   : > { %1360 = vmatpush1.bf16.msra.mxu0 %v2067_v26 }
  0xb9   : > { %1378 = vmatmul.mubr.bf16.vlgmr.msra.gmra.mxu0 %v2070_v27 }
 0x119   : > { %v1207_v28 = vpop.f32.mrf.mxu0 }
 0x11a   : > { %v1250_v29 = vpop.f32.mrf.mxu1 }
 0x11b   : > { %v1209_v30 = vpop.f32.mrf.mxu0  ;;  %v1251_v41 = vadd.f32 %v1250_v29, %v1207_v28  ;;  %v1427_v29 = vshrl.u32 %v1426_v19, 7 }
 0x11c   : > { %v1252_v31 = vpop.f32.mrf.mxu1 }
 0x11d   : > { %v1211_v32 = vpop.f32.mrf.mxu0  ;;  %v1253_v42 = vadd.f32 %v1252_v31, %v1209_v30 }
 0x11e   : > { %v1254_v33 = vpop.f32.mrf.mxu1 }
 0x11f   : > { %v1213_v34 = vpop.f32.mrf.mxu0  ;;  %v1255_v43 = vadd.f32 %v1254_v33, %v1211_v32 }
 0x120   : > { %v1256_v36 = vpop.f32.mrf.mxu1 }
 0x121   : > { %v1257_v48 = vadd.f32 %v1256_v36, %v1213_v34  ;;  %v1428_v36 = vsub.s32 %v1425_v24, %v1427_v29 }
 0x159   : > { %v1293_v35 = vpop.f32.mrf.mxu0 }
 0x15a   : > { %v1336_v38 = vpop.f32.mrf.mxu1  ;;  %v1294_v44 = vadd.f32 %v1293_v35, %v1251_v41 }
 0x15b   : > { %v1295_v37 = vpop.f32.mrf.mxu0 }
 0x15c   : > { %v1338_v40 = vpop.f32.mrf.mxu1  ;;  %v1296_v45 = vadd.f32 %v1295_v37, %v1253_v42  ;;  %v1337_v51 = vadd.f32 %v1336_v38, %v1294_v44  ;;  %v1405_v42 = vld [vmem:[#allocation3] sm:$0x3] }
 0x15d   : > { %v1297_v39 = vpop.f32.mrf.mxu0 }
 0x15e   : > { %v1340_v47 = vpop.f32.mrf.mxu1  ;;  %v1298_v49 = vadd.f32 %v1297_v39, %v1255_v43  ;;  %v1339_v52 = vadd.f32 %v1338_v40, %v1296_v45 }
 0x15f   : > { %v1299_v46 = vpop.f32.mrf.mxu0 }
 0x160   : > { %v1300_v53 = vadd.f32 %v1299_v46, %v1257_v48  ;;  %v1342_v54 = vpop.f32.mrf.mxu1  ;;  %v1341_v56 = vadd.f32 %v1340_v47, %v1298_v49  ;;  %v1444_v47 = vld [vmem:[#allocation4] sm:$0x3] }
 0x162   : > { %v1343_v60 = vadd.f32 %v1342_v54, %v1300_v53 }
 0x179   : > { %v1379_v50 = vpop.f32.mrf.mxu0 }
 0x17a   : > { %v1380_v57 = vadd.f32 %v1379_v50, %v1337_v51 }
 0x17b   : > { %v1381_v55 = vpop.f32.mrf.mxu0 }
 0x17c   : > { %v1382_v58 = vadd.f32 %v1381_v55, %v1339_v52  ;;  %v1445_v0 = vmul.f32 %v1380_v57, %v1380_v57 }
 0x17d   : > { %v1383_v59 = vpop.f32.mrf.mxu0 }
 0x17e   : > { %v1811_v61 = vpack.c.bf16 %v1382_v58, %v1380_v57  ;;  %v1384_v62 = vadd.f32 %v1383_v59, %v1341_v56  ;;  %v1446_v8 = vmul.f32 %v1382_v58, %v1382_v58 }
 0x17f   : > { %v1385_v63 = vpop.f32.mrf.mxu0 }
 0x180   : > { %1403 = vst [vmem:[#allocation2] sm:$0xff] %v1811_v61  ;;  %v1406_v1 = vadd.f32 %v1384_v62, %v1380_v57  ;;  %v1447_v2 = vmul.f32 %v1384_v62, %v1384_v62  ;;  %v1386_v3 = vadd.f32 %v1385_v63, %v1343_v60 }
 0x182   : > { %v1407_v4 = vrot.slane %v1406_v1, 4  ;;  %v1449_v5 = vadd.f32 %v1447_v2, %v1445_v0  ;;  %v1812_v6 = vpack.c.bf16 %v1386_v3, %v1384_v62  ;;  %v1413_v7 = vadd.f32 %v1386_v3, %v1382_v58 }
 0x183   : > { %v1448_v9 = vmul.f32 %v1386_v3, %v1386_v3 }
 0x184   : > { %v1408_v10 = vadd.f32 %v1407_v4, %v1406_v1  ;;  %v1450_v11 = vrot.slane %v1449_v5, 4  ;;  %1404 = vst [vmem:[#allocation2 + $0x8] sm:$0xff] %v1812_v6  ;;  %v1414_v12 = vrot.slane %v1413_v7, 4 }
 0x185   : > { %v1456_v15 = vadd.f32 %v1448_v9, %v1446_v8 }
 0x186   : > { %v1409_v16 = vrot.slane %v1408_v10, 2  ;;  %v1451_v17 = vadd.f32 %v1450_v11, %v1449_v5  ;;  %v1415_v18 = vadd.f32 %v1414_v12, %v1413_v7 }
 0x187   : > { %v1457_v20 = vrot.slane %v1456_v15, 4 }
 0x188   : > { %v1410_v21 = vadd.f32 %v1409_v16, %v1408_v10  ;;  %v1452_v22 = vrot.slane %v1451_v17, 2  ;;  %v1416_v23 = vrot.slane %v1415_v18, 2 }
 0x189   : > { %v1458_v25 = vadd.f32 %v1457_v20, %v1456_v15 }
 0x18a   : > { %v1411_v26 = vrot.slane %v1410_v21, 1  ;;  %v1453_v27 = vadd.f32 %v1452_v22, %v1451_v17  ;;  %v1417_v28 = vadd.f32 %v1416_v23, %v1415_v18 }
 0x18b   : > { %v1459_v30 = vrot.slane %v1458_v25, 2 }
 0x18c   : > { %v1418_v31 = vrot.slane %v1417_v28, 1  ;;  %v1454_v32 = vrot.slane %v1453_v27, 1  ;;  %v1412_v34 = vadd.f32 %v1411_v26, %v1410_v21 }
 0x18d   : > { %v1460_v33 = vadd.f32 %v1459_v30, %v1458_v25 }
 0x18e   : > { %v1419_v35 = vadd.f32 %v1418_v31, %v1417_v28  ;;  %v1455_v39 = vadd.f32 %v1454_v32, %v1453_v27 }
 0x18f   : > { %v1461_v37 = vrot.slane %v1460_v33, 1 }
 0x190   : > { %v1422_v38 = vcombine.low %v1412_v34, %v1419_v35 }
 0x191   : > { %v1462_v40 = vadd.f32 %v1461_v37, %v1460_v33 }
 0x192   : > { %v1429_v41 = vrot.slane %v1422_v38, %v1428_v36 }
 0x193   : > { %v1465_v43 = vcombine.low %v1455_v39, %v1462_v40 }
 0x194   : > { %v1436_v44 = vrot.slane %v1429_v41, %v1428_v36 }
 0x195   : > { %v1472_v45 = vrot.slane %v1465_v43, %v1428_v36 }
 0x196   : > { %v1438_v46 = vadd.f32 %v1436_v44, %v1405_v42 }
 0x197   : > { %v1479_v48 = vrot.slane %v1472_v45, %v1428_v36 }
 0x198   : > { %1443 = vst.msk [vmem:[#allocation3] sm:$0x3] %vm1441_vm1, %v1438_v46 }
 0x199   : > { %v1481_v49 = vadd.f32 %v1479_v48, %v1444_v47 }
 0x19b   : > { %1482 = vst.msk [vmem:[#allocation4] sm:$0x3] %vm1441_vm1, %v1481_v49 }
 0x19c PF: > { %p1803_p6 = scmp.ne.s32.totalorder %s2087_s15, 1 }
 0x19e   : > { %1486 = sbr.rel (%p1803_p6) target bundleno = 461 (0x1cd), region = 48 }
 0x1a3   : > { %v1487_v50 = vld [vmem:[#allocation3] sm:$0x3]  ;;  %v1489_v51 = vld [vmem:[#allocation4] sm:$0x3]  ;;  %v1511_v58 = vlaneseq  ;;  %v1494_v60 = vld [vmem:[%s2630_s2] sm:$0x3] }
 0x1a4   : > { %v1488_v52 = vmul.f32 0.125, %v1487_v50  ;;  %v1490_v53 = vmul.f32 0.125, %v1489_v51  ;;  %v1504_v61 = vld [vmem:[#allocation2] sm:$0xff]  ;;  %v1505_v62 = vld [vmem:[#allocation2 + $0x8] sm:$0xff] }
 0x1a5   : > { %v1512_v59 = vshrl.u32 %v1511_v58, 7  ;;  %v1506_v3 = vunpack.c.l.bf16 %v1504_v61  ;;  %v1507_v4 = vunpack.c.h.bf16 %v1504_v61  ;;  %v1508_v5 = vunpack.c.l.bf16 %v1505_v62  ;;  %v1498_v6 = vld [vmem:[%s2631_s3] sm:$0x3] }
 0x1a6   : > { %v1491_v54 = vmul.f32 %v1488_v52, %v1488_v52  ;;  %v1509_v7 = vunpack.c.h.bf16 %v1505_v62 }
 0x1a7   : > { %v1513_v63 = vsub.s32 0, %v1512_v59  ;;  %v1517_v0 = vsub.s32 1, %v1512_v59 }
 0x1a8   : > { %v1492_v55 = vsub.f32 %v1490_v53, %v1491_v54 }
 0x1aa   : > { %v1493_v56 = vmax.f32 %v1492_v55, 0.0 }
 0x1ac   : > { %v1495_v57 = vadd.f32 1e-05, %v1493_v56 }
 0x1ae   : > { %2071 = vrsqrt.f32 %v1495_v57 }
 0x1bb   : > { %v2072_v1 = vpop.eup %2071 }
 0x1bc   : > { %v1497_v2 = vmul.f32 %v2072_v1, %v1494_v60 }
 0x1be   : > { %v1499_v8 = vmul.f32 %v1497_v2, %v1488_v52  ;;  %v1514_v9 = vrot.slane %v1497_v2, %v1513_v63  ;;  %v1518_v10 = vrot.slane %v1497_v2, %v1517_v0 }
 0x1c0   : > { %v1500_v11 = vsub.f32 %v1498_v6, %v1499_v8  ;;  %v1521_v12 = vmul.f32 %v1514_v9, %v1506_v3  ;;  %v1522_v13 = vmul.f32 %v1518_v10, %v1507_v4  ;;  %v1523_v14 = vmul.f32 %v1514_v9, %v1508_v5 }
 0x1c1   : > { %v1524_v15 = vmul.f32 %v1518_v10, %v1509_v7 }
 0x1c2   : > { %v1529_v16 = vrot.slane %v1500_v11, %v1513_v63  ;;  %v1533_v17 = vrot.slane %v1500_v11, %v1517_v0 }
 0x1c4   : > { %v1536_v18 = vadd.f32 %v1529_v16, %v1521_v12  ;;  %v1537_v19 = vadd.f32 %v1533_v17, %v1522_v13  ;;  %v1538_v20 = vadd.f32 %v1529_v16, %v1523_v14  ;;  %v1539_v21 = vadd.f32 %v1533_v17, %v1524_v15 }
 0x1c6   : > { %vm1540_vm2 = vcmp.ge.f32.partialorder %v1536_v18, 0.0  ;;  %vm1541_vm3 = vcmp.ge.f32.partialorder %v1537_v19, 0.0  ;;  %v1544_v22 = vmul.f32 0.2, %v1536_v18  ;;  %v1545_v23 = vmul.f32 0.2, %v1537_v19 }
 0x1c7   : > { %vm1542_vm4 = vcmp.ge.f32.partialorder %v1538_v20, 0.0  ;;  %vm1543_vm5 = vcmp.ge.f32.partialorder %v1539_v21, 0.0  ;;  %v1546_v24 = vmul.f32 0.2, %v1538_v20  ;;  %v1547_v25 = vmul.f32 0.2, %v1539_v21 }
 0x1c8   : > { %v1548_v26 = vsel %vm1540_vm2, %v1536_v18, %v1544_v22  ;;  %v1549_v27 = vsel %vm1541_vm3, %v1537_v19, %v1545_v23 }
 0x1c9   : > { %v1813_v28 = vpack.c.bf16 %v1549_v27, %v1548_v26  ;;  %v1550_v29 = vsel %vm1542_vm4, %v1538_v20, %v1546_v24  ;;  %v1551_v30 = vsel %vm1543_vm5, %v1539_v21, %v1547_v25 }
 0x1ca   : > { %v1814_v31 = vpack.c.bf16 %v1551_v30, %v1550_v29 }
 0x1cb   : > { %1564 = vst [vmem:[%s2632_s4] sm:$0xff] %v1813_v28 }
 0x1cc   : > { %1565 = vst [vmem:[%s2632_s4 + $0x8] sm:$0xff] %v1814_v31 }
 0x1cd PF: > { %s14_s17 = sadd.s32 1, %s2095_s17   ;;  %s2633_s15 = smov %s2091_s16 }
 0x1ce   : > { %p11_p7 = scmp.ge.s32.totalorder %s14_s17, 4   ;;  %s2634_s16 = smov %s2636_s18 }
 0x1d0   :  { %13 = sbr.rel (!%p11_p7) target bundleno = 2 (0x2), region = 80 }

// kernel: cnn_encoder_forward.11
= control target key start
LH: loop header
LB: loop body
LE: loop exit
PB: predicated region body
PF: predicated region fallthrough
CT: control target
= control target key end

     0   :  { %s1472_s15 = smov 0   ;;  %s1474_s16 = smov 0   ;;  %s1729_s0 = inlined_call_operand.vmem [shape: bf16[16,1024], index: 0, kind: input, shape index: {}]   ;;  %s1730_s1 = inlined_call_operand.vmem [shape: bf16[1024,128], index: 1, kind: input, shape index: {}]   ;;  %s1731_s2 = inlined_call_operand.vmem [shape: f32[1,128], index: 2, kind: input, shape index: {}]   ;;  %s1732_s3 = inlined_call_operand.vmem [shape: f32[1,128], index: 3, kind: input, shape index: {}]   ;;  %s1733_s4 = inlined_call_operand.vmem [shape: bf16[16,128], index: 4, kind: output, shape index: {}]  }
   0x1   :  { %s1476_s17 = smov 0  }
   0x2 LB: > { %s26_s18 = sadd.s32 1, %s1440_s16  ;;  %p1140_p0 = scmp.ge.s32.totalorder %s1444_s17, 1  ;;  %s1444_s17 = sphi %s1476_s17, %s14_s17   ;;  %s1440_s16 = sphi %s1474_s16, %s1735_s16   ;;  %s1436_s15 = sphi %s1472_s15, %s1734_s15  }
   0x3   : > { %p28_p1 = scmp.ge.s32.totalorder %s26_s18, 2  ;;  %p186_p2 = scmp.lt.s32.totalorder %s1444_s17, 3 }
   0x5   : > { %s1737_s18 = smov (%p28_p1, %s26_s18), 0  ;;  %p187_p3 = pnand %p1140_p0, %p186_p2 }
   0x6   : > { %p236_p4 = scmp.eq.s32.totalorder (!%p187_p3), %s1436_s15, 0 }
   0x7   : > { %190 = sbr.rel (%p187_p3) target bundleno = 362 (0x16a), region = 36 }
   0xc   : > { %241 = sbr.rel (!%p236_p4) target bundleno = 17 (0x11), region = 40  ;;  %v1446_v0 = vmov (%p236_p4), 0.0  }
   0xd   : > { %242 = vst [vmem:[#allocation3] sm:$0x1] (%p236_p4), %v1446_v0  ;;  %243 = vst [vmem:[#allocation4] sm:$0x1] (%p236_p4), %v1446_v0 }
  0x11 PF: > { %p1142_p5 = scmp.ne.s32.totalorder %s1436_s15, 0 }
  0x13   : > { %246 = sbr.rel (%p1142_p5) target bundleno = 314 (0x13a), region = 44 }
  0x18   : > { %v1356_v1 = vld [vmem:[%s1730_s1 + $0x78] sm:$0xff]   ;;  %v1360_v5 = vld [vmem:[%s1730_s1 + $0x70] sm:$0xff]   ;;  %v1364_v9 = vld [vmem:[%s1730_s1 + $0x68] sm:$0xff]  }
  0x19   : > { %v1357_v2 = vld [vmem:[%s1730_s1 + $0xf8] sm:$0xff]   ;;  %1243 = vmatprep.subr.bf16.mxu0 %v1356_v1  ;;  %v1361_v6 = vld [vmem:[%s1730_s1 + $0xf0] sm:$0xff]   ;;  %v1365_v10 = vld [vmem:[%s1730_s1 + $0xe8] sm:$0xff]  }
  0x1a   : > { %v1358_v3 = vld [vmem:[%s1730_s1 + $0x38] sm:$0xff]   ;;  %1265 = vmatprep.subr.bf16.mxu1 %v1357_v2  ;;  %v1362_v7 = vld [vmem:[%s1730_s1 + $0x30] sm:$0xff]   ;;  %v1366_v11 = vld [vmem:[%s1730_s1 + $0x28] sm:$0xff]  }
  0x1b   : > { %v1359_v4 = vld [vmem:[%s1730_s1 + $0xb8] sm:$0xff]   ;;  %1244 = vmatpush3.bf16.msra.mxu0 %v1358_v3  ;;  %v1363_v8 = vld [vmem:[%s1730_s1 + $0xb0] sm:$0xff]   ;;  %v1367_v12 = vld [vmem:[%s1730_s1 + $0xa8] sm:$0xff]  }
  0x1c   : > { %1266 = vmatpush3.bf16.msra.mxu1 %v1359_v4  ;;  %1245 = vmatprep.subr.bf16.mxu0 %v1360_v5  ;;  %v1368_v13 = vld [vmem:[%s1730_s1 + $0x60] sm:$0xff]   ;;  %v1372_v17 = vld [vmem:[%s1730_s1 + $0x58] sm:$0xff]   ;;  %v1376_v21 = vld [vmem:[%s1730_s1 + $0x50] sm:$0xff]  }
  0x1d   : > { %1267 = vmatprep.subr.bf16.mxu1 %v1361_v6  ;;  %v1369_v14 = vld [vmem:[%s1730_s1 + $0xe0] sm:$0xff]   ;;  %v1373_v18 = vld [vmem:[%s1730_s1 + $0xd8] sm:$0xff]   ;;  %v1377_v22 = vld [vmem:[%s1730_s1 + $0xd0] sm:$0xff]  }
  0x1e   : > { %v1370_v15 = vld [vmem:[%s1730_s1 + $0x20] sm:$0xff]   ;;  %v1374_v19 = vld [vmem:[%s1730_s1 + $0x18] sm:$0xff]   ;;  %v1378_v23 = vld [vmem:[%s1730_s1 + $0x10] sm:$0xff]  }
  0x1f   : > { %1246 = vmatpush3.bf16.msra.mxu0 %v1362_v7  ;;  %v1371_v16 = vld [vmem:[%s1730_s1 + $0xa0] sm:$0xff]   ;;  %v1375_v20 = vld [vmem:[%s1730_s1 + $0x98] sm:$0xff]   ;;  %v1379_v24 = vld [vmem:[%s1730_s1 + $0x90] sm:$0xff]  }
  0x20   : > { %1268 = vmatpush3.bf16.msra.mxu1 %v1363_v8  ;;  %1247 = vmatprep.subr.bf16.mxu0 %v1364_v9  ;;  %v1380_v25 = vld [vmem:[%s1730_s1 + $0x48] sm:$0xff]   ;;  %v1384_v29 = vld [vmem:[%s1730_s1 + $0x40] sm:$0xff]   ;;  %v1388_v41 = vld [vmem:[%s1730_s1 + $0x178] sm:$0xff]  }
  0x21   : > { %1269 = vmatprep.subr.bf16.mxu1 %v1365_v10  ;;  %v1381_v26 = vld [vmem:[%s1730_s1 + $0xc8] sm:$0xff]   ;;  %v1385_v30 = vld [vmem:[%s1730_s1 + $0xc0] sm:$0xff]   ;;  %v1389_v42 = vld [vmem:[%s1730_s1 + $0x1f8] sm:$0xff]  }
  0x22   : > { %v1382_v27 = vld [vmem:[%s1730_s1 + $0x8] sm:$0xff]   ;;  %v1386_v31 = vld [vmem:[%s1730_s1] sm:$0xff]   ;;  %v1390_v43 = vld [vmem:[%s1730_s1 + $0x138] sm:$0xff]  }
  0x23   : > { %1248 = vmatpush3.bf16.msra.mxu0 %v1366_v11  ;;  %v1383_v28 = vld [vmem:[%s1730_s1 + $0x88] sm:$0xff]   ;;  %v1387_v32 = vld [vmem:[%s1730_s1 + $0x80] sm:$0xff]   ;;  %v1391_v44 = vld [vmem:[%s1730_s1 + $0x1b8] sm:$0xff]  }
  0x24   : > { %1270 = vmatpush3.bf16.msra.mxu1 %v1367_v12  ;;  %1249 = vmatprep.subr.bf16.mxu0 %v1368_v13  ;;  %v247_v33 = vld [vmem:[%s1729_s0] sm:$0xff]  ;;  %v248_v35 = vld [vmem:[%s1729_s0 + $0x8] sm:$0xff]  ;;  %v1392_v45 = vld [vmem:[%s1730_s1 + $0x170] sm:$0xff]  }
  0x25   : > { %1271 = vmatprep.subr.bf16.mxu1 %v1369_v14  ;;  %v251_v34 = vld [vmem:[%s1729_s0 + $0x20] sm:$0xff]  ;;  %v252_v38 = vld [vmem:[%s1729_s0 + $0x28] sm:$0xff]  ;;  %v1393_v46 = vld [vmem:[%s1730_s1 + $0x1f0] sm:$0xff]  }
  0x26   : > { %v1143_v36 = vcombine.low %v247_v33, %v251_v34  ;;  %v1144_v37 = vcombine.high %v247_v33, %v251_v34  ;;  %v1145_v39 = vcombine.low %v248_v35, %v252_v38  ;;  %v1146_v40 = vcombine.high %v248_v35, %v252_v38  ;;  %v1394_v47 = vld [vmem:[%s1730_s1 + $0x130] sm:$0xff]   ;;  %v1396_v49 = vld [vmem:[%s1730_s1 + $0x168] sm:$0xff]   ;;  %v1400_v53 = vld [vmem:[%s1730_s1 + $0x160] sm:$0xff]  }
  0x27   : > { %1250 = vmatpush3.bf16.msra.mxu0 %v1370_v15  ;;  %v1395_v48 = vld [vmem:[%s1730_s1 + $0x1b0] sm:$0xff]   ;;  %v1397_v50 = vld [vmem:[%s1730_s1 + $0x1e8] sm:$0xff]   ;;  %v1401_v54 = vld [vmem:[%s1730_s1 + $0x1e0] sm:$0xff]  }
  0x28   : > { %1272 = vmatpush3.bf16.msra.mxu1 %v1371_v16  ;;  %1251 = vmatprep.subr.bf16.mxu0 %v1372_v17  ;;  %v1398_v51 = vld [vmem:[%s1730_s1 + $0x128] sm:$0xff]   ;;  %v1402_v55 = vld [vmem:[%s1730_s1 + $0x120] sm:$0xff]   ;;  %v1404_v57 = vld [vmem:[%s1730_s1 + $0x158] sm:$0xff]  }
  0x29   : > { %1273 = vmatprep.subr.bf16.mxu1 %v1373_v18  ;;  %839 = vmatprep.mubr.bf16.mxu0 %v1144_v37  ;;  %v1399_v52 = vld [vmem:[%s1730_s1 + $0x1a8] sm:$0xff]   ;;  %v1403_v56 = vld [vmem:[%s1730_s1 + $0x1a0] sm:$0xff]   ;;  %v1405_v58 = vld [vmem:[%s1730_s1 + $0x1d8] sm:$0xff]  }
  0x2a   : > { %880 = vmatprep.mubr.bf16.mxu1 %v1146_v40  ;;  %v1406_v59 = vld [vmem:[%s1730_s1 + $0x118] sm:$0xff]   ;;  %v1408_v61 = vld [vmem:[%s1730_s1 + $0x150] sm:$0xff]   ;;  %v1412_v1 = vld [vmem:[%s1730_s1 + $0x148] sm:$0xff]  }
  0x2b   : > { %1252 = vmatpush3.bf16.msra.mxu0 %v1374_v19  ;;  %v1407_v60 = vld [vmem:[%s1730_s1 + $0x198] sm:$0xff]   ;;  %v1409_v62 = vld [vmem:[%s1730_s1 + $0x1d0] sm:$0xff]   ;;  %v1413_v2 = vld [vmem:[%s1730_s1 + $0x1c8] sm:$0xff]  }
  0x2c   : > { %1274 = vmatpush3.bf16.msra.mxu1 %v1375_v20  ;;  %1253 = vmatprep.subr.bf16.mxu0 %v1376_v21  ;;  %v1410_v63 = vld [vmem:[%s1730_s1 + $0x110] sm:$0xff]   ;;  %v1414_v3 = vld [vmem:[%s1730_s1 + $0x108] sm:$0xff]   ;;  %v1416_v5 = vld [vmem:[%s1730_s1 + $0x140] sm:$0xff]  }
  0x2d   : > { %1275 = vmatprep.subr.bf16.mxu1 %v1377_v22  ;;  %v1411_v0 = vld [vmem:[%s1730_s1 + $0x190] sm:$0xff]   ;;  %v1415_v4 = vld [vmem:[%s1730_s1 + $0x188] sm:$0xff]   ;;  %v1417_v6 = vld [vmem:[%s1730_s1 + $0x1c0] sm:$0xff]  }
  0x2e   : > { %v1418_v7 = vld [vmem:[%s1730_s1 + $0x100] sm:$0xff]   ;;  %v249_v9 = vld [vmem:[%s1729_s0 + $0x10] sm:$0xff]  ;;  %v250_v13 = vld [vmem:[%s1729_s0 + $0x18] sm:$0xff] }
  0x2f   : > { %1254 = vmatpush3.bf16.msra.mxu0 %v1378_v23  ;;  %v1419_v8 = vld [vmem:[%s1730_s1 + $0x180] sm:$0xff]   ;;  %v253_v10 = vld [vmem:[%s1729_s0 + $0x30] sm:$0xff]  ;;  %v254_v14 = vld [vmem:[%s1729_s0 + $0x38] sm:$0xff] }
  0x30   : > { %1276 = vmatpush3.bf16.msra.mxu1 %v1379_v24  ;;  %1255 = vmatprep.subr.bf16.mxu0 %v1380_v25  ;;  %v1147_v11 = vcombine.low %v249_v9, %v253_v10  ;;  %v1148_v12 = vcombine.high %v249_v9, %v253_v10  ;;  %v1149_v15 = vcombine.low %v250_v13, %v254_v14 }
  0x31   : > { %1277 = vmatprep.subr.bf16.mxu1 %v1381_v26  ;;  %v1150_v16 = vcombine.high %v250_v13, %v254_v14 }
  0x33   : > { %1256 = vmatpush3.bf16.msra.mxu0 %v1382_v27 }
  0x34   : > { %1278 = vmatpush3.bf16.msra.mxu1 %v1383_v28  ;;  %1257 = vmatprep.subr.bf16.mxu0 %v1384_v29 }
  0x35   : > { %1279 = vmatprep.subr.bf16.mxu1 %v1385_v30 }
  0x37   : > { %1258 = vmatpush3.bf16.msra.mxu0 %v1386_v31 }
  0x38   : > { %1280 = vmatpush3.bf16.msra.mxu1 %v1387_v32  ;;  %1287 = vmatprep.subr.bf16.mxu0 %v1388_v41 }
  0x39   : > { %1309 = vmatprep.subr.bf16.mxu1 %v1389_v42 }
  0x3a   : > { %840 = vmatmul.mubr.bf16.vlgmr.msra.gmra.mxu0 %v1143_v36 }
  0x3b   : > { %881 = vmatmul.mubr.bf16.vlgmr.msra.gmra.mxu1 %v1145_v39  ;;  %1288 = vmatpush3.bf16.msra.mxu0 %v1390_v43 }
  0x3c   : > { %1310 = vmatpush3.bf16.msra.mxu1 %v1391_v44  ;;  %1289 = vmatprep.subr.bf16.mxu0 %v1392_v45 }
  0x3d   : > { %1311 = vmatprep.subr.bf16.mxu1 %v1393_v46  ;;  %921 = vmatprep.mubr.bf16.mxu0 %v1148_v12 }
  0x3e   : > { %962 = vmatprep.mubr.bf16.mxu1 %v1150_v16 }
  0x3f   : > { %1290 = vmatpush3.bf16.msra.mxu0 %v1394_v47 }
  0x40   : > { %1312 = vmatpush3.bf16.msra.mxu1 %v1395_v48  ;;  %1291 = vmatprep.subr.bf16.mxu0 %v1396_v49 }
  0x41   : > { %1313 = vmatprep.subr.bf16.mxu1 %v1397_v50 }
  0x43   : > { %1292 = vmatpush3.bf16.msra.mxu0 %v1398_v51 }
  0x44   : > { %1314 = vmatpush3.bf16.msra.mxu1 %v1399_v52  ;;  %1293 = vmatprep.subr.bf16.mxu0 %v1400_v53 }
  0x45   : > { %1315 = vmatprep.subr.bf16.mxu1 %v1401_v54 }
  0x47   : > { %1294 = vmatpush3.bf16.msra.mxu0 %v1402_v55 }
  0x48   : > { %1316 = vmatpush3.bf16.msra.mxu1 %v1403_v56  ;;  %1295 = vmatprep.subr.bf16.mxu0 %v1404_v57 }
  0x49   : > { %1317 = vmatprep.subr.bf16.mxu1 %v1405_v58 }
  0x4b   : > { %1296 = vmatpush3.bf16.msra.mxu0 %v1406_v59 }
  0x4c   : > { %1318 = vmatpush3.bf16.msra.mxu1 %v1407_v60  ;;  %1297 = vmatprep.subr.bf16.mxu0 %v1408_v61  ;;  %v984_v61 = vld [vmem:[#allocation3] sm:$0x1] }
  0x4d   : > { %1319 = vmatprep.subr.bf16.mxu1 %v1409_v62 }
  0x4f   : > { %1298 = vmatpush3.bf16.msra.mxu0 %v1410_v63 }
  0x50   : > { %1320 = vmatpush3.bf16.msra.mxu1 %v1411_v0  ;;  %1299 = vmatprep.subr.bf16.mxu0 %v1412_v1  ;;  %v994_v0 = vld [vmem:[#allocation4] sm:$0x1] }
  0x51   : > { %1321 = vmatprep.subr.bf16.mxu1 %v1413_v2 }
  0x53   : > { %1300 = vmatpush3.bf16.msra.mxu0 %v1414_v3 }
  0x54   : > { %1322 = vmatpush3.bf16.msra.mxu1 %v1415_v4  ;;  %1301 = vmatprep.subr.bf16.mxu0 %v1416_v5 }
  0x55   : > { %1323 = vmatprep.subr.bf16.mxu1 %v1417_v6 }
  0x57   : > { %1302 = vmatpush3.bf16.msra.mxu0 %v1418_v7 }
  0x58   : > { %1324 = vmatpush3.bf16.msra.mxu1 %v1419_v8 }
  0x5a   : > { %922 = vmatmul.mubr.bf16.vlgmr.msra.gmra.mxu0 %v1147_v11 }
  0x5b   : > { %963 = vmatmul.mubr.bf16.vlgmr.msra.gmra.mxu1 %v1149_v15 }
  0xfa   : > { %v1259_v17 = vpop.f32.mrf.mxu0 }
  0xfb   : > { %v1281_v18 = vpop.f32.mrf.mxu1 }
  0xfc   : > { %v1260_v19 = vpop.f32.mrf.mxu0 }
  0xfd   : > { %v1282_v20 = vpop.f32.mrf.mxu1  ;;  %v1261_v24 = vadd.f32 %v1260_v19, %v1259_v17 }
  0xfe   : > { %v1262_v21 = vpop.f32.mrf.mxu0  ;;  %v1283_v25 = vadd.f32 %v1282_v20, %v1281_v18 }
  0xff   : > { %v1284_v22 = vpop.f32.mrf.mxu1 }
 0x100   : > { %v1263_v23 = vpop.f32.mrf.mxu0  ;;  %v883_v30 = vadd.f32 %v1283_v25, %v1261_v24 }
 0x101   : > { %v1285_v26 = vpop.f32.mrf.mxu1  ;;  %v1264_v31 = vadd.f32 %v1263_v23, %v1262_v21 }
 0x102   : > { %v1286_v32 = vadd.f32 %v1285_v26, %v1284_v22 }
 0x104   : > { %v886_v39 = vadd.f32 %v1286_v32, %v1264_v31 }
 0x11a   : > { %v1303_v27 = vpop.f32.mrf.mxu0 }
 0x11b   : > { %v1325_v28 = vpop.f32.mrf.mxu1 }
 0x11c   : > { %v1304_v29 = vpop.f32.mrf.mxu0 }
 0x11d   : > { %v1305_v33 = vadd.f32 %v1304_v29, %v1303_v27  ;;  %v1326_v34 = vpop.f32.mrf.mxu1 }
 0x11e   : > { %v1306_v35 = vpop.f32.mrf.mxu0  ;;  %v1327_v40 = vadd.f32 %v1326_v34, %v1325_v28 }
 0x11f   : > { %v924_v36 = vadd.f32 %v1305_v33, %v883_v30  ;;  %v1328_v37 = vpop.f32.mrf.mxu1 }
 0x120   : > { %v1307_v38 = vpop.f32.mrf.mxu0 }
 0x121   : > { %v1308_v41 = vadd.f32 %v1307_v38, %v1306_v35  ;;  %v1329_v42 = vpop.f32.mrf.mxu1  ;;  %v965_v43 = vadd.f32 %v1327_v40, %v924_v36 }
 0x122   : > { %v1330_v45 = vadd.f32 %v1329_v42, %v1328_v37 }
 0x123   : > { %v927_v44 = vadd.f32 %v1308_v41, %v886_v39  ;;  %v995_v47 = vmul.f32 %v965_v43, %v965_v43 }
 0x125   : > { %v968_v46 = vadd.f32 %v1330_v45, %v927_v44 }
 0x127   : > { %v1232_v48 = vpack.c.bf16 %v968_v46, %v965_v43  ;;  %v985_v49 = vadd.f32 %v968_v46, %v965_v43  ;;  %v996_v50 = vmul.f32 %v968_v46, %v968_v46 }
 0x129   : > { %1233 = vst [vmem:[#allocation2] sm:$0xff] %v1232_v48   ;;  %v986_v51 = vrot.slane %v985_v49, 4  ;;  %v997_v52 = vadd.f32 %v996_v50, %v995_v47 }
 0x12b   : > { %v987_v53 = vadd.f32 %v986_v51, %v985_v49  ;;  %v998_v54 = vrot.slane %v997_v52, 4 }
 0x12d   : > { %v988_v55 = vrot.slane %v987_v53, 2  ;;  %v999_v56 = vadd.f32 %v998_v54, %v997_v52 }
 0x12f   : > { %v989_v57 = vadd.f32 %v988_v55, %v987_v53  ;;  %v1000_v58 = vrot.slane %v999_v56, 2 }
 0x131   : > { %v990_v59 = vrot.slane %v989_v57, 1  ;;  %v1001_v60 = vadd.f32 %v1000_v58, %v999_v56 }
 0x133   : > { %v991_v62 = vadd.f32 %v990_v59, %v989_v57  ;;  %v1002_v63 = vrot.slane %v1001_v60, 1 }
 0x135   : > { %v992_v1 = vadd.f32 %v991_v62, %v984_v61  ;;  %v1003_v2 = vadd.f32 %v1002_v63, %v1001_v60 }
 0x137   : > { %993 = vst [vmem:[#allocation3] sm:$0x1] %v992_v1  ;;  %v1004_v3 = vadd.f32 %v1003_v2, %v994_v0 }
 0x139   : > { %1005 = vst [vmem:[#allocation4] sm:$0x1] %v1004_v3 }
 0x13a PF: > { %p1217_p6 = scmp.ne.s32.totalorder %s1436_s15, 1 }
 0x13c   : > { %1009 = sbr.rel (%p1217_p6) target bundleno = 362 (0x16a), region = 48 }
 0x141   : > { %v1010_v4 = vld [vmem:[#allocation3] sm:$0x1]  ;;  %v1012_v5 = vld [vmem:[#allocation4] sm:$0x1]  ;;  %v1032_v12 = vlaneseq  ;;  %v1017_v14 = vld [vmem:[%s1731_s2] sm:$0x1] }
 0x142   : > { %v1011_v6 = vmul.f32 0.5, %v1010_v4  ;;  %v1013_v7 = vmul.f32 0.5, %v1012_v5  ;;  %v1235_v15 = vld [vmem:[#allocation2] sm:$0xff]  }
 0x143   : > { %v1033_v13 = vshrl.u32 %v1032_v12, 7  ;;  %v1236_v19 = vunpack.c.l.bf16 %v1235_v15  ;;  %v1237_v20 = vunpack.c.h.bf16 %v1235_v15  ;;  %v1021_v21 = vld [vmem:[%s1732_s3] sm:$0x1] }
 0x144   : > { %v1014_v8 = vmul.f32 %v1011_v6, %v1011_v6 }
 0x145   : > { %v1034_v16 = vsub.s32 0, %v1033_v13 }
 0x146   : > { %v1015_v9 = vsub.f32 %v1013_v7, %v1014_v8 }
 0x148   : > { %v1016_v10 = vmax.f32 %v1015_v9, 0.0 }
 0x14a   : > { %v1018_v11 = vadd.f32 1e-05, %v1016_v10 }
 0x14c   : > { %1420 = vrsqrt.f32 %v1018_v11 }
 0x159   : > { %v1421_v17 = vpop.eup %1420 }
 0x15a   : > { %v1020_v18 = vmul.f32 %v1421_v17, %v1017_v14 }
 0x15c   : > { %v1022_v22 = vmul.f32 %v1020_v18, %v1011_v6  ;;  %v1035_v23 = vrot.slane %v1020_v18, %v1034_v16 }
 0x15e   : > { %v1023_v24 = vsub.f32 %v1021_v21, %v1022_v22  ;;  %v1037_v25 = vmul.f32 %v1236_v19, %v1035_v23  ;;  %v1038_v26 = vmul.f32 %v1237_v20, %v1035_v23 }
 0x160   : > { %v1043_v27 = vrot.slane %v1023_v24, %v1034_v16 }
 0x162   : > { %v1045_v28 = vadd.f32 %v1043_v27, %v1037_v25  ;;  %v1046_v29 = vadd.f32 %v1043_v27, %v1038_v26 }
 0x164   : > { %vm1047_vm0 = vcmp.ge.f32.partialorder %v1045_v28, 0.0  ;;  %vm1048_vm1 = vcmp.ge.f32.partialorder %v1046_v29, 0.0  ;;  %v1049_v30 = vmul.f32 0.2, %v1045_v28  ;;  %v1050_v31 = vmul.f32 0.2, %v1046_v29 }
 0x166   : > { %v1051_v32 = vsel %vm1047_vm0, %v1045_v28, %v1049_v30  ;;  %v1052_v33 = vsel %vm1048_vm1, %v1046_v29, %v1050_v31 }
 0x167   : > { %v1241_v34 = vpack.c.bf16 %v1052_v33, %v1051_v32 }
 0x169   : > { %1242 = vst [vmem:[%s1733_s4] sm:$0xff] %v1241_v34  }
 0x16a PF: > { %s14_s17 = sadd.s32 1, %s1444_s17   ;;  %s1734_s15 = smov %s1440_s16 }
 0x16b   : > { %p11_p7 = scmp.ge.s32.totalorder %s14_s17, 4   ;;  %s1735_s16 = smov %s1737_s18 }
 0x16d   :  { %13 = sbr.rel (!%p11_p7) target bundleno = 2 (0x2), region = 80 }

</bundles_post_ra>
